<compile_context>
chip_gen: v5e
topology: v5e:2x2
jax: 0.10.0
libtpu: 0.0.40
codegen_flags: <defaults>
</compile_context>

<pallas_src>
import functools

import jax
import jax.numpy as jnp
from jax import lax
from jax.experimental import pallas as pl
from jax.experimental.pallas import tpu as pltpu


# ----------------------------------------------------------------------------
# Fused multi-layer GRU kernel (single grid step).
# ----------------------------------------------------------------------------
def _encoder_gru_kernel(n_layers, T, B, H, *refs):
    # refs = [x, (10 weight refs per layer)..., out_seq, h_fin,
    #         gi_r_scr, gi_z_scr, gi_n_scr, seq_scr]
    x_ref = refs[0]
    w_refs = refs[1:1 + 10 * n_layers]
    out_ref = refs[1 + 10 * n_layers]
    hfin_ref = refs[2 + 10 * n_layers]
    gi_r_scr, gi_z_scr, gi_n_scr, seq_scr = refs[3 + 10 * n_layers:]

    x_all = x_ref[...]                                  # (T*B, In0)

    for l in range(n_layers):
        (wr, wz, wn, ur, uz, un, br, bz, bin_, bhn) = w_refs[10 * l:10 * (l + 1)]

        # Input projection for the whole sequence: one MXU matmul per gate.
        # r/z biases already contain b_ih + b_hh (pre-folded offline).
        gi_r_scr[...] = jnp.dot(x_all, wr[...],
                                preferred_element_type=jnp.float32) + br[...]
        gi_z_scr[...] = jnp.dot(x_all, wz[...],
                                preferred_element_type=jnp.float32) + bz[...]
        gi_n_scr[...] = jnp.dot(x_all, wn[...],
                                preferred_element_type=jnp.float32) + bin_[...]

        # Hoist recurrent weights / bias out of the (unrolled) time loop.
        Ur = ur[...]
        Uz = uz[...]
        Un = un[...]
        Bhn = bhn[...]

        h = jnp.zeros((B, H), jnp.float32)              # h0 = 0 (PyTorch default)
        for t in range(T):                              # static, fully unrolled
            sl = slice(t * B, (t + 1) * B)
            gh_r = jnp.dot(h, Ur, preferred_element_type=jnp.float32)
            gh_z = jnp.dot(h, Uz, preferred_element_type=jnp.float32)
            gh_n = jnp.dot(h, Un, preferred_element_type=jnp.float32) + Bhn
            r = jax.nn.sigmoid(gi_r_scr[sl, :] + gh_r)
            z = jax.nn.sigmoid(gi_z_scr[sl, :] + gh_z)
            n = jnp.tanh(gi_n_scr[sl, :] + r * gh_n)
            h = (1.0 - z) * n + z * h
            seq_scr[sl, :] = h

        hfin_ref[l] = h                                  # final hidden, layer l
        x_all = seq_scr[...]                             # next layer's input

    out_ref[...] = seq_scr[...]                          # single full-block store


def encoder_gru_pallas(x, layers):
    """x: (T, B, E) f32; layers: list of per-layer weight dicts.

    Returns (out_seq (T,B,H), h_fin (n_layers,B,H))."""
    T, B, E = x.shape
    H = layers[0]["whh_r"].shape[0]
    n_layers = len(layers)

    x2d = x.reshape(T * B, E)

    args = [x2d]
    in_specs = [pl.BlockSpec((T * B, E), lambda i: (0, 0))]
    w_names = ("wih_r", "wih_z", "wih_n", "whh_r", "whh_z", "whh_n",
               "b_r", "b_z", "b_in", "b_hn")
    for lyr in layers:
        for name in w_names:
            arr = lyr[name]
            args.append(arr)
            idx = (0,) * arr.ndim
            in_specs.append(pl.BlockSpec(arr.shape, lambda i, idx=idx: idx))

    kernel = functools.partial(_encoder_gru_kernel, n_layers, T, B, H)

    out2d, h_fin = pl.pallas_call(
        kernel,
        out_shape=(jax.ShapeDtypeStruct((T * B, H), jnp.float32),
                   jax.ShapeDtypeStruct((n_layers, B, H), jnp.float32)),
        grid_spec=pltpu.PrefetchScalarGridSpec(
            num_scalar_prefetch=0,
            grid=(1,),                                   # single grid step
            in_specs=in_specs,
            out_specs=[pl.BlockSpec((T * B, H), lambda i: (0, 0)),
                       pl.BlockSpec((n_layers, B, H), lambda i: (0, 0, 0))],
            scratch_shapes=[pltpu.VMEM((T * B, H), jnp.float32)
                            for _ in range(4)],          # gi_r, gi_z, gi_n, seq
        ),
        compiler_params=pltpu.CompilerParams(
            dimension_semantics=("arbitrary",)),
    )(*args)

    return out2d.reshape(T, B, H), h_fin


# ----------------------------------------------------------------------------
# Parameter construction (PyTorch nn.GRU gate order [r | z | n]).
# ----------------------------------------------------------------------------
def init_encoder_params(key, input_dim, embed_dim, latent_dim, n_layers, pad_id):
    keys = jax.random.split(key, 1 + 4 * n_layers)
    emb = jax.random.normal(keys[0], (input_dim, embed_dim), jnp.float32) * 0.1
    emb = emb.at[pad_id].set(0.0)                        # padding_idx row = 0

    H = latent_dim
    layers = []
    scale = 1.0 / jnp.sqrt(latent_dim)
    for l in range(n_layers):
        in_dim = embed_dim if l == 0 else latent_dim
        k0, k1, k2, k3 = keys[1 + 4 * l: 5 + 4 * l]
        w_ih = jax.random.uniform(k0, (3 * H, in_dim), jnp.float32, -scale, scale)
        w_hh = jax.random.uniform(k1, (3 * H, H), jnp.float32, -scale, scale)
        b_ih = jax.random.uniform(k2, (3 * H,), jnp.float32, -scale, scale)
        b_hh = jax.random.uniform(k3, (3 * H,), jnp.float32, -scale, scale)
        layers.append(dict(
            # per-gate, pre-transposed weights: (in_dim, H) / (H, H)
            wih_r=w_ih[0:H].T, wih_z=w_ih[H:2 * H].T, wih_n=w_ih[2 * H:3 * H].T,
            whh_r=w_hh[0:H].T, whh_z=w_hh[H:2 * H].T, whh_n=w_hh[2 * H:3 * H].T,
            # r/z biases folded (b_ih + b_hh); n-gate biases must stay split
            b_r=(b_ih[0:H] + b_hh[0:H]).reshape(1, H),
            b_z=(b_ih[H:2 * H] + b_hh[H:2 * H]).reshape(1, H),
            b_in=b_ih[2 * H:3 * H].reshape(1, H),
            b_hn=b_hh[2 * H:3 * H].reshape(1, H),
        ))
    return dict(emb=emb, layers=layers)


@jax.jit
def encoder_forward(params, tokens):
    """tokens: (T, B) int32 -> (h_last_layer (T,B,H), h (n_layers,B,H))."""
    x = jnp.take(params["emb"], tokens, axis=0)          # (T, B, E) embedding glue
    out_seq, h = encoder_gru_pallas(x, params["layers"])
    return out_seq, h


# ----------------------------------------------------------------------------
# Pure-JAX reference (lax.scan GRU) for correctness checking.
# ----------------------------------------------------------------------------
def encoder_forward_ref(params, tokens):
    x = jnp.take(params["emb"], tokens, axis=0)
    h_finals = []
    for layer in params["layers"]:
        H = layer["whh_r"].shape[0]

        def step(h_prev, x_t, layer=layer):
            r = jax.nn.sigmoid(x_t @ layer["wih_r"] + h_prev @ layer["whh_r"]
                               + layer["b_r"])
            z = jax.nn.sigmoid(x_t @ layer["wih_z"] + h_prev @ layer["whh_z"]
                               + layer["b_z"])
            n = jnp.tanh(x_t @ layer["wih_n"] + layer["b_in"]
                         + r * (h_prev @ layer["whh_n"] + layer["b_hn"]))
            h = (1.0 - z) * n + z * h_prev
            return h, h

        B = x.shape[1]
        h0 = jnp.zeros((B, H), jnp.float32)
        h_fin, ys = lax.scan(step, h0, x)
        x = ys
        h_finals.append(h_fin)
    return x, jnp.stack(h_finals, axis=0)


if __name__ == "__main__":
    input_dim = 11      # vocab size
    embed_dim = 16
    latent_dim = 32
    n_layers = 2
    pad_id = 0
    T, B = 8, 2         # seq-first tokens (T, B)

    key = jax.random.PRNGKey(0)
    pkey, tkey = jax.random.split(key)
    params = init_encoder_params(pkey, input_dim, embed_dim, latent_dim,
                                 n_layers, pad_id)
    tokens = jax.random.randint(tkey, (T, B), 1, input_dim, dtype=jnp.int32)
    tokens = tokens.at[-1, 0].set(pad_id)   # exercise padding_idx row

    h_last_layer, h = encoder_forward(params, tokens)
    jax.block_until_ready((h_last_layer, h))

    h_last_ref, h_ref = encoder_forward_ref(params, tokens)
    assert h_last_layer.shape == (T, B, latent_dim)
    assert h.shape == (n_layers, B, latent_dim)
    assert jnp.allclose(h_last_layer, h_last_ref, atol=1e-4, rtol=1e-4)
    assert jnp.allclose(h, h_ref, atol=1e-4, rtol=1e-4)

    print("KERNEL_OK")
</pallas_src>

<mosaic_0001>
module attributes {stable_mosaic.version = 11 : i64} {
  func.func @_encoder_gru_kernel(%arg0: i32, %arg1: memref<16x16xf32, #tpu.memory_space<vmem>>, %arg2: memref<16x32xf32, #tpu.memory_space<vmem>>, %arg3: memref<16x32xf32, #tpu.memory_space<vmem>>, %arg4: memref<16x32xf32, #tpu.memory_space<vmem>>, %arg5: memref<32x32xf32, #tpu.memory_space<vmem>>, %arg6: memref<32x32xf32, #tpu.memory_space<vmem>>, %arg7: memref<32x32xf32, #tpu.memory_space<vmem>>, %arg8: memref<1x32xf32, #tpu.memory_space<vmem>>, %arg9: memref<1x32xf32, #tpu.memory_space<vmem>>, %arg10: memref<1x32xf32, #tpu.memory_space<vmem>>, %arg11: memref<1x32xf32, #tpu.memory_space<vmem>>, %arg12: memref<32x32xf32, #tpu.memory_space<vmem>>, %arg13: memref<32x32xf32, #tpu.memory_space<vmem>>, %arg14: memref<32x32xf32, #tpu.memory_space<vmem>>, %arg15: memref<32x32xf32, #tpu.memory_space<vmem>>, %arg16: memref<32x32xf32, #tpu.memory_space<vmem>>, %arg17: memref<32x32xf32, #tpu.memory_space<vmem>>, %arg18: memref<1x32xf32, #tpu.memory_space<vmem>>, %arg19: memref<1x32xf32, #tpu.memory_space<vmem>>, %arg20: memref<1x32xf32, #tpu.memory_space<vmem>>, %arg21: memref<1x32xf32, #tpu.memory_space<vmem>>, %arg22: memref<16x32xf32, #tpu.memory_space<vmem>>, %arg23: memref<2x2x32xf32, #tpu.memory_space<vmem>>, %arg24: memref<16x32xf32, #tpu.memory_space<vmem>>, %arg25: memref<16x32xf32, #tpu.memory_space<vmem>>, %arg26: memref<16x32xf32, #tpu.memory_space<vmem>>, %arg27: memref<16x32xf32, #tpu.memory_space<vmem>>) attributes {dimension_semantics = [#tpu.dimension_semantics<arbitrary>], iteration_bounds = array<i64: 1>, scalar_prefetch = 0 : i64, scratch_operands = 4 : i64, tpu.core_type = #tpu.core_type<tc>, window_params = [{pipeline_mode = #tpu.pipeline_mode<synchronous>, transform_indices = @transform_0, window_bounds = array<i64: 16, 16>}, {pipeline_mode = #tpu.pipeline_mode<synchronous>, transform_indices = @transform_1, window_bounds = array<i64: 16, 32>}, {pipeline_mode = #tpu.pipeline_mode<synchronous>, transform_indices = @transform_2, window_bounds = array<i64: 16, 32>}, {pipeline_mode = #tpu.pipeline_mode<synchronous>, transform_indices = @transform_3, window_bounds = array<i64: 16, 32>}, {pipeline_mode = #tpu.pipeline_mode<synchronous>, transform_indices = @transform_4, window_bounds = array<i64: 32, 32>}, {pipeline_mode = #tpu.pipeline_mode<synchronous>, transform_indices = @transform_5, window_bounds = array<i64: 32, 32>}, {pipeline_mode = #tpu.pipeline_mode<synchronous>, transform_indices = @transform_6, window_bounds = array<i64: 32, 32>}, {pipeline_mode = #tpu.pipeline_mode<synchronous>, transform_indices = @transform_7, window_bounds = array<i64: 1, 32>}, {pipeline_mode = #tpu.pipeline_mode<synchronous>, transform_indices = @transform_8, window_bounds = array<i64: 1, 32>}, {pipeline_mode = #tpu.pipeline_mode<synchronous>, transform_indices = @transform_9, window_bounds = array<i64: 1, 32>}, {pipeline_mode = #tpu.pipeline_mode<synchronous>, transform_indices = @transform_10, window_bounds = array<i64: 1, 32>}, {pipeline_mode = #tpu.pipeline_mode<synchronous>, transform_indices = @transform_11, window_bounds = array<i64: 32, 32>}, {pipeline_mode = #tpu.pipeline_mode<synchronous>, transform_indices = @transform_12, window_bounds = array<i64: 32, 32>}, {pipeline_mode = #tpu.pipeline_mode<synchronous>, transform_indices = @transform_13, window_bounds = array<i64: 32, 32>}, {pipeline_mode = #tpu.pipeline_mode<synchronous>, transform_indices = @transform_14, window_bounds = array<i64: 32, 32>}, {pipeline_mode = #tpu.pipeline_mode<synchronous>, transform_indices = @transform_15, window_bounds = array<i64: 32, 32>}, {pipeline_mode = #tpu.pipeline_mode<synchronous>, transform_indices = @transform_16, window_bounds = array<i64: 32, 32>}, {pipeline_mode = #tpu.pipeline_mode<synchronous>, transform_indices = @transform_17, window_bounds = array<i64: 1, 32>}, {pipeline_mode = #tpu.pipeline_mode<synchronous>, transform_indices = @transform_18, window_bounds = array<i64: 1, 32>}, {pipeline_mode = #tpu.pipeline_mode<synchronous>, transform_indices = @transform_19, window_bounds = array<i64: 1, 32>}, {pipeline_mode = #tpu.pipeline_mode<synchronous>, transform_indices = @transform_20, window_bounds = array<i64: 1, 32>}, {pipeline_mode = #tpu.pipeline_mode<synchronous>, transform_indices = @transform_21, window_bounds = array<i64: 16, 32>}, {pipeline_mode = #tpu.pipeline_mode<synchronous>, transform_indices = @transform_22, window_bounds = array<i64: 2, 2, 32>}]} {
    %c0 = arith.constant 0 : index
    %c0_0 = arith.constant 0 : index
    %0 = vector.load %arg1[%c0, %c0_0] : memref<16x16xf32, #tpu.memory_space<vmem>>, vector<16x16xf32>
    %c0_1 = arith.constant 0 : index
    %c0_2 = arith.constant 0 : index
    %1 = vector.load %arg2[%c0_1, %c0_2] : memref<16x32xf32, #tpu.memory_space<vmem>>, vector<16x32xf32>
    %cst = arith.constant dense<0.000000e+00> : vector<16x32xf32>
    %2 = tpu.matmul %0, %1, %cst {dimension_numbers = #tpu.dot_dimension_numbers<[1], [0], [0], [1], [0, 0, 1, 1], [], []>} : vector<16x16xf32>, vector<16x32xf32>, vector<16x32xf32> -> vector<16x32xf32>
    %c0_3 = arith.constant 0 : index
    %c0_4 = arith.constant 0 : index
    %3 = vector.load %arg8[%c0_3, %c0_4] : memref<1x32xf32, #tpu.memory_space<vmem>>, vector<1x32xf32>
    %4 = vector.broadcast %3 : vector<1x32xf32> to vector<16x32xf32>
    %5 = arith.addf %2, %4 : vector<16x32xf32>
    %c0_5 = arith.constant 0 : index
    %c0_6 = arith.constant 0 : index
    %6 = vector.load %arg24[%c0_5, %c0_6] : memref<16x32xf32, #tpu.memory_space<vmem>>, vector<16x32xf32>
    tpu.vector_store %arg24[%c0_5, %c0_6], %5 {strides = array<i32>} : memref<16x32xf32, #tpu.memory_space<vmem>>, vector<16x32xf32>,
    %c0_7 = arith.constant 0 : index
    %c0_8 = arith.constant 0 : index
    %7 = vector.load %arg3[%c0_7, %c0_8] : memref<16x32xf32, #tpu.memory_space<vmem>>, vector<16x32xf32>
    %cst_9 = arith.constant dense<0.000000e+00> : vector<16x32xf32>
    %8 = tpu.matmul %0, %7, %cst_9 {dimension_numbers = #tpu.dot_dimension_numbers<[1], [0], [0], [1], [0, 0, 1, 1], [], []>} : vector<16x16xf32>, vector<16x32xf32>, vector<16x32xf32> -> vector<16x32xf32>
    %c0_10 = arith.constant 0 : index
    %c0_11 = arith.constant 0 : index
    %9 = vector.load %arg9[%c0_10, %c0_11] : memref<1x32xf32, #tpu.memory_space<vmem>>, vector<1x32xf32>
    %10 = vector.broadcast %9 : vector<1x32xf32> to vector<16x32xf32>
    %11 = arith.addf %8, %10 : vector<16x32xf32>
    %c0_12 = arith.constant 0 : index
    %c0_13 = arith.constant 0 : index
    %12 = vector.load %arg25[%c0_12, %c0_13] : memref<16x32xf32, #tpu.memory_space<vmem>>, vector<16x32xf32>
    tpu.vector_store %arg25[%c0_12, %c0_13], %11 {strides = array<i32>} : memref<16x32xf32, #tpu.memory_space<vmem>>, vector<16x32xf32>,
    %c0_14 = arith.constant 0 : index
    %c0_15 = arith.constant 0 : index
    %13 = vector.load %arg4[%c0_14, %c0_15] : memref<16x32xf32, #tpu.memory_space<vmem>>, vector<16x32xf32>
    %cst_16 = arith.constant dense<0.000000e+00> : vector<16x32xf32>
    %14 = tpu.matmul %0, %13, %cst_16 {dimension_numbers = #tpu.dot_dimension_numbers<[1], [0], [0], [1], [0, 0, 1, 1], [], []>} : vector<16x16xf32>, vector<16x32xf32>, vector<16x32xf32> -> vector<16x32xf32>
    %c0_17 = arith.constant 0 : index
    %c0_18 = arith.constant 0 : index
    %15 = vector.load %arg10[%c0_17, %c0_18] : memref<1x32xf32, #tpu.memory_space<vmem>>, vector<1x32xf32>
    %16 = vector.broadcast %15 : vector<1x32xf32> to vector<16x32xf32>
    %17 = arith.addf %14, %16 : vector<16x32xf32>
    %c0_19 = arith.constant 0 : index
    %c0_20 = arith.constant 0 : index
    %18 = vector.load %arg26[%c0_19, %c0_20] : memref<16x32xf32, #tpu.memory_space<vmem>>, vector<16x32xf32>
    tpu.vector_store %arg26[%c0_19, %c0_20], %17 {strides = array<i32>} : memref<16x32xf32, #tpu.memory_space<vmem>>, vector<16x32xf32>,
    %c0_21 = arith.constant 0 : index
    %c0_22 = arith.constant 0 : index
    %19 = vector.load %arg5[%c0_21, %c0_22] : memref<32x32xf32, #tpu.memory_space<vmem>>, vector<32x32xf32>
    %c0_23 = arith.constant 0 : index
    %c0_24 = arith.constant 0 : index
    %20 = vector.load %arg6[%c0_23, %c0_24] : memref<32x32xf32, #tpu.memory_space<vmem>>, vector<32x32xf32>
    %c0_25 = arith.constant 0 : index
    %c0_26 = arith.constant 0 : index
    %21 = vector.load %arg7[%c0_25, %c0_26] : memref<32x32xf32, #tpu.memory_space<vmem>>, vector<32x32xf32>
    %c0_27 = arith.constant 0 : index
    %c0_28 = arith.constant 0 : index
    %22 = vector.load %arg11[%c0_27, %c0_28] : memref<1x32xf32, #tpu.memory_space<vmem>>, vector<1x32xf32>
    %cst_29 = arith.constant 0.000000e+00 : f32
    %23 = vector.broadcast %cst_29 : f32 to vector<2x32xf32>
    %cst_30 = arith.constant dense<0.000000e+00> : vector<2x32xf32>
    %24 = tpu.matmul %23, %19, %cst_30 {dimension_numbers = #tpu.dot_dimension_numbers<[1], [0], [0], [1], [0, 0, 1, 1], [], []>} : vector<2x32xf32>, vector<32x32xf32>, vector<2x32xf32> -> vector<2x32xf32>
    %cst_31 = arith.constant dense<0.000000e+00> : vector<2x32xf32>
    %25 = tpu.matmul %23, %20, %cst_31 {dimension_numbers = #tpu.dot_dimension_numbers<[1], [0], [0], [1], [0, 0, 1, 1], [], []>} : vector<2x32xf32>, vector<32x32xf32>, vector<2x32xf32> -> vector<2x32xf32>
    %cst_32 = arith.constant dense<0.000000e+00> : vector<2x32xf32>
    %26 = tpu.matmul %23, %21, %cst_32 {dimension_numbers = #tpu.dot_dimension_numbers<[1], [0], [0], [1], [0, 0, 1, 1], [], []>} : vector<2x32xf32>, vector<32x32xf32>, vector<2x32xf32> -> vector<2x32xf32>
    %27 = vector.broadcast %22 : vector<1x32xf32> to vector<2x32xf32>
    %28 = arith.addf %26, %27 : vector<2x32xf32>
    %c0_33 = arith.constant 0 : index
    %c0_34 = arith.constant 0 : index
    %29 = vector.load %arg24[%c0_33, %c0_34] : memref<16x32xf32, #tpu.memory_space<vmem>>, vector<2x32xf32>
    %30 = arith.addf %29, %24 : vector<2x32xf32>
    %31 = arith.negf %30 : vector<2x32xf32>
    %32 = math.exp %31 : vector<2x32xf32>
    %cst_35 = arith.constant 1.000000e+00 : f32
    %33 = vector.broadcast %cst_35 : f32 to vector<2x32xf32>
    %34 = arith.addf %33, %32 : vector<2x32xf32>
    %35 = arith.divf %33, %34 : vector<2x32xf32>
    %c0_36 = arith.constant 0 : index
    %c0_37 = arith.constant 0 : index
    %36 = vector.load %arg25[%c0_36, %c0_37] : memref<16x32xf32, #tpu.memory_space<vmem>>, vector<2x32xf32>
    %37 = arith.addf %36, %25 : vector<2x32xf32>
    %38 = arith.negf %37 : vector<2x32xf32>
    %39 = math.exp %38 : vector<2x32xf32>
    %cst_38 = arith.constant 1.000000e+00 : f32
    %40 = vector.broadcast %cst_38 : f32 to vector<2x32xf32>
    %41 = arith.addf %40, %39 : vector<2x32xf32>
    %42 = arith.divf %40, %41 : vector<2x32xf32>
    %c0_39 = arith.constant 0 : index
    %c0_40 = arith.constant 0 : index
    %43 = vector.load %arg26[%c0_39, %c0_40] : memref<16x32xf32, #tpu.memory_space<vmem>>, vector<2x32xf32>
    %44 = arith.mulf %35, %28 : vector<2x32xf32>
    %45 = arith.addf %43, %44 : vector<2x32xf32>
    %46 = math.tanh %45 : vector<2x32xf32>
    %cst_41 = arith.constant 1.000000e+00 : f32
    %47 = vector.broadcast %cst_41 : f32 to vector<2x32xf32>
    %48 = arith.subf %47, %42 : vector<2x32xf32>
    %49 = arith.mulf %48, %46 : vector<2x32xf32>
    %50 = arith.mulf %42, %23 : vector<2x32xf32>
    %51 = arith.addf %49, %50 : vector<2x32xf32>
    %c0_42 = arith.constant 0 : index
    %c0_43 = arith.constant 0 : index
    %52 = vector.load %arg27[%c0_42, %c0_43] : memref<16x32xf32, #tpu.memory_space<vmem>>, vector<2x32xf32>
    tpu.vector_store %arg27[%c0_42, %c0_43], %51 {strides = array<i32>} : memref<16x32xf32, #tpu.memory_space<vmem>>, vector<2x32xf32>,
    %cst_44 = arith.constant dense<0.000000e+00> : vector<2x32xf32>
    %53 = tpu.matmul %51, %19, %cst_44 {dimension_numbers = #tpu.dot_dimension_numbers<[1], [0], [0], [1], [0, 0, 1, 1], [], []>} : vector<2x32xf32>, vector<32x32xf32>, vector<2x32xf32> -> vector<2x32xf32>
    %cst_45 = arith.constant dense<0.000000e+00> : vector<2x32xf32>
    %54 = tpu.matmul %51, %20, %cst_45 {dimension_numbers = #tpu.dot_dimension_numbers<[1], [0], [0], [1], [0, 0, 1, 1], [], []>} : vector<2x32xf32>, vector<32x32xf32>, vector<2x32xf32> -> vector<2x32xf32>
    %cst_46 = arith.constant dense<0.000000e+00> : vector<2x32xf32>
    %55 = tpu.matmul %51, %21, %cst_46 {dimension_numbers = #tpu.dot_dimension_numbers<[1], [0], [0], [1], [0, 0, 1, 1], [], []>} : vector<2x32xf32>, vector<32x32xf32>, vector<2x32xf32> -> vector<2x32xf32>
    %56 = vector.broadcast %22 : vector<1x32xf32> to vector<2x32xf32>
    %57 = arith.addf %55, %56 : vector<2x32xf32>
    %c2 = arith.constant 2 : index
    %c0_47 = arith.constant 0 : index
    %58 = vector.load %arg24[%c2, %c0_47] : memref<16x32xf32, #tpu.memory_space<vmem>>, vector<2x32xf32>
    %59 = arith.addf %58, %53 : vector<2x32xf32>
    %60 = arith.negf %59 : vector<2x32xf32>
    %61 = math.exp %60 : vector<2x32xf32>
    %cst_48 = arith.constant 1.000000e+00 : f32
    %62 = vector.broadcast %cst_48 : f32 to vector<2x32xf32>
    %63 = arith.addf %62, %61 : vector<2x32xf32>
    %64 = arith.divf %62, %63 : vector<2x32xf32>
    %c2_49 = arith.constant 2 : index
    %c0_50 = arith.constant 0 : index
    %65 = vector.load %arg25[%c2_49, %c0_50] : memref<16x32xf32, #tpu.memory_space<vmem>>, vector<2x32xf32>
    %66 = arith.addf %65, %54 : vector<2x32xf32>
    %67 = arith.negf %66 : vector<2x32xf32>
    %68 = math.exp %67 : vector<2x32xf32>
    %cst_51 = arith.constant 1.000000e+00 : f32
    %69 = vector.broadcast %cst_51 : f32 to vector<2x32xf32>
    %70 = arith.addf %69, %68 : vector<2x32xf32>
    %71 = arith.divf %69, %70 : vector<2x32xf32>
    %c2_52 = arith.constant 2 : index
    %c0_53 = arith.constant 0 : index
    %72 = vector.load %arg26[%c2_52, %c0_53] : memref<16x32xf32, #tpu.memory_space<vmem>>, vector<2x32xf32>
    %73 = arith.mulf %64, %57 : vector<2x32xf32>
    %74 = arith.addf %72, %73 : vector<2x32xf32>
    %75 = math.tanh %74 : vector<2x32xf32>
    %cst_54 = arith.constant 1.000000e+00 : f32
    %76 = vector.broadcast %cst_54 : f32 to vector<2x32xf32>
    %77 = arith.subf %76, %71 : vector<2x32xf32>
    %78 = arith.mulf %77, %75 : vector<2x32xf32>
    %79 = arith.mulf %71, %51 : vector<2x32xf32>
    %80 = arith.addf %78, %79 : vector<2x32xf32>
    %c2_55 = arith.constant 2 : index
    %c0_56 = arith.constant 0 : index
    %81 = vector.load %arg27[%c2_55, %c0_56] : memref<16x32xf32, #tpu.memory_space<vmem>>, vector<2x32xf32>
    tpu.vector_store %arg27[%c2_55, %c0_56], %80 {strides = array<i32>} : memref<16x32xf32, #tpu.memory_space<vmem>>, vector<2x32xf32>,
    %cst_57 = arith.constant dense<0.000000e+00> : vector<2x32xf32>
    %82 = tpu.matmul %80, %19, %cst_57 {dimension_numbers = #tpu.dot_dimension_numbers<[1], [0], [0], [1], [0, 0, 1, 1], [], []>} : vector<2x32xf32>, vector<32x32xf32>, vector<2x32xf32> -> vector<2x32xf32>
    %cst_58 = arith.constant dense<0.000000e+00> : vector<2x32xf32>
    %83 = tpu.matmul %80, %20, %cst_58 {dimension_numbers = #tpu.dot_dimension_numbers<[1], [0], [0], [1], [0, 0, 1, 1], [], []>} : vector<2x32xf32>, vector<32x32xf32>, vector<2x32xf32> -> vector<2x32xf32>
    %cst_59 = arith.constant dense<0.000000e+00> : vector<2x32xf32>
    %84 = tpu.matmul %80, %21, %cst_59 {dimension_numbers = #tpu.dot_dimension_numbers<[1], [0], [0], [1], [0, 0, 1, 1], [], []>} : vector<2x32xf32>, vector<32x32xf32>, vector<2x32xf32> -> vector<2x32xf32>
    %85 = vector.broadcast %22 : vector<1x32xf32> to vector<2x32xf32>
    %86 = arith.addf %84, %85 : vector<2x32xf32>
    %c4 = arith.constant 4 : index
    %c0_60 = arith.constant 0 : index
    %87 = vector.load %arg24[%c4, %c0_60] : memref<16x32xf32, #tpu.memory_space<vmem>>, vector<2x32xf32>
    %88 = arith.addf %87, %82 : vector<2x32xf32>
    %89 = arith.negf %88 : vector<2x32xf32>
    %90 = math.exp %89 : vector<2x32xf32>
    %cst_61 = arith.constant 1.000000e+00 : f32
    %91 = vector.broadcast %cst_61 : f32 to vector<2x32xf32>
    %92 = arith.addf %91, %90 : vector<2x32xf32>
    %93 = arith.divf %91, %92 : vector<2x32xf32>
    %c4_62 = arith.constant 4 : index
    %c0_63 = arith.constant 0 : index
    %94 = vector.load %arg25[%c4_62, %c0_63] : memref<16x32xf32, #tpu.memory_space<vmem>>, vector<2x32xf32>
    %95 = arith.addf %94, %83 : vector<2x32xf32>
    %96 = arith.negf %95 : vector<2x32xf32>
    %97 = math.exp %96 : vector<2x32xf32>
    %cst_64 = arith.constant 1.000000e+00 : f32
    %98 = vector.broadcast %cst_64 : f32 to vector<2x32xf32>
    %99 = arith.addf %98, %97 : vector<2x32xf32>
    %100 = arith.divf %98, %99 : vector<2x32xf32>
    %c4_65 = arith.constant 4 : index
    %c0_66 = arith.constant 0 : index
    %101 = vector.load %arg26[%c4_65, %c0_66] : memref<16x32xf32, #tpu.memory_space<vmem>>, vector<2x32xf32>
    %102 = arith.mulf %93, %86 : vector<2x32xf32>
    %103 = arith.addf %101, %102 : vector<2x32xf32>
    %104 = math.tanh %103 : vector<2x32xf32>
    %cst_67 = arith.constant 1.000000e+00 : f32
    %105 = vector.broadcast %cst_67 : f32 to vector<2x32xf32>
    %106 = arith.subf %105, %100 : vector<2x32xf32>
    %107 = arith.mulf %106, %104 : vector<2x32xf32>
    %108 = arith.mulf %100, %80 : vector<2x32xf32>
    %109 = arith.addf %107, %108 : vector<2x32xf32>
    %c4_68 = arith.constant 4 : index
    %c0_69 = arith.constant 0 : index
    %110 = vector.load %arg27[%c4_68, %c0_69] : memref<16x32xf32, #tpu.memory_space<vmem>>, vector<2x32xf32>
    tpu.vector_store %arg27[%c4_68, %c0_69], %109 {strides = array<i32>} : memref<16x32xf32, #tpu.memory_space<vmem>>, vector<2x32xf32>,
    %cst_70 = arith.constant dense<0.000000e+00> : vector<2x32xf32>
    %111 = tpu.matmul %109, %19, %cst_70 {dimension_numbers = #tpu.dot_dimension_numbers<[1], [0], [0], [1], [0, 0, 1, 1], [], []>} : vector<2x32xf32>, vector<32x32xf32>, vector<2x32xf32> -> vector<2x32xf32>
    %cst_71 = arith.constant dense<0.000000e+00> : vector<2x32xf32>
    %112 = tpu.matmul %109, %20, %cst_71 {dimension_numbers = #tpu.dot_dimension_numbers<[1], [0], [0], [1], [0, 0, 1, 1], [], []>} : vector<2x32xf32>, vector<32x32xf32>, vector<2x32xf32> -> vector<2x32xf32>
    %cst_72 = arith.constant dense<0.000000e+00> : vector<2x32xf32>
    %113 = tpu.matmul %109, %21, %cst_72 {dimension_numbers = #tpu.dot_dimension_numbers<[1], [0], [0], [1], [0, 0, 1, 1], [], []>} : vector<2x32xf32>, vector<32x32xf32>, vector<2x32xf32> -> vector<2x32xf32>
    %114 = vector.broadcast %22 : vector<1x32xf32> to vector<2x32xf32>
    %115 = arith.addf %113, %114 : vector<2x32xf32>
    %c6 = arith.constant 6 : index
    %c0_73 = arith.constant 0 : index
    %116 = vector.load %arg24[%c6, %c0_73] : memref<16x32xf32, #tpu.memory_space<vmem>>, vector<2x32xf32>
    %117 = arith.addf %116, %111 : vector<2x32xf32>
    %118 = arith.negf %117 : vector<2x32xf32>
    %119 = math.exp %118 : vector<2x32xf32>
    %cst_74 = arith.constant 1.000000e+00 : f32
    %120 = vector.broadcast %cst_74 : f32 to vector<2x32xf32>
    %121 = arith.addf %120, %119 : vector<2x32xf32>
    %122 = arith.divf %120, %121 : vector<2x32xf32>
    %c6_75 = arith.constant 6 : index
    %c0_76 = arith.constant 0 : index
    %123 = vector.load %arg25[%c6_75, %c0_76] : memref<16x32xf32, #tpu.memory_space<vmem>>, vector<2x32xf32>
    %124 = arith.addf %123, %112 : vector<2x32xf32>
    %125 = arith.negf %124 : vector<2x32xf32>
    %126 = math.exp %125 : vector<2x32xf32>
    %cst_77 = arith.constant 1.000000e+00 : f32
    %127 = vector.broadcast %cst_77 : f32 to vector<2x32xf32>
    %128 = arith.addf %127, %126 : vector<2x32xf32>
    %129 = arith.divf %127, %128 : vector<2x32xf32>
    %c6_78 = arith.constant 6 : index
    %c0_79 = arith.constant 0 : index
    %130 = vector.load %arg26[%c6_78, %c0_79] : memref<16x32xf32, #tpu.memory_space<vmem>>, vector<2x32xf32>
    %131 = arith.mulf %122, %115 : vector<2x32xf32>
    %132 = arith.addf %130, %131 : vector<2x32xf32>
    %133 = math.tanh %132 : vector<2x32xf32>
    %cst_80 = arith.constant 1.000000e+00 : f32
    %134 = vector.broadcast %cst_80 : f32 to vector<2x32xf32>
    %135 = arith.subf %134, %129 : vector<2x32xf32>
    %136 = arith.mulf %135, %133 : vector<2x32xf32>
    %137 = arith.mulf %129, %109 : vector<2x32xf32>
    %138 = arith.addf %136, %137 : vector<2x32xf32>
    %c6_81 = arith.constant 6 : index
    %c0_82 = arith.constant 0 : index
    %139 = vector.load %arg27[%c6_81, %c0_82] : memref<16x32xf32, #tpu.memory_space<vmem>>, vector<2x32xf32>
    tpu.vector_store %arg27[%c6_81, %c0_82], %138 {strides = array<i32>} : memref<16x32xf32, #tpu.memory_space<vmem>>, vector<2x32xf32>,
    %cst_83 = arith.constant dense<0.000000e+00> : vector<2x32xf32>
    %140 = tpu.matmul %138, %19, %cst_83 {dimension_numbers = #tpu.dot_dimension_numbers<[1], [0], [0], [1], [0, 0, 1, 1], [], []>} : vector<2x32xf32>, vector<32x32xf32>, vector<2x32xf32> -> vector<2x32xf32>
    %cst_84 = arith.constant dense<0.000000e+00> : vector<2x32xf32>
    %141 = tpu.matmul %138, %20, %cst_84 {dimension_numbers = #tpu.dot_dimension_numbers<[1], [0], [0], [1], [0, 0, 1, 1], [], []>} : vector<2x32xf32>, vector<32x32xf32>, vector<2x32xf32> -> vector<2x32xf32>
    %cst_85 = arith.constant dense<0.000000e+00> : vector<2x32xf32>
    %142 = tpu.matmul %138, %21, %cst_85 {dimension_numbers = #tpu.dot_dimension_numbers<[1], [0], [0], [1], [0, 0, 1, 1], [], []>} : vector<2x32xf32>, vector<32x32xf32>, vector<2x32xf32> -> vector<2x32xf32>
    %143 = vector.broadcast %22 : vector<1x32xf32> to vector<2x32xf32>
    %144 = arith.addf %142, %143 : vector<2x32xf32>
    %c8 = arith.constant 8 : index
    %c0_86 = arith.constant 0 : index
    %145 = vector.load %arg24[%c8, %c0_86] : memref<16x32xf32, #tpu.memory_space<vmem>>, vector<2x32xf32>
    %146 = arith.addf %145, %140 : vector<2x32xf32>
    %147 = arith.negf %146 : vector<2x32xf32>
    %148 = math.exp %147 : vector<2x32xf32>
    %cst_87 = arith.constant 1.000000e+00 : f32
    %149 = vector.broadcast %cst_87 : f32 to vector<2x32xf32>
    %150 = arith.addf %149, %148 : vector<2x32xf32>
    %151 = arith.divf %149, %150 : vector<2x32xf32>
    %c8_88 = arith.constant 8 : index
    %c0_89 = arith.constant 0 : index
    %152 = vector.load %arg25[%c8_88, %c0_89] : memref<16x32xf32, #tpu.memory_space<vmem>>, vector<2x32xf32>
    %153 = arith.addf %152, %141 : vector<2x32xf32>
    %154 = arith.negf %153 : vector<2x32xf32>
    %155 = math.exp %154 : vector<2x32xf32>
    %cst_90 = arith.constant 1.000000e+00 : f32
    %156 = vector.broadcast %cst_90 : f32 to vector<2x32xf32>
    %157 = arith.addf %156, %155 : vector<2x32xf32>
    %158 = arith.divf %156, %157 : vector<2x32xf32>
    %c8_91 = arith.constant 8 : index
    %c0_92 = arith.constant 0 : index
    %159 = vector.load %arg26[%c8_91, %c0_92] : memref<16x32xf32, #tpu.memory_space<vmem>>, vector<2x32xf32>
    %160 = arith.mulf %151, %144 : vector<2x32xf32>
    %161 = arith.addf %159, %160 : vector<2x32xf32>
    %162 = math.tanh %161 : vector<2x32xf32>
    %cst_93 = arith.constant 1.000000e+00 : f32
    %163 = vector.broadcast %cst_93 : f32 to vector<2x32xf32>
    %164 = arith.subf %163, %158 : vector<2x32xf32>
    %165 = arith.mulf %164, %162 : vector<2x32xf32>
    %166 = arith.mulf %158, %138 : vector<2x32xf32>
    %167 = arith.addf %165, %166 : vector<2x32xf32>
    %c8_94 = arith.constant 8 : index
    %c0_95 = arith.constant 0 : index
    %168 = vector.load %arg27[%c8_94, %c0_95] : memref<16x32xf32, #tpu.memory_space<vmem>>, vector<2x32xf32>
    tpu.vector_store %arg27[%c8_94, %c0_95], %167 {strides = array<i32>} : memref<16x32xf32, #tpu.memory_space<vmem>>, vector<2x32xf32>,
    %cst_96 = arith.constant dense<0.000000e+00> : vector<2x32xf32>
    %169 = tpu.matmul %167, %19, %cst_96 {dimension_numbers = #tpu.dot_dimension_numbers<[1], [0], [0], [1], [0, 0, 1, 1], [], []>} : vector<2x32xf32>, vector<32x32xf32>, vector<2x32xf32> -> vector<2x32xf32>
    %cst_97 = arith.constant dense<0.000000e+00> : vector<2x32xf32>
    %170 = tpu.matmul %167, %20, %cst_97 {dimension_numbers = #tpu.dot_dimension_numbers<[1], [0], [0], [1], [0, 0, 1, 1], [], []>} : vector<2x32xf32>, vector<32x32xf32>, vector<2x32xf32> -> vector<2x32xf32>
    %cst_98 = arith.constant dense<0.000000e+00> : vector<2x32xf32>
    %171 = tpu.matmul %167, %21, %cst_98 {dimension_numbers = #tpu.dot_dimension_numbers<[1], [0], [0], [1], [0, 0, 1, 1], [], []>} : vector<2x32xf32>, vector<32x32xf32>, vector<2x32xf32> -> vector<2x32xf32>
    %172 = vector.broadcast %22 : vector<1x32xf32> to vector<2x32xf32>
    %173 = arith.addf %171, %172 : vector<2x32xf32>
    %c10 = arith.constant 10 : index
    %c0_99 = arith.constant 0 : index
    %174 = vector.load %arg24[%c10, %c0_99] : memref<16x32xf32, #tpu.memory_space<vmem>>, vector<2x32xf32>
    %175 = arith.addf %174, %169 : vector<2x32xf32>
    %176 = arith.negf %175 : vector<2x32xf32>
    %177 = math.exp %176 : vector<2x32xf32>
    %cst_100 = arith.constant 1.000000e+00 : f32
    %178 = vector.broadcast %cst_100 : f32 to vector<2x32xf32>
    %179 = arith.addf %178, %177 : vector<2x32xf32>
    %180 = arith.divf %178, %179 : vector<2x32xf32>
    %c10_101 = arith.constant 10 : index
    %c0_102 = arith.constant 0 : index
    %181 = vector.load %arg25[%c10_101, %c0_102] : memref<16x32xf32, #tpu.memory_space<vmem>>, vector<2x32xf32>
    %182 = arith.addf %181, %170 : vector<2x32xf32>
    %183 = arith.negf %182 : vector<2x32xf32>
    %184 = math.exp %183 : vector<2x32xf32>
    %cst_103 = arith.constant 1.000000e+00 : f32
    %185 = vector.broadcast %cst_103 : f32 to vector<2x32xf32>
    %186 = arith.addf %185, %184 : vector<2x32xf32>
    %187 = arith.divf %185, %186 : vector<2x32xf32>
    %c10_104 = arith.constant 10 : index
    %c0_105 = arith.constant 0 : index
    %188 = vector.load %arg26[%c10_104, %c0_105] : memref<16x32xf32, #tpu.memory_space<vmem>>, vector<2x32xf32>
    %189 = arith.mulf %180, %173 : vector<2x32xf32>
    %190 = arith.addf %188, %189 : vector<2x32xf32>
    %191 = math.tanh %190 : vector<2x32xf32>
    %cst_106 = arith.constant 1.000000e+00 : f32
    %192 = vector.broadcast %cst_106 : f32 to vector<2x32xf32>
    %193 = arith.subf %192, %187 : vector<2x32xf32>
    %194 = arith.mulf %193, %191 : vector<2x32xf32>
    %195 = arith.mulf %187, %167 : vector<2x32xf32>
    %196 = arith.addf %194, %195 : vector<2x32xf32>
    %c10_107 = arith.constant 10 : index
    %c0_108 = arith.constant 0 : index
    %197 = vector.load %arg27[%c10_107, %c0_108] : memref<16x32xf32, #tpu.memory_space<vmem>>, vector<2x32xf32>
    tpu.vector_store %arg27[%c10_107, %c0_108], %196 {strides = array<i32>} : memref<16x32xf32, #tpu.memory_space<vmem>>, vector<2x32xf32>,
    %cst_109 = arith.constant dense<0.000000e+00> : vector<2x32xf32>
    %198 = tpu.matmul %196, %19, %cst_109 {dimension_numbers = #tpu.dot_dimension_numbers<[1], [0], [0], [1], [0, 0, 1, 1], [], []>} : vector<2x32xf32>, vector<32x32xf32>, vector<2x32xf32> -> vector<2x32xf32>
    %cst_110 = arith.constant dense<0.000000e+00> : vector<2x32xf32>
    %199 = tpu.matmul %196, %20, %cst_110 {dimension_numbers = #tpu.dot_dimension_numbers<[1], [0], [0], [1], [0, 0, 1, 1], [], []>} : vector<2x32xf32>, vector<32x32xf32>, vector<2x32xf32> -> vector<2x32xf32>
    %cst_111 = arith.constant dense<0.000000e+00> : vector<2x32xf32>
    %200 = tpu.matmul %196, %21, %cst_111 {dimension_numbers = #tpu.dot_dimension_numbers<[1], [0], [0], [1], [0, 0, 1, 1], [], []>} : vector<2x32xf32>, vector<32x32xf32>, vector<2x32xf32> -> vector<2x32xf32>
    %201 = vector.broadcast %22 : vector<1x32xf32> to vector<2x32xf32>
    %202 = arith.addf %200, %201 : vector<2x32xf32>
    %c12 = arith.constant 12 : index
    %c0_112 = arith.constant 0 : index
    %203 = vector.load %arg24[%c12, %c0_112] : memref<16x32xf32, #tpu.memory_space<vmem>>, vector<2x32xf32>
    %204 = arith.addf %203, %198 : vector<2x32xf32>
    %205 = arith.negf %204 : vector<2x32xf32>
    %206 = math.exp %205 : vector<2x32xf32>
    %cst_113 = arith.constant 1.000000e+00 : f32
    %207 = vector.broadcast %cst_113 : f32 to vector<2x32xf32>
    %208 = arith.addf %207, %206 : vector<2x32xf32>
    %209 = arith.divf %207, %208 : vector<2x32xf32>
    %c12_114 = arith.constant 12 : index
    %c0_115 = arith.constant 0 : index
    %210 = vector.load %arg25[%c12_114, %c0_115] : memref<16x32xf32, #tpu.memory_space<vmem>>, vector<2x32xf32>
    %211 = arith.addf %210, %199 : vector<2x32xf32>
    %212 = arith.negf %211 : vector<2x32xf32>
    %213 = math.exp %212 : vector<2x32xf32>
    %cst_116 = arith.constant 1.000000e+00 : f32
    %214 = vector.broadcast %cst_116 : f32 to vector<2x32xf32>
    %215 = arith.addf %214, %213 : vector<2x32xf32>
    %216 = arith.divf %214, %215 : vector<2x32xf32>
    %c12_117 = arith.constant 12 : index
    %c0_118 = arith.constant 0 : index
    %217 = vector.load %arg26[%c12_117, %c0_118] : memref<16x32xf32, #tpu.memory_space<vmem>>, vector<2x32xf32>
    %218 = arith.mulf %209, %202 : vector<2x32xf32>
    %219 = arith.addf %217, %218 : vector<2x32xf32>
    %220 = math.tanh %219 : vector<2x32xf32>
    %cst_119 = arith.constant 1.000000e+00 : f32
    %221 = vector.broadcast %cst_119 : f32 to vector<2x32xf32>
    %222 = arith.subf %221, %216 : vector<2x32xf32>
    %223 = arith.mulf %222, %220 : vector<2x32xf32>
    %224 = arith.mulf %216, %196 : vector<2x32xf32>
    %225 = arith.addf %223, %224 : vector<2x32xf32>
    %c12_120 = arith.constant 12 : index
    %c0_121 = arith.constant 0 : index
    %226 = vector.load %arg27[%c12_120, %c0_121] : memref<16x32xf32, #tpu.memory_space<vmem>>, vector<2x32xf32>
    tpu.vector_store %arg27[%c12_120, %c0_121], %225 {strides = array<i32>} : memref<16x32xf32, #tpu.memory_space<vmem>>, vector<2x32xf32>,
    %cst_122 = arith.constant dense<0.000000e+00> : vector<2x32xf32>
    %227 = tpu.matmul %225, %19, %cst_122 {dimension_numbers = #tpu.dot_dimension_numbers<[1], [0], [0], [1], [0, 0, 1, 1], [], []>} : vector<2x32xf32>, vector<32x32xf32>, vector<2x32xf32> -> vector<2x32xf32>
    %cst_123 = arith.constant dense<0.000000e+00> : vector<2x32xf32>
    %228 = tpu.matmul %225, %20, %cst_123 {dimension_numbers = #tpu.dot_dimension_numbers<[1], [0], [0], [1], [0, 0, 1, 1], [], []>} : vector<2x32xf32>, vector<32x32xf32>, vector<2x32xf32> -> vector<2x32xf32>
    %cst_124 = arith.constant dense<0.000000e+00> : vector<2x32xf32>
    %229 = tpu.matmul %225, %21, %cst_124 {dimension_numbers = #tpu.dot_dimension_numbers<[1], [0], [0], [1], [0, 0, 1, 1], [], []>} : vector<2x32xf32>, vector<32x32xf32>, vector<2x32xf32> -> vector<2x32xf32>
    %230 = vector.broadcast %22 : vector<1x32xf32> to vector<2x32xf32>
    %231 = arith.addf %229, %230 : vector<2x32xf32>
    %c14 = arith.constant 14 : index
    %c0_125 = arith.constant 0 : index
    %232 = vector.load %arg24[%c14, %c0_125] : memref<16x32xf32, #tpu.memory_space<vmem>>, vector<2x32xf32>
    %233 = arith.addf %232, %227 : vector<2x32xf32>
    %234 = arith.negf %233 : vector<2x32xf32>
    %235 = math.exp %234 : vector<2x32xf32>
    %cst_126 = arith.constant 1.000000e+00 : f32
    %236 = vector.broadcast %cst_126 : f32 to vector<2x32xf32>
    %237 = arith.addf %236, %235 : vector<2x32xf32>
    %238 = arith.divf %236, %237 : vector<2x32xf32>
    %c14_127 = arith.constant 14 : index
    %c0_128 = arith.constant 0 : index
    %239 = vector.load %arg25[%c14_127, %c0_128] : memref<16x32xf32, #tpu.memory_space<vmem>>, vector<2x32xf32>
    %240 = arith.addf %239, %228 : vector<2x32xf32>
    %241 = arith.negf %240 : vector<2x32xf32>
    %242 = math.exp %241 : vector<2x32xf32>
    %cst_129 = arith.constant 1.000000e+00 : f32
    %243 = vector.broadcast %cst_129 : f32 to vector<2x32xf32>
    %244 = arith.addf %243, %242 : vector<2x32xf32>
    %245 = arith.divf %243, %244 : vector<2x32xf32>
    %c14_130 = arith.constant 14 : index
    %c0_131 = arith.constant 0 : index
    %246 = vector.load %arg26[%c14_130, %c0_131] : memref<16x32xf32, #tpu.memory_space<vmem>>, vector<2x32xf32>
    %247 = arith.mulf %238, %231 : vector<2x32xf32>
    %248 = arith.addf %246, %247 : vector<2x32xf32>
    %249 = math.tanh %248 : vector<2x32xf32>
    %cst_132 = arith.constant 1.000000e+00 : f32
    %250 = vector.broadcast %cst_132 : f32 to vector<2x32xf32>
    %251 = arith.subf %250, %245 : vector<2x32xf32>
    %252 = arith.mulf %251, %249 : vector<2x32xf32>
    %253 = arith.mulf %245, %225 : vector<2x32xf32>
    %254 = arith.addf %252, %253 : vector<2x32xf32>
    %c14_133 = arith.constant 14 : index
    %c0_134 = arith.constant 0 : index
    %255 = vector.load %arg27[%c14_133, %c0_134] : memref<16x32xf32, #tpu.memory_space<vmem>>, vector<2x32xf32>
    tpu.vector_store %arg27[%c14_133, %c0_134], %254 {strides = array<i32>} : memref<16x32xf32, #tpu.memory_space<vmem>>, vector<2x32xf32>,
    %c0_135 = arith.constant 0 : index
    %c0_136 = arith.constant 0 : index
    %c0_137 = arith.constant 0 : index
    %256 = vector.load %arg23[%c0_135, %c0_136, %c0_137] : memref<2x2x32xf32, #tpu.memory_space<vmem>>, vector<1x2x32xf32>
    %257 = vector.shape_cast %256 : vector<1x2x32xf32> to vector<2x32xf32>
    %258 = vector.shape_cast %254 : vector<2x32xf32> to vector<1x2x32xf32>
    tpu.vector_store %arg23[%c0_135, %c0_136, %c0_137], %258 {strides = array<i32>} : memref<2x2x32xf32, #tpu.memory_space<vmem>>, vector<1x2x32xf32>,
    %c0_138 = arith.constant 0 : index
    %c0_139 = arith.constant 0 : index
    %259 = vector.load %arg27[%c0_138, %c0_139] : memref<16x32xf32, #tpu.memory_space<vmem>>, vector<16x32xf32>
    %c0_140 = arith.constant 0 : index
    %c0_141 = arith.constant 0 : index
    %260 = vector.load %arg12[%c0_140, %c0_141] : memref<32x32xf32, #tpu.memory_space<vmem>>, vector<32x32xf32>
    %cst_142 = arith.constant dense<0.000000e+00> : vector<16x32xf32>
    %261 = tpu.matmul %259, %260, %cst_142 {dimension_numbers = #tpu.dot_dimension_numbers<[1], [0], [0], [1], [0, 0, 1, 1], [], []>} : vector<16x32xf32>, vector<32x32xf32>, vector<16x32xf32> -> vector<16x32xf32>
    %c0_143 = arith.constant 0 : index
    %c0_144 = arith.constant 0 : index
    %262 = vector.load %arg18[%c0_143, %c0_144] : memref<1x32xf32, #tpu.memory_space<vmem>>, vector<1x32xf32>
    %263 = vector.broadcast %262 : vector<1x32xf32> to vector<16x32xf32>
    %264 = arith.addf %261, %263 : vector<16x32xf32>
    %c0_145 = arith.constant 0 : index
    %c0_146 = arith.constant 0 : index
    %265 = vector.load %arg24[%c0_145, %c0_146] : memref<16x32xf32, #tpu.memory_space<vmem>>, vector<16x32xf32>
    tpu.vector_store %arg24[%c0_145, %c0_146], %264 {strides = array<i32>} : memref<16x32xf32, #tpu.memory_space<vmem>>, vector<16x32xf32>,
    %c0_147 = arith.constant 0 : index
    %c0_148 = arith.constant 0 : index
    %266 = vector.load %arg13[%c0_147, %c0_148] : memref<32x32xf32, #tpu.memory_space<vmem>>, vector<32x32xf32>
    %cst_149 = arith.constant dense<0.000000e+00> : vector<16x32xf32>
    %267 = tpu.matmul %259, %266, %cst_149 {dimension_numbers = #tpu.dot_dimension_numbers<[1], [0], [0], [1], [0, 0, 1, 1], [], []>} : vector<16x32xf32>, vector<32x32xf32>, vector<16x32xf32> -> vector<16x32xf32>
    %c0_150 = arith.constant 0 : index
    %c0_151 = arith.constant 0 : index
    %268 = vector.load %arg19[%c0_150, %c0_151] : memref<1x32xf32, #tpu.memory_space<vmem>>, vector<1x32xf32>
    %269 = vector.broadcast %268 : vector<1x32xf32> to vector<16x32xf32>
    %270 = arith.addf %267, %269 : vector<16x32xf32>
    %c0_152 = arith.constant 0 : index
    %c0_153 = arith.constant 0 : index
    %271 = vector.load %arg25[%c0_152, %c0_153] : memref<16x32xf32, #tpu.memory_space<vmem>>, vector<16x32xf32>
    tpu.vector_store %arg25[%c0_152, %c0_153], %270 {strides = array<i32>} : memref<16x32xf32, #tpu.memory_space<vmem>>, vector<16x32xf32>,
    %c0_154 = arith.constant 0 : index
    %c0_155 = arith.constant 0 : index
    %272 = vector.load %arg14[%c0_154, %c0_155] : memref<32x32xf32, #tpu.memory_space<vmem>>, vector<32x32xf32>
    %cst_156 = arith.constant dense<0.000000e+00> : vector<16x32xf32>
    %273 = tpu.matmul %259, %272, %cst_156 {dimension_numbers = #tpu.dot_dimension_numbers<[1], [0], [0], [1], [0, 0, 1, 1], [], []>} : vector<16x32xf32>, vector<32x32xf32>, vector<16x32xf32> -> vector<16x32xf32>
    %c0_157 = arith.constant 0 : index
    %c0_158 = arith.constant 0 : index
    %274 = vector.load %arg20[%c0_157, %c0_158] : memref<1x32xf32, #tpu.memory_space<vmem>>, vector<1x32xf32>
    %275 = vector.broadcast %274 : vector<1x32xf32> to vector<16x32xf32>
    %276 = arith.addf %273, %275 : vector<16x32xf32>
    %c0_159 = arith.constant 0 : index
    %c0_160 = arith.constant 0 : index
    %277 = vector.load %arg26[%c0_159, %c0_160] : memref<16x32xf32, #tpu.memory_space<vmem>>, vector<16x32xf32>
    tpu.vector_store %arg26[%c0_159, %c0_160], %276 {strides = array<i32>} : memref<16x32xf32, #tpu.memory_space<vmem>>, vector<16x32xf32>,
    %c0_161 = arith.constant 0 : index
    %c0_162 = arith.constant 0 : index
    %278 = vector.load %arg15[%c0_161, %c0_162] : memref<32x32xf32, #tpu.memory_space<vmem>>, vector<32x32xf32>
    %c0_163 = arith.constant 0 : index
    %c0_164 = arith.constant 0 : index
    %279 = vector.load %arg16[%c0_163, %c0_164] : memref<32x32xf32, #tpu.memory_space<vmem>>, vector<32x32xf32>
    %c0_165 = arith.constant 0 : index
    %c0_166 = arith.constant 0 : index
    %280 = vector.load %arg17[%c0_165, %c0_166] : memref<32x32xf32, #tpu.memory_space<vmem>>, vector<32x32xf32>
    %c0_167 = arith.constant 0 : index
    %c0_168 = arith.constant 0 : index
    %281 = vector.load %arg21[%c0_167, %c0_168] : memref<1x32xf32, #tpu.memory_space<vmem>>, vector<1x32xf32>
    %cst_169 = arith.constant 0.000000e+00 : f32
    %282 = vector.broadcast %cst_169 : f32 to vector<2x32xf32>
    %cst_170 = arith.constant dense<0.000000e+00> : vector<2x32xf32>
    %283 = tpu.matmul %282, %278, %cst_170 {dimension_numbers = #tpu.dot_dimension_numbers<[1], [0], [0], [1], [0, 0, 1, 1], [], []>} : vector<2x32xf32>, vector<32x32xf32>, vector<2x32xf32> -> vector<2x32xf32>
    %cst_171 = arith.constant dense<0.000000e+00> : vector<2x32xf32>
    %284 = tpu.matmul %282, %279, %cst_171 {dimension_numbers = #tpu.dot_dimension_numbers<[1], [0], [0], [1], [0, 0, 1, 1], [], []>} : vector<2x32xf32>, vector<32x32xf32>, vector<2x32xf32> -> vector<2x32xf32>
    %cst_172 = arith.constant dense<0.000000e+00> : vector<2x32xf32>
    %285 = tpu.matmul %282, %280, %cst_172 {dimension_numbers = #tpu.dot_dimension_numbers<[1], [0], [0], [1], [0, 0, 1, 1], [], []>} : vector<2x32xf32>, vector<32x32xf32>, vector<2x32xf32> -> vector<2x32xf32>
    %286 = vector.broadcast %281 : vector<1x32xf32> to vector<2x32xf32>
    %287 = arith.addf %285, %286 : vector<2x32xf32>
    %c0_173 = arith.constant 0 : index
    %c0_174 = arith.constant 0 : index
    %288 = vector.load %arg24[%c0_173, %c0_174] : memref<16x32xf32, #tpu.memory_space<vmem>>, vector<2x32xf32>
    %289 = arith.addf %288, %283 : vector<2x32xf32>
    %290 = arith.negf %289 : vector<2x32xf32>
    %291 = math.exp %290 : vector<2x32xf32>
    %cst_175 = arith.constant 1.000000e+00 : f32
    %292 = vector.broadcast %cst_175 : f32 to vector<2x32xf32>
    %293 = arith.addf %292, %291 : vector<2x32xf32>
    %294 = arith.divf %292, %293 : vector<2x32xf32>
    %c0_176 = arith.constant 0 : index
    %c0_177 = arith.constant 0 : index
    %295 = vector.load %arg25[%c0_176, %c0_177] : memref<16x32xf32, #tpu.memory_space<vmem>>, vector<2x32xf32>
    %296 = arith.addf %295, %284 : vector<2x32xf32>
    %297 = arith.negf %296 : vector<2x32xf32>
    %298 = math.exp %297 : vector<2x32xf32>
    %cst_178 = arith.constant 1.000000e+00 : f32
    %299 = vector.broadcast %cst_178 : f32 to vector<2x32xf32>
    %300 = arith.addf %299, %298 : vector<2x32xf32>
    %301 = arith.divf %299, %300 : vector<2x32xf32>
    %c0_179 = arith.constant 0 : index
    %c0_180 = arith.constant 0 : index
    %302 = vector.load %arg26[%c0_179, %c0_180] : memref<16x32xf32, #tpu.memory_space<vmem>>, vector<2x32xf32>
    %303 = arith.mulf %294, %287 : vector<2x32xf32>
    %304 = arith.addf %302, %303 : vector<2x32xf32>
    %305 = math.tanh %304 : vector<2x32xf32>
    %cst_181 = arith.constant 1.000000e+00 : f32
    %306 = vector.broadcast %cst_181 : f32 to vector<2x32xf32>
    %307 = arith.subf %306, %301 : vector<2x32xf32>
    %308 = arith.mulf %307, %305 : vector<2x32xf32>
    %309 = arith.mulf %301, %282 : vector<2x32xf32>
    %310 = arith.addf %308, %309 : vector<2x32xf32>
    %c0_182 = arith.constant 0 : index
    %c0_183 = arith.constant 0 : index
    %311 = vector.load %arg27[%c0_182, %c0_183] : memref<16x32xf32, #tpu.memory_space<vmem>>, vector<2x32xf32>
    tpu.vector_store %arg27[%c0_182, %c0_183], %310 {strides = array<i32>} : memref<16x32xf32, #tpu.memory_space<vmem>>, vector<2x32xf32>,
    %cst_184 = arith.constant dense<0.000000e+00> : vector<2x32xf32>
    %312 = tpu.matmul %310, %278, %cst_184 {dimension_numbers = #tpu.dot_dimension_numbers<[1], [0], [0], [1], [0, 0, 1, 1], [], []>} : vector<2x32xf32>, vector<32x32xf32>, vector<2x32xf32> -> vector<2x32xf32>
    %cst_185 = arith.constant dense<0.000000e+00> : vector<2x32xf32>
    %313 = tpu.matmul %310, %279, %cst_185 {dimension_numbers = #tpu.dot_dimension_numbers<[1], [0], [0], [1], [0, 0, 1, 1], [], []>} : vector<2x32xf32>, vector<32x32xf32>, vector<2x32xf32> -> vector<2x32xf32>
    %cst_186 = arith.constant dense<0.000000e+00> : vector<2x32xf32>
    %314 = tpu.matmul %310, %280, %cst_186 {dimension_numbers = #tpu.dot_dimension_numbers<[1], [0], [0], [1], [0, 0, 1, 1], [], []>} : vector<2x32xf32>, vector<32x32xf32>, vector<2x32xf32> -> vector<2x32xf32>
    %315 = vector.broadcast %281 : vector<1x32xf32> to vector<2x32xf32>
    %316 = arith.addf %314, %315 : vector<2x32xf32>
    %c2_187 = arith.constant 2 : index
    %c0_188 = arith.constant 0 : index
    %317 = vector.load %arg24[%c2_187, %c0_188] : memref<16x32xf32, #tpu.memory_space<vmem>>, vector<2x32xf32>
    %318 = arith.addf %317, %312 : vector<2x32xf32>
    %319 = arith.negf %318 : vector<2x32xf32>
    %320 = math.exp %319 : vector<2x32xf32>
    %cst_189 = arith.constant 1.000000e+00 : f32
    %321 = vector.broadcast %cst_189 : f32 to vector<2x32xf32>
    %322 = arith.addf %321, %320 : vector<2x32xf32>
    %323 = arith.divf %321, %322 : vector<2x32xf32>
    %c2_190 = arith.constant 2 : index
    %c0_191 = arith.constant 0 : index
    %324 = vector.load %arg25[%c2_190, %c0_191] : memref<16x32xf32, #tpu.memory_space<vmem>>, vector<2x32xf32>
    %325 = arith.addf %324, %313 : vector<2x32xf32>
    %326 = arith.negf %325 : vector<2x32xf32>
    %327 = math.exp %326 : vector<2x32xf32>
    %cst_192 = arith.constant 1.000000e+00 : f32
    %328 = vector.broadcast %cst_192 : f32 to vector<2x32xf32>
    %329 = arith.addf %328, %327 : vector<2x32xf32>
    %330 = arith.divf %328, %329 : vector<2x32xf32>
    %c2_193 = arith.constant 2 : index
    %c0_194 = arith.constant 0 : index
    %331 = vector.load %arg26[%c2_193, %c0_194] : memref<16x32xf32, #tpu.memory_space<vmem>>, vector<2x32xf32>
    %332 = arith.mulf %323, %316 : vector<2x32xf32>
    %333 = arith.addf %331, %332 : vector<2x32xf32>
    %334 = math.tanh %333 : vector<2x32xf32>
    %cst_195 = arith.constant 1.000000e+00 : f32
    %335 = vector.broadcast %cst_195 : f32 to vector<2x32xf32>
    %336 = arith.subf %335, %330 : vector<2x32xf32>
    %337 = arith.mulf %336, %334 : vector<2x32xf32>
    %338 = arith.mulf %330, %310 : vector<2x32xf32>
    %339 = arith.addf %337, %338 : vector<2x32xf32>
    %c2_196 = arith.constant 2 : index
    %c0_197 = arith.constant 0 : index
    %340 = vector.load %arg27[%c2_196, %c0_197] : memref<16x32xf32, #tpu.memory_space<vmem>>, vector<2x32xf32>
    tpu.vector_store %arg27[%c2_196, %c0_197], %339 {strides = array<i32>} : memref<16x32xf32, #tpu.memory_space<vmem>>, vector<2x32xf32>,
    %cst_198 = arith.constant dense<0.000000e+00> : vector<2x32xf32>
    %341 = tpu.matmul %339, %278, %cst_198 {dimension_numbers = #tpu.dot_dimension_numbers<[1], [0], [0], [1], [0, 0, 1, 1], [], []>} : vector<2x32xf32>, vector<32x32xf32>, vector<2x32xf32> -> vector<2x32xf32>
    %cst_199 = arith.constant dense<0.000000e+00> : vector<2x32xf32>
    %342 = tpu.matmul %339, %279, %cst_199 {dimension_numbers = #tpu.dot_dimension_numbers<[1], [0], [0], [1], [0, 0, 1, 1], [], []>} : vector<2x32xf32>, vector<32x32xf32>, vector<2x32xf32> -> vector<2x32xf32>
    %cst_200 = arith.constant dense<0.000000e+00> : vector<2x32xf32>
    %343 = tpu.matmul %339, %280, %cst_200 {dimension_numbers = #tpu.dot_dimension_numbers<[1], [0], [0], [1], [0, 0, 1, 1], [], []>} : vector<2x32xf32>, vector<32x32xf32>, vector<2x32xf32> -> vector<2x32xf32>
    %344 = vector.broadcast %281 : vector<1x32xf32> to vector<2x32xf32>
    %345 = arith.addf %343, %344 : vector<2x32xf32>
    %c4_201 = arith.constant 4 : index
    %c0_202 = arith.constant 0 : index
    %346 = vector.load %arg24[%c4_201, %c0_202] : memref<16x32xf32, #tpu.memory_space<vmem>>, vector<2x32xf32>
    %347 = arith.addf %346, %341 : vector<2x32xf32>
    %348 = arith.negf %347 : vector<2x32xf32>
    %349 = math.exp %348 : vector<2x32xf32>
    %cst_203 = arith.constant 1.000000e+00 : f32
    %350 = vector.broadcast %cst_203 : f32 to vector<2x32xf32>
    %351 = arith.addf %350, %349 : vector<2x32xf32>
    %352 = arith.divf %350, %351 : vector<2x32xf32>
    %c4_204 = arith.constant 4 : index
    %c0_205 = arith.constant 0 : index
    %353 = vector.load %arg25[%c4_204, %c0_205] : memref<16x32xf32, #tpu.memory_space<vmem>>, vector<2x32xf32>
    %354 = arith.addf %353, %342 : vector<2x32xf32>
    %355 = arith.negf %354 : vector<2x32xf32>
    %356 = math.exp %355 : vector<2x32xf32>
    %cst_206 = arith.constant 1.000000e+00 : f32
    %357 = vector.broadcast %cst_206 : f32 to vector<2x32xf32>
    %358 = arith.addf %357, %356 : vector<2x32xf32>
    %359 = arith.divf %357, %358 : vector<2x32xf32>
    %c4_207 = arith.constant 4 : index
    %c0_208 = arith.constant 0 : index
    %360 = vector.load %arg26[%c4_207, %c0_208] : memref<16x32xf32, #tpu.memory_space<vmem>>, vector<2x32xf32>
    %361 = arith.mulf %352, %345 : vector<2x32xf32>
    %362 = arith.addf %360, %361 : vector<2x32xf32>
    %363 = math.tanh %362 : vector<2x32xf32>
    %cst_209 = arith.constant 1.000000e+00 : f32
    %364 = vector.broadcast %cst_209 : f32 to vector<2x32xf32>
    %365 = arith.subf %364, %359 : vector<2x32xf32>
    %366 = arith.mulf %365, %363 : vector<2x32xf32>
    %367 = arith.mulf %359, %339 : vector<2x32xf32>
    %368 = arith.addf %366, %367 : vector<2x32xf32>
    %c4_210 = arith.constant 4 : index
    %c0_211 = arith.constant 0 : index
    %369 = vector.load %arg27[%c4_210, %c0_211] : memref<16x32xf32, #tpu.memory_space<vmem>>, vector<2x32xf32>
    tpu.vector_store %arg27[%c4_210, %c0_211], %368 {strides = array<i32>} : memref<16x32xf32, #tpu.memory_space<vmem>>, vector<2x32xf32>,
    %cst_212 = arith.constant dense<0.000000e+00> : vector<2x32xf32>
    %370 = tpu.matmul %368, %278, %cst_212 {dimension_numbers = #tpu.dot_dimension_numbers<[1], [0], [0], [1], [0, 0, 1, 1], [], []>} : vector<2x32xf32>, vector<32x32xf32>, vector<2x32xf32> -> vector<2x32xf32>
    %cst_213 = arith.constant dense<0.000000e+00> : vector<2x32xf32>
    %371 = tpu.matmul %368, %279, %cst_213 {dimension_numbers = #tpu.dot_dimension_numbers<[1], [0], [0], [1], [0, 0, 1, 1], [], []>} : vector<2x32xf32>, vector<32x32xf32>, vector<2x32xf32> -> vector<2x32xf32>
    %cst_214 = arith.constant dense<0.000000e+00> : vector<2x32xf32>
    %372 = tpu.matmul %368, %280, %cst_214 {dimension_numbers = #tpu.dot_dimension_numbers<[1], [0], [0], [1], [0, 0, 1, 1], [], []>} : vector<2x32xf32>, vector<32x32xf32>, vector<2x32xf32> -> vector<2x32xf32>
    %373 = vector.broadcast %281 : vector<1x32xf32> to vector<2x32xf32>
    %374 = arith.addf %372, %373 : vector<2x32xf32>
    %c6_215 = arith.constant 6 : index
    %c0_216 = arith.constant 0 : index
    %375 = vector.load %arg24[%c6_215, %c0_216] : memref<16x32xf32, #tpu.memory_space<vmem>>, vector<2x32xf32>
    %376 = arith.addf %375, %370 : vector<2x32xf32>
    %377 = arith.negf %376 : vector<2x32xf32>
    %378 = math.exp %377 : vector<2x32xf32>
    %cst_217 = arith.constant 1.000000e+00 : f32
    %379 = vector.broadcast %cst_217 : f32 to vector<2x32xf32>
    %380 = arith.addf %379, %378 : vector<2x32xf32>
    %381 = arith.divf %379, %380 : vector<2x32xf32>
    %c6_218 = arith.constant 6 : index
    %c0_219 = arith.constant 0 : index
    %382 = vector.load %arg25[%c6_218, %c0_219] : memref<16x32xf32, #tpu.memory_space<vmem>>, vector<2x32xf32>
    %383 = arith.addf %382, %371 : vector<2x32xf32>
    %384 = arith.negf %383 : vector<2x32xf32>
    %385 = math.exp %384 : vector<2x32xf32>
    %cst_220 = arith.constant 1.000000e+00 : f32
    %386 = vector.broadcast %cst_220 : f32 to vector<2x32xf32>
    %387 = arith.addf %386, %385 : vector<2x32xf32>
    %388 = arith.divf %386, %387 : vector<2x32xf32>
    %c6_221 = arith.constant 6 : index
    %c0_222 = arith.constant 0 : index
    %389 = vector.load %arg26[%c6_221, %c0_222] : memref<16x32xf32, #tpu.memory_space<vmem>>, vector<2x32xf32>
    %390 = arith.mulf %381, %374 : vector<2x32xf32>
    %391 = arith.addf %389, %390 : vector<2x32xf32>
    %392 = math.tanh %391 : vector<2x32xf32>
    %cst_223 = arith.constant 1.000000e+00 : f32
    %393 = vector.broadcast %cst_223 : f32 to vector<2x32xf32>
    %394 = arith.subf %393, %388 : vector<2x32xf32>
    %395 = arith.mulf %394, %392 : vector<2x32xf32>
    %396 = arith.mulf %388, %368 : vector<2x32xf32>
    %397 = arith.addf %395, %396 : vector<2x32xf32>
    %c6_224 = arith.constant 6 : index
    %c0_225 = arith.constant 0 : index
    %398 = vector.load %arg27[%c6_224, %c0_225] : memref<16x32xf32, #tpu.memory_space<vmem>>, vector<2x32xf32>
    tpu.vector_store %arg27[%c6_224, %c0_225], %397 {strides = array<i32>} : memref<16x32xf32, #tpu.memory_space<vmem>>, vector<2x32xf32>,
    %cst_226 = arith.constant dense<0.000000e+00> : vector<2x32xf32>
    %399 = tpu.matmul %397, %278, %cst_226 {dimension_numbers = #tpu.dot_dimension_numbers<[1], [0], [0], [1], [0, 0, 1, 1], [], []>} : vector<2x32xf32>, vector<32x32xf32>, vector<2x32xf32> -> vector<2x32xf32>
    %cst_227 = arith.constant dense<0.000000e+00> : vector<2x32xf32>
    %400 = tpu.matmul %397, %279, %cst_227 {dimension_numbers = #tpu.dot_dimension_numbers<[1], [0], [0], [1], [0, 0, 1, 1], [], []>} : vector<2x32xf32>, vector<32x32xf32>, vector<2x32xf32> -> vector<2x32xf32>
    %cst_228 = arith.constant dense<0.000000e+00> : vector<2x32xf32>
    %401 = tpu.matmul %397, %280, %cst_228 {dimension_numbers = #tpu.dot_dimension_numbers<[1], [0], [0], [1], [0, 0, 1, 1], [], []>} : vector<2x32xf32>, vector<32x32xf32>, vector<2x32xf32> -> vector<2x32xf32>
    %402 = vector.broadcast %281 : vector<1x32xf32> to vector<2x32xf32>
    %403 = arith.addf %401, %402 : vector<2x32xf32>
    %c8_229 = arith.constant 8 : index
    %c0_230 = arith.constant 0 : index
    %404 = vector.load %arg24[%c8_229, %c0_230] : memref<16x32xf32, #tpu.memory_space<vmem>>, vector<2x32xf32>
    %405 = arith.addf %404, %399 : vector<2x32xf32>
    %406 = arith.negf %405 : vector<2x32xf32>
    %407 = math.exp %406 : vector<2x32xf32>
    %cst_231 = arith.constant 1.000000e+00 : f32
    %408 = vector.broadcast %cst_231 : f32 to vector<2x32xf32>
    %409 = arith.addf %408, %407 : vector<2x32xf32>
    %410 = arith.divf %408, %409 : vector<2x32xf32>
    %c8_232 = arith.constant 8 : index
    %c0_233 = arith.constant 0 : index
    %411 = vector.load %arg25[%c8_232, %c0_233] : memref<16x32xf32, #tpu.memory_space<vmem>>, vector<2x32xf32>
    %412 = arith.addf %411, %400 : vector<2x32xf32>
    %413 = arith.negf %412 : vector<2x32xf32>
    %414 = math.exp %413 : vector<2x32xf32>
    %cst_234 = arith.constant 1.000000e+00 : f32
    %415 = vector.broadcast %cst_234 : f32 to vector<2x32xf32>
    %416 = arith.addf %415, %414 : vector<2x32xf32>
    %417 = arith.divf %415, %416 : vector<2x32xf32>
    %c8_235 = arith.constant 8 : index
    %c0_236 = arith.constant 0 : index
    %418 = vector.load %arg26[%c8_235, %c0_236] : memref<16x32xf32, #tpu.memory_space<vmem>>, vector<2x32xf32>
    %419 = arith.mulf %410, %403 : vector<2x32xf32>
    %420 = arith.addf %418, %419 : vector<2x32xf32>
    %421 = math.tanh %420 : vector<2x32xf32>
    %cst_237 = arith.constant 1.000000e+00 : f32
    %422 = vector.broadcast %cst_237 : f32 to vector<2x32xf32>
    %423 = arith.subf %422, %417 : vector<2x32xf32>
    %424 = arith.mulf %423, %421 : vector<2x32xf32>
    %425 = arith.mulf %417, %397 : vector<2x32xf32>
    %426 = arith.addf %424, %425 : vector<2x32xf32>
    %c8_238 = arith.constant 8 : index
    %c0_239 = arith.constant 0 : index
    %427 = vector.load %arg27[%c8_238, %c0_239] : memref<16x32xf32, #tpu.memory_space<vmem>>, vector<2x32xf32>
    tpu.vector_store %arg27[%c8_238, %c0_239], %426 {strides = array<i32>} : memref<16x32xf32, #tpu.memory_space<vmem>>, vector<2x32xf32>,
    %cst_240 = arith.constant dense<0.000000e+00> : vector<2x32xf32>
    %428 = tpu.matmul %426, %278, %cst_240 {dimension_numbers = #tpu.dot_dimension_numbers<[1], [0], [0], [1], [0, 0, 1, 1], [], []>} : vector<2x32xf32>, vector<32x32xf32>, vector<2x32xf32> -> vector<2x32xf32>
    %cst_241 = arith.constant dense<0.000000e+00> : vector<2x32xf32>
    %429 = tpu.matmul %426, %279, %cst_241 {dimension_numbers = #tpu.dot_dimension_numbers<[1], [0], [0], [1], [0, 0, 1, 1], [], []>} : vector<2x32xf32>, vector<32x32xf32>, vector<2x32xf32> -> vector<2x32xf32>
    %cst_242 = arith.constant dense<0.000000e+00> : vector<2x32xf32>
    %430 = tpu.matmul %426, %280, %cst_242 {dimension_numbers = #tpu.dot_dimension_numbers<[1], [0], [0], [1], [0, 0, 1, 1], [], []>} : vector<2x32xf32>, vector<32x32xf32>, vector<2x32xf32> -> vector<2x32xf32>
    %431 = vector.broadcast %281 : vector<1x32xf32> to vector<2x32xf32>
    %432 = arith.addf %430, %431 : vector<2x32xf32>
    %c10_243 = arith.constant 10 : index
    %c0_244 = arith.constant 0 : index
    %433 = vector.load %arg24[%c10_243, %c0_244] : memref<16x32xf32, #tpu.memory_space<vmem>>, vector<2x32xf32>
    %434 = arith.addf %433, %428 : vector<2x32xf32>
    %435 = arith.negf %434 : vector<2x32xf32>
    %436 = math.exp %435 : vector<2x32xf32>
    %cst_245 = arith.constant 1.000000e+00 : f32
    %437 = vector.broadcast %cst_245 : f32 to vector<2x32xf32>
    %438 = arith.addf %437, %436 : vector<2x32xf32>
    %439 = arith.divf %437, %438 : vector<2x32xf32>
    %c10_246 = arith.constant 10 : index
    %c0_247 = arith.constant 0 : index
    %440 = vector.load %arg25[%c10_246, %c0_247] : memref<16x32xf32, #tpu.memory_space<vmem>>, vector<2x32xf32>
    %441 = arith.addf %440, %429 : vector<2x32xf32>
    %442 = arith.negf %441 : vector<2x32xf32>
    %443 = math.exp %442 : vector<2x32xf32>
    %cst_248 = arith.constant 1.000000e+00 : f32
    %444 = vector.broadcast %cst_248 : f32 to vector<2x32xf32>
    %445 = arith.addf %444, %443 : vector<2x32xf32>
    %446 = arith.divf %444, %445 : vector<2x32xf32>
    %c10_249 = arith.constant 10 : index
    %c0_250 = arith.constant 0 : index
    %447 = vector.load %arg26[%c10_249, %c0_250] : memref<16x32xf32, #tpu.memory_space<vmem>>, vector<2x32xf32>
    %448 = arith.mulf %439, %432 : vector<2x32xf32>
    %449 = arith.addf %447, %448 : vector<2x32xf32>
    %450 = math.tanh %449 : vector<2x32xf32>
    %cst_251 = arith.constant 1.000000e+00 : f32
    %451 = vector.broadcast %cst_251 : f32 to vector<2x32xf32>
    %452 = arith.subf %451, %446 : vector<2x32xf32>
    %453 = arith.mulf %452, %450 : vector<2x32xf32>
    %454 = arith.mulf %446, %426 : vector<2x32xf32>
    %455 = arith.addf %453, %454 : vector<2x32xf32>
    %c10_252 = arith.constant 10 : index
    %c0_253 = arith.constant 0 : index
    %456 = vector.load %arg27[%c10_252, %c0_253] : memref<16x32xf32, #tpu.memory_space<vmem>>, vector<2x32xf32>
    tpu.vector_store %arg27[%c10_252, %c0_253], %455 {strides = array<i32>} : memref<16x32xf32, #tpu.memory_space<vmem>>, vector<2x32xf32>,
    %cst_254 = arith.constant dense<0.000000e+00> : vector<2x32xf32>
    %457 = tpu.matmul %455, %278, %cst_254 {dimension_numbers = #tpu.dot_dimension_numbers<[1], [0], [0], [1], [0, 0, 1, 1], [], []>} : vector<2x32xf32>, vector<32x32xf32>, vector<2x32xf32> -> vector<2x32xf32>
    %cst_255 = arith.constant dense<0.000000e+00> : vector<2x32xf32>
    %458 = tpu.matmul %455, %279, %cst_255 {dimension_numbers = #tpu.dot_dimension_numbers<[1], [0], [0], [1], [0, 0, 1, 1], [], []>} : vector<2x32xf32>, vector<32x32xf32>, vector<2x32xf32> -> vector<2x32xf32>
    %cst_256 = arith.constant dense<0.000000e+00> : vector<2x32xf32>
    %459 = tpu.matmul %455, %280, %cst_256 {dimension_numbers = #tpu.dot_dimension_numbers<[1], [0], [0], [1], [0, 0, 1, 1], [], []>} : vector<2x32xf32>, vector<32x32xf32>, vector<2x32xf32> -> vector<2x32xf32>
    %460 = vector.broadcast %281 : vector<1x32xf32> to vector<2x32xf32>
    %461 = arith.addf %459, %460 : vector<2x32xf32>
    %c12_257 = arith.constant 12 : index
    %c0_258 = arith.constant 0 : index
    %462 = vector.load %arg24[%c12_257, %c0_258] : memref<16x32xf32, #tpu.memory_space<vmem>>, vector<2x32xf32>
    %463 = arith.addf %462, %457 : vector<2x32xf32>
    %464 = arith.negf %463 : vector<2x32xf32>
    %465 = math.exp %464 : vector<2x32xf32>
    %cst_259 = arith.constant 1.000000e+00 : f32
    %466 = vector.broadcast %cst_259 : f32 to vector<2x32xf32>
    %467 = arith.addf %466, %465 : vector<2x32xf32>
    %468 = arith.divf %466, %467 : vector<2x32xf32>
    %c12_260 = arith.constant 12 : index
    %c0_261 = arith.constant 0 : index
    %469 = vector.load %arg25[%c12_260, %c0_261] : memref<16x32xf32, #tpu.memory_space<vmem>>, vector<2x32xf32>
    %470 = arith.addf %469, %458 : vector<2x32xf32>
    %471 = arith.negf %470 : vector<2x32xf32>
    %472 = math.exp %471 : vector<2x32xf32>
    %cst_262 = arith.constant 1.000000e+00 : f32
    %473 = vector.broadcast %cst_262 : f32 to vector<2x32xf32>
    %474 = arith.addf %473, %472 : vector<2x32xf32>
    %475 = arith.divf %473, %474 : vector<2x32xf32>
    %c12_263 = arith.constant 12 : index
    %c0_264 = arith.constant 0 : index
    %476 = vector.load %arg26[%c12_263, %c0_264] : memref<16x32xf32, #tpu.memory_space<vmem>>, vector<2x32xf32>
    %477 = arith.mulf %468, %461 : vector<2x32xf32>
    %478 = arith.addf %476, %477 : vector<2x32xf32>
    %479 = math.tanh %478 : vector<2x32xf32>
    %cst_265 = arith.constant 1.000000e+00 : f32
    %480 = vector.broadcast %cst_265 : f32 to vector<2x32xf32>
    %481 = arith.subf %480, %475 : vector<2x32xf32>
    %482 = arith.mulf %481, %479 : vector<2x32xf32>
    %483 = arith.mulf %475, %455 : vector<2x32xf32>
    %484 = arith.addf %482, %483 : vector<2x32xf32>
    %c12_266 = arith.constant 12 : index
    %c0_267 = arith.constant 0 : index
    %485 = vector.load %arg27[%c12_266, %c0_267] : memref<16x32xf32, #tpu.memory_space<vmem>>, vector<2x32xf32>
    tpu.vector_store %arg27[%c12_266, %c0_267], %484 {strides = array<i32>} : memref<16x32xf32, #tpu.memory_space<vmem>>, vector<2x32xf32>,
    %cst_268 = arith.constant dense<0.000000e+00> : vector<2x32xf32>
    %486 = tpu.matmul %484, %278, %cst_268 {dimension_numbers = #tpu.dot_dimension_numbers<[1], [0], [0], [1], [0, 0, 1, 1], [], []>} : vector<2x32xf32>, vector<32x32xf32>, vector<2x32xf32> -> vector<2x32xf32>
    %cst_269 = arith.constant dense<0.000000e+00> : vector<2x32xf32>
    %487 = tpu.matmul %484, %279, %cst_269 {dimension_numbers = #tpu.dot_dimension_numbers<[1], [0], [0], [1], [0, 0, 1, 1], [], []>} : vector<2x32xf32>, vector<32x32xf32>, vector<2x32xf32> -> vector<2x32xf32>
    %cst_270 = arith.constant dense<0.000000e+00> : vector<2x32xf32>
    %488 = tpu.matmul %484, %280, %cst_270 {dimension_numbers = #tpu.dot_dimension_numbers<[1], [0], [0], [1], [0, 0, 1, 1], [], []>} : vector<2x32xf32>, vector<32x32xf32>, vector<2x32xf32> -> vector<2x32xf32>
    %489 = vector.broadcast %281 : vector<1x32xf32> to vector<2x32xf32>
    %490 = arith.addf %488, %489 : vector<2x32xf32>
    %c14_271 = arith.constant 14 : index
    %c0_272 = arith.constant 0 : index
    %491 = vector.load %arg24[%c14_271, %c0_272] : memref<16x32xf32, #tpu.memory_space<vmem>>, vector<2x32xf32>
    %492 = arith.addf %491, %486 : vector<2x32xf32>
    %493 = arith.negf %492 : vector<2x32xf32>
    %494 = math.exp %493 : vector<2x32xf32>
    %cst_273 = arith.constant 1.000000e+00 : f32
    %495 = vector.broadcast %cst_273 : f32 to vector<2x32xf32>
    %496 = arith.addf %495, %494 : vector<2x32xf32>
    %497 = arith.divf %495, %496 : vector<2x32xf32>
    %c14_274 = arith.constant 14 : index
    %c0_275 = arith.constant 0 : index
    %498 = vector.load %arg25[%c14_274, %c0_275] : memref<16x32xf32, #tpu.memory_space<vmem>>, vector<2x32xf32>
    %499 = arith.addf %498, %487 : vector<2x32xf32>
    %500 = arith.negf %499 : vector<2x32xf32>
    %501 = math.exp %500 : vector<2x32xf32>
    %cst_276 = arith.constant 1.000000e+00 : f32
    %502 = vector.broadcast %cst_276 : f32 to vector<2x32xf32>
    %503 = arith.addf %502, %501 : vector<2x32xf32>
    %504 = arith.divf %502, %503 : vector<2x32xf32>
    %c14_277 = arith.constant 14 : index
    %c0_278 = arith.constant 0 : index
    %505 = vector.load %arg26[%c14_277, %c0_278] : memref<16x32xf32, #tpu.memory_space<vmem>>, vector<2x32xf32>
    %506 = arith.mulf %497, %490 : vector<2x32xf32>
    %507 = arith.addf %505, %506 : vector<2x32xf32>
    %508 = math.tanh %507 : vector<2x32xf32>
    %cst_279 = arith.constant 1.000000e+00 : f32
    %509 = vector.broadcast %cst_279 : f32 to vector<2x32xf32>
    %510 = arith.subf %509, %504 : vector<2x32xf32>
    %511 = arith.mulf %510, %508 : vector<2x32xf32>
    %512 = arith.mulf %504, %484 : vector<2x32xf32>
    %513 = arith.addf %511, %512 : vector<2x32xf32>
    %c14_280 = arith.constant 14 : index
    %c0_281 = arith.constant 0 : index
    %514 = vector.load %arg27[%c14_280, %c0_281] : memref<16x32xf32, #tpu.memory_space<vmem>>, vector<2x32xf32>
    tpu.vector_store %arg27[%c14_280, %c0_281], %513 {strides = array<i32>} : memref<16x32xf32, #tpu.memory_space<vmem>>, vector<2x32xf32>,
    %c1 = arith.constant 1 : index
    %c0_282 = arith.constant 0 : index
    %c0_283 = arith.constant 0 : index
    %515 = vector.load %arg23[%c1, %c0_282, %c0_283] : memref<2x2x32xf32, #tpu.memory_space<vmem>>, vector<1x2x32xf32>
    %516 = vector.shape_cast %515 : vector<1x2x32xf32> to vector<2x32xf32>
    %517 = vector.shape_cast %513 : vector<2x32xf32> to vector<1x2x32xf32>
    tpu.vector_store %arg23[%c1, %c0_282, %c0_283], %517 {strides = array<i32>} : memref<2x2x32xf32, #tpu.memory_space<vmem>>, vector<1x2x32xf32>,
    %c0_284 = arith.constant 0 : index
    %c0_285 = arith.constant 0 : index
    %518 = vector.load %arg27[%c0_284, %c0_285] : memref<16x32xf32, #tpu.memory_space<vmem>>, vector<16x32xf32>
    %c0_286 = arith.constant 0 : index
    %c0_287 = arith.constant 0 : index
    %519 = vector.load %arg22[%c0_286, %c0_287] : memref<16x32xf32, #tpu.memory_space<vmem>>, vector<16x32xf32>
    tpu.vector_store %arg22[%c0_286, %c0_287], %518 {strides = array<i32>} : memref<16x32xf32, #tpu.memory_space<vmem>>, vector<16x32xf32>,
    return
  }
  func.func @transform_0(%arg0: i32) -> (i32, i32) {
    %c0_i32 = arith.constant 0 : i32
    %c0_i32_0 = arith.constant 0 : i32
    %c0_i32_1 = arith.constant 0 : i32
    return %c0_i32, %c0_i32_0 : i32, i32
  }
  func.func @transform_1(%arg0: i32) -> (i32, i32) {
    %c0_i32 = arith.constant 0 : i32
    %c0_i32_0 = arith.constant 0 : i32
    %c0_i32_1 = arith.constant 0 : i32
    return %c0_i32, %c0_i32_0 : i32, i32
  }
  func.func @transform_2(%arg0: i32) -> (i32, i32) {
    %c0_i32 = arith.constant 0 : i32
    %c0_i32_0 = arith.constant 0 : i32
    %c0_i32_1 = arith.constant 0 : i32
    return %c0_i32, %c0_i32_0 : i32, i32
  }
  func.func @transform_3(%arg0: i32) -> (i32, i32) {
    %c0_i32 = arith.constant 0 : i32
    %c0_i32_0 = arith.constant 0 : i32
    %c0_i32_1 = arith.constant 0 : i32
    return %c0_i32, %c0_i32_0 : i32, i32
  }
  func.func @transform_4(%arg0: i32) -> (i32, i32) {
    %c0_i32 = arith.constant 0 : i32
    %c0_i32_0 = arith.constant 0 : i32
    %c0_i32_1 = arith.constant 0 : i32
    return %c0_i32, %c0_i32_0 : i32, i32
  }
  func.func @transform_5(%arg0: i32) -> (i32, i32) {
    %c0_i32 = arith.constant 0 : i32
    %c0_i32_0 = arith.constant 0 : i32
    %c0_i32_1 = arith.constant 0 : i32
    return %c0_i32, %c0_i32_0 : i32, i32
  }
  func.func @transform_6(%arg0: i32) -> (i32, i32) {
    %c0_i32 = arith.constant 0 : i32
    %c0_i32_0 = arith.constant 0 : i32
    %c0_i32_1 = arith.constant 0 : i32
    return %c0_i32, %c0_i32_0 : i32, i32
  }
  func.func @transform_7(%arg0: i32) -> (i32, i32) {
    %c0_i32 = arith.constant 0 : i32
    %c0_i32_0 = arith.constant 0 : i32
    %c0_i32_1 = arith.constant 0 : i32
    return %c0_i32, %c0_i32_0 : i32, i32
  }
  func.func @transform_8(%arg0: i32) -> (i32, i32) {
    %c0_i32 = arith.constant 0 : i32
    %c0_i32_0 = arith.constant 0 : i32
    %c0_i32_1 = arith.constant 0 : i32
    return %c0_i32, %c0_i32_0 : i32, i32
  }
  func.func @transform_9(%arg0: i32) -> (i32, i32) {
    %c0_i32 = arith.constant 0 : i32
    %c0_i32_0 = arith.constant 0 : i32
    %c0_i32_1 = arith.constant 0 : i32
    return %c0_i32, %c0_i32_0 : i32, i32
  }
  func.func @transform_10(%arg0: i32) -> (i32, i32) {
    %c0_i32 = arith.constant 0 : i32
    %c0_i32_0 = arith.constant 0 : i32
    %c0_i32_1 = arith.constant 0 : i32
    return %c0_i32, %c0_i32_0 : i32, i32
  }
  func.func @transform_11(%arg0: i32) -> (i32, i32) {
    %c0_i32 = arith.constant 0 : i32
    %c0_i32_0 = arith.constant 0 : i32
    %c0_i32_1 = arith.constant 0 : i32
    return %c0_i32, %c0_i32_0 : i32, i32
  }
  func.func @transform_12(%arg0: i32) -> (i32, i32) {
    %c0_i32 = arith.constant 0 : i32
    %c0_i32_0 = arith.constant 0 : i32
    %c0_i32_1 = arith.constant 0 : i32
    return %c0_i32, %c0_i32_0 : i32, i32
  }
  func.func @transform_13(%arg0: i32) -> (i32, i32) {
    %c0_i32 = arith.constant 0 : i32
    %c0_i32_0 = arith.constant 0 : i32
    %c0_i32_1 = arith.constant 0 : i32
    return %c0_i32, %c0_i32_0 : i32, i32
  }
  func.func @transform_14(%arg0: i32) -> (i32, i32) {
    %c0_i32 = arith.constant 0 : i32
    %c0_i32_0 = arith.constant 0 : i32
    %c0_i32_1 = arith.constant 0 : i32
    return %c0_i32, %c0_i32_0 : i32, i32
  }
  func.func @transform_15(%arg0: i32) -> (i32, i32) {
    %c0_i32 = arith.constant 0 : i32
    %c0_i32_0 = arith.constant 0 : i32
    %c0_i32_1 = arith.constant 0 : i32
    return %c0_i32, %c0_i32_0 : i32, i32
  }
  func.func @transform_16(%arg0: i32) -> (i32, i32) {
    %c0_i32 = arith.constant 0 : i32
    %c0_i32_0 = arith.constant 0 : i32
    %c0_i32_1 = arith.constant 0 : i32
    return %c0_i32, %c0_i32_0 : i32, i32
  }
  func.func @transform_17(%arg0: i32) -> (i32, i32) {
    %c0_i32 = arith.constant 0 : i32
    %c0_i32_0 = arith.constant 0 : i32
    %c0_i32_1 = arith.constant 0 : i32
    return %c0_i32, %c0_i32_0 : i32, i32
  }
  func.func @transform_18(%arg0: i32) -> (i32, i32) {
    %c0_i32 = arith.constant 0 : i32
    %c0_i32_0 = arith.constant 0 : i32
    %c0_i32_1 = arith.constant 0 : i32
    return %c0_i32, %c0_i32_0 : i32, i32
  }
  func.func @transform_19(%arg0: i32) -> (i32, i32) {
    %c0_i32 = arith.constant 0 : i32
    %c0_i32_0 = arith.constant 0 : i32
    %c0_i32_1 = arith.constant 0 : i32
    return %c0_i32, %c0_i32_0 : i32, i32
  }
  func.func @transform_20(%arg0: i32) -> (i32, i32) {
    %c0_i32 = arith.constant 0 : i32
    %c0_i32_0 = arith.constant 0 : i32
    %c0_i32_1 = arith.constant 0 : i32
    return %c0_i32, %c0_i32_0 : i32, i32
  }
  func.func @transform_21(%arg0: i32) -> (i32, i32) {
    %c0_i32 = arith.constant 0 : i32
    %c0_i32_0 = arith.constant 0 : i32
    %c0_i32_1 = arith.constant 0 : i32
    return %c0_i32, %c0_i32_0 : i32, i32
  }
  func.func @transform_22(%arg0: i32) -> (i32, i32, i32) {
    %c0_i32 = arith.constant 0 : i32
    %c0_i32_0 = arith.constant 0 : i32
    %c0_i32_1 = arith.constant 0 : i32
    %c0_i32_2 = arith.constant 0 : i32
    return %c0_i32, %c0_i32_0, %c0_i32_1 : i32, i32, i32
  }
}

</mosaic_0001>

<bundles_post_ra>
// kernel: encoder_forward.1
= control target key start
LH: loop header
LB: loop body
LE: loop exit
PB: predicated region body
PF: predicated region fallthrough
CT: control target
= control target key end

     0   :  { %s3519_s0 = inlined_call_operand.vmem [shape: f32[16,16], index: 0, kind: input, shape index: {}]   ;;  %s3520_s1 = inlined_call_operand.hbm [shape: f32[16,32], index: 1, kind: input, shape index: {}]   ;;  %s3521_s2 = inlined_call_operand.hbm [shape: f32[16,32], index: 2, kind: input, shape index: {}]   ;;  %s3522_s3 = inlined_call_operand.hbm [shape: f32[16,32], index: 3, kind: input, shape index: {}]   ;;  %s3523_s4 = inlined_call_operand.vmem [shape: f32[32,32], index: 4, kind: input, shape index: {}]   ;;  %s3524_s5 = inlined_call_operand.vmem [shape: f32[32,32], index: 5, kind: input, shape index: {}]   ;;  %s3525_s6 = inlined_call_operand.vmem [shape: f32[32,32], index: 6, kind: input, shape index: {}]   ;;  %s3526_s7 = inlined_call_operand.vmem [shape: f32[1,32], index: 7, kind: input, shape index: {}]   ;;  %s3527_s8 = inlined_call_operand.vmem [shape: f32[1,32], index: 8, kind: input, shape index: {}]   ;;  %s3528_s9 = inlined_call_operand.hbm [shape: f32[1,32], index: 9, kind: input, shape index: {}]   ;;  %s3529_s10 = inlined_call_operand.hbm [shape: f32[1,32], index: 10, kind: input, shape index: {}]   ;;  %s3530_s11 = inlined_call_operand.vmem [shape: f32[32,32], index: 11, kind: input, shape index: {}]   ;;  %s3531_s12 = inlined_call_operand.vmem [shape: f32[32,32], index: 12, kind: input, shape index: {}]   ;;  %s3532_s13 = inlined_call_operand.vmem [shape: f32[32,32], index: 13, kind: input, shape index: {}]   ;;  %s3533_s14 = inlined_call_operand.vmem [shape: f32[32,32], index: 14, kind: input, shape index: {}]   ;;  %s3534_s15 = inlined_call_operand.hbm [shape: f32[32,32], index: 15, kind: input, shape index: {}]   ;;  %s3535_s16 = inlined_call_operand.hbm [shape: f32[32,32], index: 16, kind: input, shape index: {}]   ;;  %s3536_s17 = inlined_call_operand.vmem [shape: f32[1,32], index: 17, kind: input, shape index: {}]   ;;  %s3537_s18 = inlined_call_operand.vmem [shape: f32[1,32], index: 18, kind: input, shape index: {}]   ;;  %s3538_s19 = inlined_call_operand.vmem [shape: f32[1,32], index: 19, kind: input, shape index: {}]   ;;  %s3539_s20 = inlined_call_operand.vmem [shape: f32[1,32], index: 20, kind: input, shape index: {}]   ;;  %s3540_s21 = inlined_call_operand.hbm [shape: f32[16,32], index: 21, kind: output, shape index: {0}]   ;;  %s3541_s22 = inlined_call_operand.hbm [shape: f32[2,2,32], index: 22, kind: output, shape index: {1}]  }
   0x1   :  { %3546 = sst [smem:[#allocation27_spill]] %s3519_s0 }
   0x2   :  { %3547 = sst [smem:[#allocation28_spill]] %s3520_s1 }
   0x3   :  { %3548 = sst [smem:[#allocation29_spill]] %s3521_s2 }
   0x4   :  { %3549 = sst [smem:[#allocation30_spill]] %s3522_s3 }
   0x5   :  { %3550 = sst [smem:[#allocation31_spill]] %s3523_s4 }
   0x6   :  { %3551 = sst [smem:[#allocation32_spill]] %s3524_s5 }
   0x7   :  { %3552 = sst [smem:[#allocation33_spill]] %s3525_s6 }
   0x8   :  { %28 = vsyncpa [#allocation7], 0 }
   0x9   :  { %29 = vsyncpa [#allocation10], 0 }
   0xa   :  { %30 = vsyncpa [#allocation13], 0 }
   0xb   :  { %31 = vsyncpa [#allocation16], 0 }
   0xc   :  { %32 = vsyncpa [#allocation8], 0 }
   0xd   :  { %33 = vsyncpa [#allocation20], 0  ;;  %s3553_s29 = sld [smem:[#allocation29_spill]]  ;;  %s2785_s4 = smov [#allocation9]  }
   0xe   :  { %s55_s0 = sshll.u32 %s2785_s4, 4  ;;  %s90_s5 = sshll.u32 %s3528_s9, 4  ;;  %s56_s0 = int_to_ptr.vmem [resolvable:$true] %s55_s0  ;;  %s91_s5 = int_to_ptr.hbm [resolvable:$true] %s90_s5 }
   0xf   :  { %s2786_s24 = smov 128   ;;  %s2787_s6 = smov 8  }
  0x10   :  { %s2788_s25 = smov [#allocation12]   ;;  %s119_s3 = sshll.u32 %s3534_s15, 4  ;;  %s120_s3 = int_to_ptr.hbm [resolvable:$true] %s119_s3 }
  0x11   :  { %s92_s26 = sshll.u32 %s2788_s25, 4  ;;  %s3554_s4 = sld [smem:[#allocation28_spill]]  ;;  %s93_s26 = int_to_ptr.vmem [resolvable:$true] %s92_s26 }
  0x12   :  { %95 = dma.hbm_to_vmem [thread:$0]  %s91_s5, 16, %s93_s26, [#allocation13]  }
  0x13   :  { %s53_s30 = sshll.u32 %s3553_s29, 4  ;;  %s2789_s23 = smov [#allocation15]   ;;  %s54_s30 = int_to_ptr.hbm [resolvable:$true] %s53_s30 }
  0x14   :  { %61 = dma.hbm_to_vmem [thread:$0]  %s54_s30, 256, %s56_s0, [#allocation10], %s2786_s24, %s2786_s24, %s2787_s6  }
  0x15   :  { %s121_s1 = sshll.u32 %s2789_s23, 4  ;;  %s2790_s30 = smov [#allocation6]   ;;  %s122_s1 = int_to_ptr.vmem [resolvable:$true] %s121_s1 }
  0x16   :  { %127 = dma.hbm_to_vmem [thread:$0]  %s120_s3, 512, %s122_s1, [#allocation16], %s2786_s24, %s2786_s24, %s2787_s6  }
  0x17   :  { %s40_s9 = sshll.u32 %s3554_s4, 4  ;;  %s42_s0 = sshll.u32 %s2790_s30, 4  ;;  %s41_s9 = int_to_ptr.hbm [resolvable:$true] %s40_s9  ;;  %s43_s0 = int_to_ptr.vmem [resolvable:$true] %s42_s0 }
  0x18   :  { %s3555_s15 = sld [smem:[#allocation30_spill]]  ;;  %s101_s28 = sshll.u32 %s3529_s10, 4  ;;  %s102_s28 = int_to_ptr.hbm [resolvable:$true] %s101_s28 }
  0x19   :  { %48 = dma.hbm_to_vmem [thread:$0]  %s41_s9, 256, %s43_s0, [#allocation7], %s2786_s24, %s2786_s24, %s2787_s6  }
  0x1a   :  { %s2791_s29 = smov [#allocation11]   ;;  %s2792_s3 = smov [#allocation14]  }
  0x1b   :  { %s68_s4 = sshll.u32 %s2791_s29, 4  ;;  %s103_s23 = sshll.u32 %s2792_s3, 4  ;;  %s69_s4 = int_to_ptr.vmem [resolvable:$true] %s68_s4  ;;  %s104_s23 = int_to_ptr.vmem [resolvable:$true] %s103_s23 }
  0x1c   :  { %s132_s25 = sshll.u32 %s3535_s16, 4  ;;  %s2793_s9 = smov [#allocation17]   ;;  %s133_s25 = int_to_ptr.hbm [resolvable:$true] %s132_s25 }
  0x1d   :  { %106 = dma.hbm_to_vmem [thread:$0]  %s102_s28, 16, %s104_s23, [#allocation13]  }
  0x1e   :  { %s66_s27 = sshll.u32 %s3555_s15, 4  ;;  %s134_s0 = sshll.u32 %s2793_s9, 4  ;;  %s67_s27 = int_to_ptr.hbm [resolvable:$true] %s66_s27  ;;  %s135_s0 = int_to_ptr.vmem [resolvable:$true] %s134_s0 }
  0x1f   :  { %74 = dma.hbm_to_vmem [thread:$0]  %s67_s27, 256, %s69_s4, [#allocation10], %s2786_s24, %s2786_s24, %s2787_s6  }
  0x20   :  { %140 = dma.hbm_to_vmem [thread:$0]  %s133_s25, 512, %s135_s0, [#allocation16], %s2786_s24, %s2786_s24, %s2787_s6  }
  0x21   :  { %2773 = dma.done.wait [#allocation7], 256  }
  0x22   :  { %2774 = vsyncadd [#allocation7], 4294967040 }
  0x23   :  { %2775 = dma.done.wait [#allocation10], 512  }
  0x24   :  { %2776 = vsyncadd [#allocation10], 4294966784 }
  0x25   :  { %2777 = dma.done.wait [#allocation13], 32  }
  0x26   :  { %2778 = vsyncadd [#allocation13], 4294967264 }
  0x27   :  { %2779 = dma.done.wait [#allocation16], 1024  }
  0x28   :  { %2780 = vsyncadd [#allocation16], 4294966272  ;;  %v180_v0 = vld [vmem:[#allocation6 + $0x8] sm:$0xff]  ;;  %s3556_s2 = sld [smem:[#allocation31_spill]]  ;;  %v179_v2 = vld [vmem:[#allocation6] sm:$0xff]  ;;  %vm185_vm0 = vcmask 130048  }
  0x29   :  { %206 = vmatpush.msra.mxu0 %v180_v0  ;;  %s3557_s28 = sld [smem:[#allocation27_spill]]  ;;  %v219_v6 = vld [vmem:[#allocation9 + $0x8] sm:$0xff]  ;;  %v218_v7 = vld [vmem:[#allocation9] sm:$0xff]  ;;  %v250_v10 = vld [vmem:[#allocation11 + $0x8] sm:$0xff]  ;;  %v2794_v15 = vmov 0.0   ;;  %vm215_vm1 = vcmask 261120  }
  0x2a   :  { %238 = vmatpush.msra.mxu1 %v219_v6  ;;  %s3558_s25 = sld [smem:[#allocation33_spill]]  ;;  %v249_v11 = vld [vmem:[#allocation11] sm:$0xff]  ;;  %269 = vmatpush.msra.mxu2 %v250_v10  ;;  %v2390_v28 = vld [vmem:[#allocation12] ss:$0 sm:$0xff]  ;;  %v3081_v50 = vld [vmem:[#allocation14] ss:$0 sm:$0xff] }
  0x2b   :  { %207 = vmatpush.msra.mxu0 %v179_v2  ;;  %s3559_s10 = sld [smem:[#allocation32_spill]]  ;;  %v2388_v21 = vld [vmem:[%s3526_s7] ss:$0 sm:$0xff]  ;;  %vm409_vm10 = vcmask 254976   ;;  %s2796_s0 = smov 32  }
  0x2c   :  { %239 = vmatpush.msra.mxu1 %v218_v7  ;;  %270 = vmatpush.msra.mxu2 %v249_v11  ;;  %v2389_v23 = vld [vmem:[%s3527_s8] ss:$0 sm:$0xff]  ;;  %s2798_s16 = smov [#allocation18]   ;;  %s2254_s15 = sshll.u32 %s3540_s21, 4  ;;  %s2255_s15 = int_to_ptr.hbm [resolvable:$true] %s2254_s15 }
  0x2d   :  { %s2252_s7 = sshll.u32 %s2798_s16, 4  ;;  %s2253_s7 = int_to_ptr.vmem [resolvable:$true] %s2252_s7 }
  0x2e   :  { %v2953_v1 = vld [vmem:[%s3556_s2 + $0x18] sm:$0xff]  ;;  %v2959_v3 = vld [vmem:[%s3556_s2 + $0x10] sm:$0xff]  ;;  %v2967_v5 = vld [vmem:[%s3556_s2 + $0x8] sm:$0xff] }
  0x2f   :  { %308 = vmatpush.msra.mxu3 %v2953_v1  ;;  %v177_v4 = vld [vmem:[%s3557_s28] sm:$0xff]  ;;  %v178_v16 = vld [vmem:[%s3557_s28 + $0x8] sm:$0xff]  ;;  %426 = vmatpush.msrb.mxu1 %v2953_v1 }
  0x30   :  { %2288 = vmatmul.msk.f32.vlgmr.msra.gmra.mxu0 %vm185_vm0, %v177_v4  ;;  %v2974_v8 = vld [vmem:[%s3556_s2] sm:$0xff]  ;;  %v2979_v9 = vld [vmem:[%s3558_s25 + $0x18] sm:$0xff]  ;;  %2290 = vmatmul.msk.f32.vlgmr.msra.gmra.mxu1 %vm185_vm0, %v177_v4  ;;  %v2998_v14 = vld [vmem:[%s3558_s25 + $0x10] sm:$0xff] }
  0x31   :  { %309 = vmatpush.msra.mxu3 %v2959_v3  ;;  %351 = vmatpush.msrb.mxu0 %v2979_v9  ;;  %v2986_v12 = vld [vmem:[%s3559_s10 + $0x18] sm:$0xff]  ;;  %v2991_v13 = vld [vmem:[%s3559_s10 + $0x10] sm:$0xff]  ;;  %v3009_v17 = vld [vmem:[%s3559_s10 + $0x8] sm:$0xff] }
  0x32   :  { %2292 = vmatmul.msk.f32.vlgmr.msra.gmra.mxu2 %vm185_vm0, %v177_v4  ;;  %v3015_v18 = vld [vmem:[%s3558_s25 + $0x8] sm:$0xff]  ;;  %v3023_v19 = vld [vmem:[%s3559_s10] sm:$0xff]  ;;  %427 = vmatpush.msrb.mxu1 %v2959_v3  ;;  %s2797_s10 = smov 2  }
  0x33   :  { %310 = vmatpush.msra.mxu3 %v2967_v5  ;;  %352 = vmatpush.msrb.mxu0 %v2998_v14  ;;  %v3029_v20 = vld [vmem:[%s3558_s25] sm:$0xff]  ;;  %s2267_s25 = sshll.u32 %s3541_s22, 4  ;;  %s2268_s25 = int_to_ptr.hbm [resolvable:$true] %s2267_s25 }
  0x34   :  { %446 = vmatpush.msrb.mxu2 %v2986_v12  ;;  %428 = vmatpush.msrb.mxu1 %v2967_v5 }
  0x35   :  { %311 = vmatpush.msra.mxu3 %v2974_v8  ;;  %353 = vmatpush.msrb.mxu0 %v3015_v18 }
  0x36   :  { %312 = vmatmul.f32.vlgmr.msra.gmra.mxu3 %v2794_v15  ;;  %447 = vmatpush.msrb.mxu2 %v2991_v13 }
  0x37   :  { %328 = vmatpush.msrb.mxu3 %v2986_v12  ;;  %354 = vmatpush.msrb.mxu0 %v3029_v20 }
  0x38   :  { %2289 = vmatmul.msk.f32.gmra.mxu0 %vm185_vm0, %v178_v16  ;;  %2291 = vmatmul.msk.f32.gmra.mxu1 %vm185_vm0, %v178_v16 }
  0x39   :  { %329 = vmatpush.msrb.mxu3 %v2991_v13  ;;  %448 = vmatpush.msrb.mxu2 %v3009_v17 }
  0x3a   :  { %2293 = vmatmul.msk.f32.gmra.mxu2 %vm185_vm0, %v178_v16  ;;  %429 = vmatpush.msrb.mxu1 %v2974_v8 }
  0x3b   :  { %330 = vmatpush.msrb.mxu3 %v3009_v17  ;;  %540 = vmatpush.msra.mxu0 %v2953_v1 }
  0x3c   :  { %449 = vmatpush.msrb.mxu2 %v3023_v19  ;;  %560 = vmatpush.msra.mxu1 %v2986_v12 }
  0x3d   :  { %331 = vmatpush.msrb.mxu3 %v3023_v19  ;;  %541 = vmatpush.msra.mxu0 %v2959_v3 }
  0x3e   :  { %332 = vmatmul.f32.vlgmr.msrb.gmra.mxu3 %v2794_v15  ;;  %580 = vmatpush.msra.mxu2 %v2979_v9 }
  0x3f   :  { %466 = vmatpush.msra.mxu3 %v2979_v9  ;;  %561 = vmatpush.msra.mxu1 %v2991_v13 }
  0x40   :  { %355 = vmatmul.f32.vlgmr.msrb.gmra.mxu0 %v2794_v15  ;;  %581 = vmatpush.msra.mxu2 %v2998_v14 }
  0x41   :  { %467 = vmatpush.msra.mxu3 %v2998_v14  ;;  %542 = vmatpush.msra.mxu0 %v2967_v5 }
  0x42   :  { %562 = vmatpush.msra.mxu1 %v3009_v17  ;;  %582 = vmatpush.msra.mxu2 %v3015_v18 }
  0x43   :  { %468 = vmatpush.msra.mxu3 %v3015_v18  ;;  %543 = vmatpush.msra.mxu0 %v2974_v8 }
  0x44   :  { %563 = vmatpush.msra.mxu1 %v3023_v19  ;;  %583 = vmatpush.msra.mxu2 %v3029_v20 }
  0x45   :  { %469 = vmatpush.msra.mxu3 %v3029_v20  ;;  %674 = vmatpush.msrb.mxu0 %v2986_v12 }
  0x47   :  { %654 = vmatpush.msrb.mxu3 %v2953_v1  ;;  %675 = vmatpush.msrb.mxu0 %v2991_v13 }
  0x49   :  { %655 = vmatpush.msrb.mxu3 %v2959_v3  ;;  %676 = vmatpush.msrb.mxu0 %v3009_v17 }
  0x4b   :  { %656 = vmatpush.msrb.mxu3 %v2967_v5  ;;  %677 = vmatpush.msrb.mxu0 %v3023_v19 }
  0x4d   :  { %657 = vmatpush.msrb.mxu3 %v2974_v8 }
  0xad   :  { %v209_v22 = vpop.f32.mrf.mxu0  ;;  %v241_v25 = vpop.f32.mrf.mxu1 }
  0xae   :  { %v210_v24 = vadd.f32 %v2388_v21, %v209_v22  ;;  %v242_v26 = vadd.f32 %v2389_v23, %v241_v25 }
  0xb0   :  { %216 = vst.msk [vmem:[#allocation2] sm:$0xff] %vm215_vm1, %v210_v24 }
  0xb1   :  { %247 = vst.msk [vmem:[#allocation3] sm:$0xff] %vm215_vm1, %v242_v26 }
  0xb5   :  { %v212_v27 = vpop.f32.mrf.mxu0  ;;  %v272_v33 = vpop.f32.mrf.mxu2 }
  0xb6   :  { %v213_v29 = vadd.f32 %v2388_v21, %v212_v27  ;;  %v273_v34 = vadd.f32 %v2390_v28, %v272_v33  ;;  %v244_v42 = vpop.f32.mrf.mxu1 }
  0xb7   :  { %v359_v31 = vld [vmem:[#allocation2] sm:$0x3]  ;;  %v245_v44 = vadd.f32 %v2389_v23, %v244_v42 }
  0xb8   :  { %217 = vst.msk [vmem:[#allocation2 + $0x8] sm:$0xff] %vm215_vm1, %v213_v29  ;;  %v380_v36 = vld [vmem:[#allocation3] sm:$0x3]  ;;  %v474_v29 = vld [vmem:[#allocation2 + $0x2] sm:$0x3] }
  0xb9   :  { %v313_v30 = vpop.f32.mrf.mxu3  ;;  %278 = vst.msk [vmem:[#allocation4] sm:$0xff] %vm215_vm1, %v273_v34  ;;  %v495_v33 = vld [vmem:[#allocation3 + $0x2] sm:$0x3] }
  0xba   :  { %v360_v32 = vadd.f32 %v359_v31, %v313_v30  ;;  %248 = vst.msk [vmem:[#allocation3 + $0x8] sm:$0xff] %vm215_vm1, %v245_v44 }
  0xbc   :  { %v2294_v35 = vmul.f32 -1.442695, %v360_v32 }
  0xbd   :  { %v275_v43 = vpop.f32.mrf.mxu2  ;;  %v356_v52 = vpop.f32.mrf.mxu0 }
  0xbe   :  { %2396 = vpow2.f32 %v2294_v35  ;;  %v276_v45 = vadd.f32 %v2390_v28, %v275_v43  ;;  %v357_v56 = vadd.f32 %v3081_v50, %v356_v52 }
  0xc0   :  { %279 = vst.msk [vmem:[#allocation4 + $0x8] sm:$0xff] %vm215_vm1, %v276_v45  ;;  %v401_v63 = vld [vmem:[#allocation4] sm:$0x3] }
  0xc1   :  { %v333_v37 = vpop.f32.mrf.mxu3 }
  0xc2   :  { %v381_v38 = vadd.f32 %v380_v36, %v333_v37 }
  0xc4   :  { %v2397_v39 = vpop.eup %2396  ;;  %v2295_v40 = vmul.f32 -1.442695, %v381_v38 }
  0xc5   :  { %v364_v41 = vadd.f32 1.0, %v2397_v39 }
  0xc6   :  { %2398 = vpow2.f32 %v2295_v40 }
  0xc7   :  { %2400 = vrcp.f32 %v364_v41  ;;  %v376_v53 = vand.u32 2147483648, %v364_v41  ;;  %v374_v55 = vand.u32 2147483647, %v364_v41  ;;  %vm370_vm3 = vweird.f32 %v364_v41 }
  0xc9   :  { %v377_v59 = vor.u32 1.1754944e-38, %v376_v53  ;;  %vm375_vm5 = vcmp.eq.f32.partialorder %v374_v55, 8.507059e+37 }
  0xcc   :  { %v2399_v46 = vpop.eup %2398 }
  0xcd   :  { %v2401_v47 = vpop.eup %2400  ;;  %v385_v48 = vadd.f32 1.0, %v2399_v46 }
  0xce   :  { %v366_v49 = vmul.f32 %v2401_v47, %v364_v41  ;;  %vm371_vm2 = vweird.f32 %v2401_v47 }
  0xcf   :  { %2402 = vrcp.f32 %v385_v48  ;;  %vm372_vm4 = vmor %vm370_vm3, %vm371_vm2  ;;  %v397_v4 = vand.u32 2147483648, %v385_v48  ;;  %v395_v7 = vand.u32 2147483647, %v385_v48  ;;  %vm391_vm7 = vweird.f32 %v385_v48 }
  0xd0   :  { %v367_v51 = vsub.f32 1.0, %v366_v49 }
  0xd1   :  { %v398_v16 = vor.u32 1.1754944e-38, %v397_v4  ;;  %vm396_vm9 = vcmp.eq.f32.partialorder %v395_v7, 8.507059e+37 }
  0xd2   :  { %v368_v54 = vmul.f32 %v2401_v47, %v367_v51 }
  0xd4   :  { %v369_v57 = vadd.f32 %v2401_v47, %v368_v54 }
  0xd5   :  { %v2403_v58 = vpop.eup %2402 }
  0xd6   :  { %v387_v60 = vmul.f32 %v2403_v58, %v385_v48  ;;  %v373_v61 = vsel %vm372_vm4, %v2401_v47, %v369_v57  ;;  %vm392_vm6 = vweird.f32 %v2403_v58 }
  0xd7   :  { %v378_v62 = vsel %vm375_vm5, %v377_v59, %v373_v61  ;;  %vm393_vm8 = vmor %vm391_vm7, %vm392_vm6 }
  0xd8   :  { %v388_v0 = vsub.f32 1.0, %v387_v60  ;;  %v402_v2 = vmul.f32 %v378_v62, %v357_v56  ;;  %v516_v60 = vld [vmem:[#allocation4 + $0x2] sm:$0x3] }
  0xda   :  { %v389_v6 = vmul.f32 %v2403_v58, %v388_v0  ;;  %v403_v10 = vadd.f32 %v402_v2, %v401_v63 }
  0xdc   :  { %v390_v11 = vadd.f32 %v2403_v58, %v389_v6  ;;  %2404 = vtanh.f32 %v403_v10 }
  0xde   :  { %v394_v21 = vsel %vm393_vm8, %v2403_v58, %v390_v11 }
  0xdf   :  { %v399_v22 = vsel %vm396_vm9, %v398_v16, %v394_v21  ;;  %v588_v21 = vld [vmem:[#allocation2 + $0x4] sm:$0x3] }
  0xe0   :  { %v405_v23 = vsub.f32 1.0, %v399_v22  ;;  %v407_v26 = vmul.f32 0.0, %v399_v22 }
  0xe2   :  { %v2405_v24 = vpop.eup %2404 }
  0xe3   :  { %v406_v25 = vmul.f32 %v2405_v24, %v405_v23  ;;  %v609_v23 = vld [vmem:[#allocation3 + $0x4] sm:$0x3] }
  0xe5   :  { %v3084_v27 = vadd.f32 %v407_v26, %v406_v25 }
  0xe7   :  { %410 = vst.msk [vmem:[#allocation5] sm:$0x3] %vm409_vm10, %v3084_v27  ;;  %2296 = vmatmul.msk.f32.vlgmr.msrb.gmra.mxu1 %vm215_vm1, %v3084_v27  ;;  %2297 = vmatmul.msk.f32.vlgmr.msrb.gmra.mxu2 %vm215_vm1, %v3084_v27 }
  0xe8   :  { %2298 = vmatmul.msk.f32.vlgmr.msra.gmra.mxu3 %vm215_vm1, %v3084_v27  ;;  %694 = vmatpush.msrb.mxu1 %v2979_v9 }
  0xe9   :  { %768 = vmatpush.msrb.mxu2 %v2953_v1  ;;  %788 = vmatpush.msra.mxu3 %v2986_v12 }
  0xea   :  { %695 = vmatpush.msrb.mxu1 %v2998_v14 }
  0xeb   :  { %769 = vmatpush.msrb.mxu2 %v2959_v3  ;;  %789 = vmatpush.msra.mxu3 %v2991_v13 }
  0xec   :  { %696 = vmatpush.msrb.mxu1 %v3015_v18 }
  0xed   :  { %770 = vmatpush.msrb.mxu2 %v2967_v5  ;;  %790 = vmatpush.msra.mxu3 %v3009_v17 }
  0xee   :  { %697 = vmatpush.msrb.mxu1 %v3029_v20 }
  0xef   :  { %771 = vmatpush.msrb.mxu2 %v2974_v8  ;;  %791 = vmatpush.msra.mxu3 %v3023_v19 }
 0x164   :  { %v431_v28 = vpop.f32.mrf.mxu1 }
 0x165   :  { %v475_v30 = vadd.f32 %v474_v29, %v431_v28 }
 0x167   :  { %v2299_v31 = vmul.f32 -1.442695, %v475_v30 }
 0x169   :  { %2406 = vpow2.f32 %v2299_v31 }
 0x16a   :  { %v451_v32 = vpop.f32.mrf.mxu2 }
 0x16b   :  { %v496_v34 = vadd.f32 %v495_v33, %v451_v32  ;;  %v471_v47 = vpop.f32.mrf.mxu3 }
 0x16c   :  { %v472_v53 = vadd.f32 %v3081_v50, %v471_v47 }
 0x16d   :  { %v2300_v35 = vmul.f32 -1.442695, %v496_v34 }
 0x16f   :  { %v2407_v36 = vpop.eup %2406  ;;  %2408 = vpow2.f32 %v2300_v35 }
 0x170   :  { %v479_v37 = vadd.f32 1.0, %v2407_v36 }
 0x172   :  { %2410 = vrcp.f32 %v479_v37  ;;  %v491_v43 = vand.u32 2147483648, %v479_v37  ;;  %v489_v45 = vand.u32 2147483647, %v479_v37  ;;  %vm485_vm12 = vweird.f32 %v479_v37 }
 0x174   :  { %v492_v51 = vor.u32 1.1754944e-38, %v491_v43  ;;  %vm490_vm14 = vcmp.eq.f32.partialorder %v489_v45, 8.507059e+37 }
 0x175   :  { %v2409_v38 = vpop.eup %2408 }
 0x176   :  { %v500_v39 = vadd.f32 1.0, %v2409_v38 }
 0x178   :  { %v2411_v40 = vpop.eup %2410  ;;  %2412 = vrcp.f32 %v500_v39  ;;  %v512_v57 = vand.u32 2147483648, %v500_v39  ;;  %v510_v59 = vand.u32 2147483647, %v500_v39  ;;  %vm506_vm0 = vweird.f32 %v500_v39 }
 0x179   :  { %v481_v41 = vmul.f32 %v2411_v40, %v479_v37  ;;  %vm486_vm11 = vweird.f32 %v2411_v40 }
 0x17a   :  { %vm487_vm13 = vmor %vm485_vm12, %vm486_vm11  ;;  %v513_v63 = vor.u32 1.1754944e-38, %v512_v57  ;;  %vm511_vm3 = vcmp.eq.f32.partialorder %v510_v59, 8.507059e+37 }
 0x17b   :  { %v482_v42 = vsub.f32 1.0, %v481_v41 }
 0x17d   :  { %v483_v44 = vmul.f32 %v2411_v40, %v482_v42 }
 0x17e   :  { %v2413_v46 = vpop.eup %2412 }
 0x17f   :  { %v502_v48 = vmul.f32 %v2413_v46, %v500_v39  ;;  %v484_v49 = vadd.f32 %v2411_v40, %v483_v44  ;;  %vm507_vm15 = vweird.f32 %v2413_v46 }
 0x180   :  { %vm508_vm2 = vmor %vm506_vm0, %vm507_vm15 }
 0x181   :  { %v503_v52 = vsub.f32 1.0, %v502_v48  ;;  %v488_v54 = vsel %vm487_vm13, %v2411_v40, %v484_v49 }
 0x182   :  { %v493_v55 = vsel %vm490_vm14, %v492_v51, %v488_v54 }
 0x183   :  { %v504_v56 = vmul.f32 %v2413_v46, %v503_v52  ;;  %v517_v58 = vmul.f32 %v493_v55, %v472_v53  ;;  %v630_v53 = vld [vmem:[#allocation4 + $0x4] sm:$0x3] }
 0x185   :  { %v505_v61 = vadd.f32 %v2413_v46, %v504_v56  ;;  %v518_v62 = vadd.f32 %v517_v58, %v516_v60 }
 0x187   :  { %v509_v0 = vsel %vm508_vm2, %v2413_v46, %v505_v61  ;;  %2414 = vtanh.f32 %v518_v62 }
 0x188   :  { %v514_v2 = vsel %vm511_vm3, %v513_v63, %v509_v0  ;;  %v723_v0 = vld [vmem:[#allocation3 + $0x6] sm:$0x3] }
 0x189   :  { %v520_v4 = vsub.f32 1.0, %v514_v2  ;;  %v522_v10 = vmul.f32 %v514_v2, %v3084_v27 }
 0x18d   :  { %v2415_v6 = vpop.eup %2414 }
 0x18e   :  { %v521_v7 = vmul.f32 %v2415_v6, %v520_v4 }
 0x190   :  { %v3108_v11 = vadd.f32 %v522_v10, %v521_v7  ;;  %v702_v7 = vld [vmem:[#allocation2 + $0x6] sm:$0x3] }
 0x192   :  { %524 = vst.msk [vmem:[#allocation5 + $0x2] sm:$0x3] %vm409_vm10, %v3108_v11  ;;  %2301 = vmatmul.msk.f32.vlgmr.msra.gmra.mxu0 %vm215_vm1, %v3108_v11  ;;  %2302 = vmatmul.msk.f32.vlgmr.msra.gmra.mxu1 %vm215_vm1, %v3108_v11 }
 0x193   :  { %2303 = vmatmul.msk.f32.vlgmr.msra.gmra.mxu2 %vm215_vm1, %v3108_v11  ;;  %808 = vmatpush.msra.mxu0 %v2979_v9 }
 0x194   :  { %882 = vmatpush.msra.mxu1 %v2953_v1  ;;  %902 = vmatpush.msra.mxu2 %v2986_v12 }
 0x195   :  { %809 = vmatpush.msra.mxu0 %v2998_v14 }
 0x196   :  { %883 = vmatpush.msra.mxu1 %v2959_v3  ;;  %903 = vmatpush.msra.mxu2 %v2991_v13 }
 0x197   :  { %810 = vmatpush.msra.mxu0 %v3015_v18 }
 0x198   :  { %884 = vmatpush.msra.mxu1 %v2967_v5  ;;  %904 = vmatpush.msra.mxu2 %v3009_v17 }
 0x199   :  { %811 = vmatpush.msra.mxu0 %v3029_v20 }
 0x19a   :  { %885 = vmatpush.msra.mxu1 %v2974_v8  ;;  %905 = vmatpush.msra.mxu2 %v3023_v19 }
 0x20f   :  { %v545_v16 = vpop.f32.mrf.mxu0  ;;  %v565_v22 = vpop.f32.mrf.mxu1 }
 0x210   :  { %v589_v24 = vadd.f32 %v588_v21, %v545_v16  ;;  %v610_v25 = vadd.f32 %v609_v23, %v565_v22 }
 0x212   :  { %v2304_v26 = vmul.f32 -1.442695, %v589_v24  ;;  %v2305_v27 = vmul.f32 -1.442695, %v610_v25 }
 0x214   :  { %2416 = vpow2.f32 %v2304_v26 }
 0x215   :  { %2418 = vpow2.f32 %v2305_v27 }
 0x216   :  { %v585_v42 = vpop.f32.mrf.mxu2 }
 0x217   :  { %v586_v45 = vadd.f32 %v3081_v50, %v585_v42 }
 0x21a   :  { %v2417_v28 = vpop.eup %2416 }
 0x21b   :  { %v2419_v29 = vpop.eup %2418  ;;  %v593_v30 = vadd.f32 1.0, %v2417_v28 }
 0x21c   :  { %v614_v31 = vadd.f32 1.0, %v2419_v29 }
 0x21d   :  { %2420 = vrcp.f32 %v593_v30  ;;  %v605_v38 = vand.u32 2147483648, %v593_v30  ;;  %v603_v40 = vand.u32 2147483647, %v593_v30  ;;  %vm599_vm5 = vweird.f32 %v593_v30 }
 0x21e   :  { %2422 = vrcp.f32 %v614_v31  ;;  %v626_v49 = vand.u32 2147483648, %v614_v31  ;;  %vm620_vm9 = vweird.f32 %v614_v31  ;;  %v624_v52 = vand.u32 2147483647, %v614_v31 }
 0x21f   :  { %v606_v44 = vor.u32 1.1754944e-38, %v605_v38  ;;  %vm604_vm7 = vcmp.eq.f32.partialorder %v603_v40, 8.507059e+37 }
 0x220   :  { %v627_v56 = vor.u32 1.1754944e-38, %v626_v49  ;;  %vm625_vm12 = vcmp.eq.f32.partialorder %v624_v52, 8.507059e+37 }
 0x223   :  { %v2421_v32 = vpop.eup %2420 }
 0x224   :  { %v2423_v33 = vpop.eup %2422  ;;  %v595_v34 = vmul.f32 %v2421_v32, %v593_v30  ;;  %vm600_vm4 = vweird.f32 %v2421_v32 }
 0x225   :  { %v616_v35 = vmul.f32 %v2423_v33, %v614_v31  ;;  %vm601_vm6 = vmor %vm599_vm5, %vm600_vm4  ;;  %vm621_vm8 = vweird.f32 %v2423_v33 }
 0x226   :  { %v596_v36 = vsub.f32 1.0, %v595_v34  ;;  %vm622_vm11 = vmor %vm620_vm9, %vm621_vm8 }
 0x227   :  { %v617_v37 = vsub.f32 1.0, %v616_v35 }
 0x228   :  { %v597_v39 = vmul.f32 %v2421_v32, %v596_v36 }
 0x229   :  { %v618_v41 = vmul.f32 %v2423_v33, %v617_v37 }
 0x22a   :  { %v598_v43 = vadd.f32 %v2421_v32, %v597_v39 }
 0x22b   :  { %v619_v47 = vadd.f32 %v2423_v33, %v618_v41 }
 0x22c   :  { %v602_v46 = vsel %vm601_vm6, %v2421_v32, %v598_v43 }
 0x22d   :  { %v607_v48 = vsel %vm604_vm7, %v606_v44, %v602_v46  ;;  %v623_v55 = vsel %vm622_vm11, %v2423_v33, %v619_v47  ;;  %v744_v44 = vld [vmem:[#allocation4 + $0x6] sm:$0x3] }
 0x22e   :  { %v631_v51 = vmul.f32 %v607_v48, %v586_v45  ;;  %v628_v57 = vsel %vm625_vm12, %v627_v56, %v623_v55  ;;  %v837_v56 = vld [vmem:[#allocation3 + $0x8] sm:$0x3] }
 0x22f   :  { %v634_v58 = vsub.f32 1.0, %v628_v57  ;;  %v636_v61 = vmul.f32 %v628_v57, %v3108_v11 }
 0x230   :  { %v632_v54 = vadd.f32 %v631_v51, %v630_v53 }
 0x232   :  { %2424 = vtanh.f32 %v632_v54 }
 0x238   :  { %v2425_v59 = vpop.eup %2424 }
 0x239   :  { %v635_v60 = vmul.f32 %v2425_v59, %v634_v58 }
 0x23b   :  { %v3132_v62 = vadd.f32 %v636_v61, %v635_v60 }
 0x23d   :  { %638 = vst.msk [vmem:[#allocation5 + $0x4] sm:$0x3] %vm409_vm10, %v3132_v62  ;;  %2306 = vmatmul.msk.f32.vlgmr.msrb.gmra.mxu3 %vm215_vm1, %v3132_v62  ;;  %2307 = vmatmul.msk.f32.vlgmr.msrb.gmra.mxu0 %vm215_vm1, %v3132_v62 }
 0x23e   :  { %2308 = vmatmul.msk.f32.vlgmr.msrb.gmra.mxu1 %vm215_vm1, %v3132_v62  ;;  %922 = vmatpush.msrb.mxu3 %v2979_v9 }
 0x23f   :  { %996 = vmatpush.msrb.mxu0 %v2953_v1  ;;  %1016 = vmatpush.msrb.mxu1 %v2986_v12 }
 0x240   :  { %923 = vmatpush.msrb.mxu3 %v2998_v14 }
 0x241   :  { %997 = vmatpush.msrb.mxu0 %v2959_v3  ;;  %1017 = vmatpush.msrb.mxu1 %v2991_v13 }
 0x242   :  { %924 = vmatpush.msrb.mxu3 %v3015_v18 }
 0x243   :  { %998 = vmatpush.msrb.mxu0 %v2967_v5  ;;  %1018 = vmatpush.msrb.mxu1 %v3009_v17 }
 0x244   :  { %925 = vmatpush.msrb.mxu3 %v3029_v20 }
 0x245   :  { %999 = vmatpush.msrb.mxu0 %v2974_v8  ;;  %1019 = vmatpush.msrb.mxu1 %v3023_v19 }
 0x2ba   :  { %v679_v63 = vpop.f32.mrf.mxu0 }
 0x2bb   :  { %v724_v2 = vadd.f32 %v723_v0, %v679_v63  ;;  %v699_v34 = vpop.f32.mrf.mxu1 }
 0x2bc   :  { %v700_v37 = vadd.f32 %v3081_v50, %v699_v34 }
 0x2bd   :  { %v2310_v4 = vmul.f32 -1.442695, %v724_v2 }
 0x2bf   :  { %2426 = vpow2.f32 %v2310_v4 }
 0x2c0   :  { %v659_v6 = vpop.f32.mrf.mxu3 }
 0x2c1   :  { %v703_v10 = vadd.f32 %v702_v7, %v659_v6 }
 0x2c3   :  { %v2309_v11 = vmul.f32 -1.442695, %v703_v10 }
 0x2c5   :  { %v2427_v16 = vpop.eup %2426  ;;  %2428 = vpow2.f32 %v2309_v11 }
 0x2c6   :  { %v728_v21 = vadd.f32 1.0, %v2427_v16 }
 0x2c8   :  { %2430 = vrcp.f32 %v728_v21  ;;  %v740_v41 = vand.u32 2147483648, %v728_v21  ;;  %vm734_vm3 = vweird.f32 %v728_v21  ;;  %v738_v43 = vand.u32 2147483647, %v728_v21 }
 0x2ca   :  { %v741_v47 = vor.u32 1.1754944e-38, %v740_v41  ;;  %vm739_vm5 = vcmp.eq.f32.partialorder %v738_v43, 8.507059e+37  ;;  %v951_v43 = vld [vmem:[#allocation3 + $0xa] sm:$0x3] }
 0x2cb   :  { %v2429_v22 = vpop.eup %2428 }
 0x2cc   :  { %v707_v23 = vadd.f32 1.0, %v2429_v22 }
 0x2ce   :  { %2432 = vrcp.f32 %v707_v23  ;;  %v2431_v24 = vpop.eup %2430  ;;  %v719_v30 = vand.u32 2147483648, %v707_v23  ;;  %v717_v32 = vand.u32 2147483647, %v707_v23  ;;  %vm713_vm14 = vweird.f32 %v707_v23 }
 0x2cf   :  { %v730_v25 = vmul.f32 %v2431_v24, %v728_v21  ;;  %vm735_vm2 = vweird.f32 %v2431_v24 }
 0x2d0   :  { %v720_v36 = vor.u32 1.1754944e-38, %v719_v30  ;;  %vm718_vm0 = vcmp.eq.f32.partialorder %v717_v32, 8.507059e+37  ;;  %vm736_vm4 = vmor %vm734_vm3, %vm735_vm2 }
 0x2d1   :  { %v731_v28 = vsub.f32 1.0, %v730_v25 }
 0x2d3   :  { %v732_v33 = vmul.f32 %v2431_v24, %v731_v28  ;;  %v858_v28 = vld [vmem:[#allocation4 + $0x8] sm:$0x3] }
 0x2d4   :  { %v2433_v26 = vpop.eup %2432 }
 0x2d5   :  { %v709_v27 = vmul.f32 %v2433_v26, %v707_v23  ;;  %vm714_vm13 = vweird.f32 %v2433_v26  ;;  %v733_v39 = vadd.f32 %v2431_v24, %v732_v33 }
 0x2d6   :  { %vm715_vm15 = vmor %vm713_vm14, %vm714_vm13 }
 0x2d7   :  { %v710_v29 = vsub.f32 1.0, %v709_v27  ;;  %v737_v46 = vsel %vm736_vm4, %v2431_v24, %v733_v39  ;;  %v930_v39 = vld [vmem:[#allocation2 + $0xa] sm:$0x3] }
 0x2d8   :  { %v742_v48 = vsel %vm739_vm5, %v741_v47, %v737_v46 }
 0x2d9   :  { %v711_v31 = vmul.f32 %v2433_v26, %v710_v29  ;;  %v748_v49 = vsub.f32 1.0, %v742_v48  ;;  %v750_v53 = vmul.f32 %v742_v48, %v3132_v62 }
 0x2db   :  { %v712_v35 = vadd.f32 %v2433_v26, %v711_v31 }
 0x2dd   :  { %v716_v38 = vsel %vm715_vm15, %v2433_v26, %v712_v35 }
 0x2de   :  { %v721_v40 = vsel %vm718_vm0, %v720_v36, %v716_v38 }
 0x2df   :  { %v745_v42 = vmul.f32 %v721_v40, %v700_v37 }
 0x2e1   :  { %v746_v45 = vadd.f32 %v745_v42, %v744_v44 }
 0x2e3   :  { %2434 = vtanh.f32 %v746_v45 }
 0x2e9   :  { %v2435_v51 = vpop.eup %2434 }
 0x2ea   :  { %v749_v52 = vmul.f32 %v2435_v51, %v748_v49  ;;  %v1212_v49 = vld [vmem:[%s3530_s11] sm:$0xff] }
 0x2ec   :  { %v3156_v54 = vadd.f32 %v750_v53, %v749_v52 }
 0x2ee   :  { %752 = vst.msk [vmem:[#allocation5 + $0x6] sm:$0x3] %vm409_vm10, %v3156_v54  ;;  %2311 = vmatmul.msk.f32.vlgmr.msrb.gmra.mxu2 %vm215_vm1, %v3156_v54  ;;  %2312 = vmatmul.msk.f32.vlgmr.msra.gmra.mxu3 %vm215_vm1, %v3156_v54 }
 0x2ef   :  { %2313 = vmatmul.msk.f32.vlgmr.msra.gmra.mxu0 %vm215_vm1, %v3156_v54  ;;  %1036 = vmatpush.msrb.mxu2 %v2979_v9 }
 0x2f0   :  { %1110 = vmatpush.msra.mxu3 %v2953_v1  ;;  %1130 = vmatpush.msra.mxu0 %v2986_v12  ;;  %v816_v12 = vld [vmem:[#allocation2 + $0x8] sm:$0x3] }
 0x2f1   :  { %1037 = vmatpush.msrb.mxu2 %v2998_v14 }
 0x2f2   :  { %1111 = vmatpush.msra.mxu3 %v2959_v3  ;;  %1131 = vmatpush.msra.mxu0 %v2991_v13 }
 0x2f3   :  { %1038 = vmatpush.msrb.mxu2 %v3015_v18 }
 0x2f4   :  { %1112 = vmatpush.msra.mxu3 %v2967_v5  ;;  %1132 = vmatpush.msra.mxu0 %v3009_v17 }
 0x2f5   :  { %1039 = vmatpush.msrb.mxu2 %v3029_v20 }
 0x2f6   :  { %1113 = vmatpush.msra.mxu3 %v2974_v8  ;;  %1133 = vmatpush.msra.mxu0 %v3023_v19 }
 0x36c   :  { %v813_v7 = vpop.f32.mrf.mxu0 }
 0x36d   :  { %v814_v21 = vadd.f32 %v3081_v50, %v813_v7 }
 0x371   :  { %v773_v1 = vpop.f32.mrf.mxu2  ;;  %v793_v55 = vpop.f32.mrf.mxu3 }
 0x372   :  { %v817_v57 = vadd.f32 %v816_v12, %v773_v1  ;;  %v838_v3 = vadd.f32 %v837_v56, %v793_v55 }
 0x374   :  { %v2314_v58 = vmul.f32 -1.442695, %v817_v57  ;;  %v2315_v13 = vmul.f32 -1.442695, %v838_v3 }
 0x376   :  { %2436 = vpow2.f32 %v2314_v58 }
 0x377   :  { %2438 = vpow2.f32 %v2315_v13 }
 0x37c   :  { %v2437_v59 = vpop.eup %2436 }
 0x37d   :  { %v2439_v5 = vpop.eup %2438  ;;  %v821_v60 = vadd.f32 1.0, %v2437_v59 }
 0x37e   :  { %v842_v17 = vadd.f32 1.0, %v2439_v5 }
 0x37f   :  { %2440 = vrcp.f32 %v821_v60  ;;  %v833_v0 = vand.u32 2147483648, %v821_v60  ;;  %v831_v6 = vand.u32 2147483647, %v821_v60  ;;  %vm827_vm7 = vweird.f32 %v821_v60 }
 0x380   :  { %2442 = vrcp.f32 %v842_v17  ;;  %v854_v26 = vand.u32 2147483648, %v842_v17  ;;  %vm848_vm12 = vweird.f32 %v842_v17  ;;  %v852_v27 = vand.u32 2147483647, %v842_v17 }
 0x381   :  { %v834_v16 = vor.u32 1.1754944e-38, %v833_v0  ;;  %vm832_vm9 = vcmp.eq.f32.partialorder %v831_v6, 8.507059e+37 }
 0x382   :  { %v855_v31 = vor.u32 1.1754944e-38, %v854_v26  ;;  %vm853_vm14 = vcmp.eq.f32.partialorder %v852_v27, 8.507059e+37  ;;  %v1065_v26 = vld [vmem:[#allocation3 + $0xc] sm:$0x3] }
 0x385   :  { %v2441_v61 = vpop.eup %2440 }
 0x386   :  { %v2443_v8 = vpop.eup %2442  ;;  %v823_v62 = vmul.f32 %v2441_v61, %v821_v60  ;;  %vm828_vm6 = vweird.f32 %v2441_v61 }
 0x387   :  { %v844_v19 = vmul.f32 %v2443_v8, %v842_v17  ;;  %vm829_vm8 = vmor %vm827_vm7, %vm828_vm6  ;;  %vm849_vm11 = vweird.f32 %v2443_v8 }
 0x388   :  { %v824_v63 = vsub.f32 1.0, %v823_v62  ;;  %vm850_vm13 = vmor %vm848_vm12, %vm849_vm11 }
 0x389   :  { %v845_v2 = vsub.f32 1.0, %v844_v19  ;;  %v972_v19 = vld [vmem:[#allocation4 + $0xa] sm:$0x3] }
 0x38a   :  { %v825_v4 = vmul.f32 %v2441_v61, %v824_v63 }
 0x38b   :  { %v846_v10 = vmul.f32 %v2443_v8, %v845_v2 }
 0x38c   :  { %v826_v11 = vadd.f32 %v2441_v61, %v825_v4 }
 0x38d   :  { %v847_v24 = vadd.f32 %v2443_v8, %v846_v10 }
 0x38e   :  { %v830_v22 = vsel %vm829_vm8, %v2441_v61, %v826_v11 }
 0x38f   :  { %v835_v23 = vsel %vm832_vm9, %v834_v16, %v830_v22  ;;  %v851_v30 = vsel %vm850_vm13, %v2443_v8, %v847_v24  ;;  %v3218_v22 = vld [vmem:[#allocation5] sm:$0xff]  ;;  %v1044_v24 = vld [vmem:[#allocation2 + $0xc] sm:$0x3] }
 0x390   :  { %v859_v25 = vmul.f32 %v835_v23, %v814_v21  ;;  %v856_v32 = vsel %vm853_vm14, %v855_v31, %v851_v30 }
 0x391   :  { %v862_v33 = vsub.f32 1.0, %v856_v32  ;;  %v864_v36 = vmul.f32 %v856_v32, %v3156_v54 }
 0x392   :  { %v860_v29 = vadd.f32 %v859_v25, %v858_v28 }
 0x394   :  { %2444 = vtanh.f32 %v860_v29 }
 0x39a   :  { %v2445_v34 = vpop.eup %2444 }
 0x39b   :  { %v863_v35 = vmul.f32 %v2445_v34, %v862_v33 }
 0x39d   :  { %v3180_v37 = vadd.f32 %v864_v36, %v863_v35  ;;  %v3225_v35 = vld [vmem:[%s3536_s17] ss:$0 sm:$0xff] }
 0x39f   :  { %866 = vst.msk [vmem:[#allocation5 + $0x8] sm:$0x3] %vm409_vm10, %v3180_v37  ;;  %2316 = vmatmul.msk.f32.vlgmr.msra.gmra.mxu1 %vm215_vm1, %v3180_v37  ;;  %2317 = vmatmul.msk.f32.vlgmr.msra.gmra.mxu2 %vm215_vm1, %v3180_v37 }
 0x3a0   :  { %2318 = vmatmul.msk.f32.vlgmr.msrb.gmra.mxu3 %vm215_vm1, %v3180_v37  ;;  %1150 = vmatpush.msra.mxu1 %v2979_v9  ;;  %v1215_v9 = vld [vmem:[%s3530_s11 + $0x18] sm:$0xff] }
 0x3a1   :  { %1238 = vmatpush.msra.mxu2 %v1215_v9  ;;  %v1251_v9 = vld [vmem:[%s3531_s12] sm:$0xff] }
 0x3a2   :  { %1151 = vmatpush.msra.mxu1 %v2998_v14  ;;  %v1214_v14 = vld [vmem:[%s3530_s11 + $0x10] sm:$0xff] }
 0x3a3   :  { %1239 = vmatpush.msra.mxu2 %v1214_v14  ;;  %v1284_v14 = vld [vmem:[%s3532_s13] sm:$0xff] }
 0x3a4   :  { %1152 = vmatpush.msra.mxu1 %v3015_v18 }
 0x3a6   :  { %1153 = vmatpush.msra.mxu1 %v3029_v20  ;;  %v1213_v20 = vld [vmem:[%s3530_s11 + $0x8] sm:$0xff] }
 0x3a7   :  { %1240 = vmatpush.msra.mxu2 %v1213_v20  ;;  %v3273_v20 = vld [vmem:[%s3533_s14] sm:$0xff] }
 0x3a9   :  { %1241 = vmatpush.msra.mxu2 %v1212_v49 }
 0x41c   :  { %v887_v38 = vpop.f32.mrf.mxu1 }
 0x41d   :  { %v931_v40 = vadd.f32 %v930_v39, %v887_v38  ;;  %v1254_v38 = vld [vmem:[%s3531_s12 + $0x18] sm:$0xff] }
 0x41e   :  { %v1287_v39 = vld [vmem:[%s3532_s13 + $0x18] sm:$0xff]  ;;  %1271 = vmatpush.msrb.mxu3 %v1254_v38 }
 0x41f   :  { %v2319_v41 = vmul.f32 -1.442695, %v931_v40  ;;  %v3236_v40 = vld [vmem:[%s3533_s14 + $0x18] sm:$0xff] }
 0x421   :  { %2446 = vpow2.f32 %v2319_v41 }
 0x422   :  { %v907_v42 = vpop.f32.mrf.mxu2 }
 0x423   :  { %v952_v44 = vadd.f32 %v951_v43, %v907_v42  ;;  %v927_v56 = vpop.f32.mrf.mxu3  ;;  %v1253_v42 = vld [vmem:[%s3531_s12 + $0x10] sm:$0xff] }
 0x424   :  { %v928_v59 = vadd.f32 %v3081_v50, %v927_v56  ;;  %v1286_v43 = vld [vmem:[%s3532_s13 + $0x10] sm:$0xff]  ;;  %1272 = vmatpush.msrb.mxu3 %v1253_v42 }
 0x425   :  { %v2320_v45 = vmul.f32 -1.442695, %v952_v44  ;;  %v3248_v44 = vld [vmem:[%s3533_s14 + $0x10] sm:$0xff] }
 0x426   :  { %v3336_v42 = vld [vmem:[#allocation17 + $0x18] sm:$0xff] }
 0x427   :  { %v2447_v46 = vpop.eup %2446  ;;  %2448 = vpow2.f32 %v2320_v45  ;;  %v1252_v45 = vld [vmem:[%s3531_s12 + $0x8] sm:$0xff] }
 0x428   :  { %v935_v47 = vadd.f32 1.0, %v2447_v46  ;;  %v1285_v46 = vld [vmem:[%s3532_s13 + $0x8] sm:$0xff]  ;;  %1273 = vmatpush.msrb.mxu3 %v1252_v45 }
 0x42a   :  { %2450 = vrcp.f32 %v935_v47  ;;  %v947_v54 = vand.u32 2147483648, %v935_v47  ;;  %v945_v12 = vand.u32 2147483647, %v935_v47  ;;  %vm941_vm0 = vweird.f32 %v935_v47  ;;  %1274 = vmatpush.msrb.mxu3 %v1251_v9 }
 0x42c   :  { %v948_v58 = vor.u32 1.1754944e-38, %v947_v54  ;;  %vm946_vm3 = vcmp.eq.f32.partialorder %v945_v12, 8.507059e+37 }
 0x42d   :  { %v2449_v18 = vpop.eup %2448 }
 0x42e   :  { %v956_v48 = vadd.f32 1.0, %v2449_v18 }
 0x430   :  { %v2451_v51 = vpop.eup %2450  ;;  %2452 = vrcp.f32 %v956_v48  ;;  %v968_v61 = vand.u32 2147483648, %v956_v48  ;;  %v966_v62 = vand.u32 2147483647, %v956_v48  ;;  %vm962_vm5 = vweird.f32 %v956_v48 }
 0x431   :  { %v937_v52 = vmul.f32 %v2451_v51, %v935_v47  ;;  %vm942_vm15 = vweird.f32 %v2451_v51  ;;  %v3261_v47 = vld [vmem:[%s3533_s14 + $0x8] sm:$0xff] }
 0x432   :  { %vm943_vm2 = vmor %vm941_vm0, %vm942_vm15  ;;  %v969_v2 = vor.u32 1.1754944e-38, %v968_v61  ;;  %vm967_vm7 = vcmp.eq.f32.partialorder %v966_v62, 8.507059e+37  ;;  %v1086_v61 = vld [vmem:[#allocation4 + $0xc] sm:$0x3] }
 0x433   :  { %v938_v53 = vsub.f32 1.0, %v937_v52 }
 0x435   :  { %v939_v1 = vmul.f32 %v2451_v51, %v938_v53 }
 0x436   :  { %v2453_v55 = vpop.eup %2452 }
 0x437   :  { %v958_v57 = vmul.f32 %v2453_v55, %v956_v48  ;;  %v940_v3 = vadd.f32 %v2451_v51, %v939_v1  ;;  %vm963_vm4 = vweird.f32 %v2453_v55 }
 0x438   :  { %vm964_vm6 = vmor %vm962_vm5, %vm963_vm4 }
 0x439   :  { %v959_v13 = vsub.f32 1.0, %v958_v57  ;;  %v944_v5 = vsel %vm943_vm2, %v2451_v51, %v940_v3 }
 0x43a   :  { %v949_v60 = vsel %vm946_vm3, %v948_v58, %v944_v5 }
 0x43b   :  { %v960_v17 = vmul.f32 %v2453_v55, %v959_v13  ;;  %v973_v8 = vmul.f32 %v949_v60, %v928_v59 }
 0x43d   :  { %v961_v63 = vadd.f32 %v2453_v55, %v960_v17  ;;  %v974_v0 = vadd.f32 %v973_v8, %v972_v19 }
 0x43f   :  { %v965_v4 = vsel %vm964_vm6, %v2453_v55, %v961_v63  ;;  %2454 = vtanh.f32 %v974_v0 }
 0x440   :  { %v970_v6 = vsel %vm967_vm7, %v969_v2, %v965_v4 }
 0x441   :  { %v976_v7 = vsub.f32 1.0, %v970_v6  ;;  %v978_v16 = vmul.f32 %v970_v6, %v3180_v37 }
 0x445   :  { %v2455_v10 = vpop.eup %2454 }
 0x446   :  { %v977_v11 = vmul.f32 %v2455_v10, %v976_v7  ;;  %v3281_v7 = vld [vmem:[#allocation15 + $0x18] sm:$0xff]  ;;  %v3291_v10 = vld [vmem:[#allocation15 + $0x10] sm:$0xff] }
 0x448   :  { %v3208_v21 = vadd.f32 %v978_v16, %v977_v11  ;;  %v3296_v11 = vld [vmem:[#allocation15 + $0x8] sm:$0xff]  ;;  %v3304_v16 = vld [vmem:[#allocation15] sm:$0xff] }
 0x44a   :  { %980 = vst.msk [vmem:[#allocation5 + $0xa] sm:$0x3] %vm409_vm10, %v3208_v21  ;;  %2321 = vmatmul.msk.f32.vlgmr.msrb.gmra.mxu0 %vm215_vm1, %v3208_v21  ;;  %2322 = vmatmul.msk.f32.vlgmr.msrb.gmra.mxu1 %vm215_vm1, %v3208_v21 }
 0x44b   :  { %2323 = vmatmul.msk.f32.vlgmr.msrb.gmra.mxu2 %vm215_vm1, %v3208_v21  ;;  %1304 = vmatpush.msrb.mxu0 %v1287_v39 }
 0x44c   :  { %1342 = vmatpush.msrb.mxu1 %v3236_v40  ;;  %1385 = vmatpush.msrb.mxu2 %v3336_v42 }
 0x44d   :  { %1305 = vmatpush.msrb.mxu0 %v1286_v43  ;;  %v3338_v43 = vld [vmem:[#allocation17 + $0x10] sm:$0xff] }
 0x44e   :  { %1343 = vmatpush.msrb.mxu1 %v3248_v44  ;;  %1386 = vmatpush.msrb.mxu2 %v3338_v43 }
 0x44f   :  { %1306 = vmatpush.msrb.mxu0 %v1285_v46 }
 0x450   :  { %1344 = vmatpush.msrb.mxu1 %v3261_v47 }
 0x451   :  { %1307 = vmatpush.msrb.mxu0 %v1284_v14 }
 0x452   :  { %1345 = vmatpush.msrb.mxu1 %v3273_v20 }
 0x453   :  { %2331 = vmatmul.msk.f32.vlgmr.msra.gmra.mxu2 %vm215_vm1, %v3218_v22 }
 0x4c7   :  { %v1001_v23 = vpop.f32.mrf.mxu0  ;;  %v1021_v25 = vpop.f32.mrf.mxu1 }
 0x4c8   :  { %v1045_v27 = vadd.f32 %v1044_v24, %v1001_v23  ;;  %v1066_v28 = vadd.f32 %v1065_v26, %v1021_v25  ;;  %v1179_v23 = vld [vmem:[#allocation3 + $0xe] sm:$0x3]  ;;  %v3322_v25 = vld [vmem:[%s3538_s19] ss:$0 sm:$0xff] }
 0x4ca   :  { %v2324_v29 = vmul.f32 -1.442695, %v1045_v27  ;;  %v2325_v30 = vmul.f32 -1.442695, %v1066_v28  ;;  %v1158_v27 = vld [vmem:[#allocation2 + $0xe] sm:$0x3] }
 0x4cc   :  { %2456 = vpow2.f32 %v2324_v29 }
 0x4cd   :  { %2458 = vpow2.f32 %v2325_v30 }
 0x4ce   :  { %v1041_v31 = vpop.f32.mrf.mxu2 }
 0x4cf   :  { %v1042_v3 = vadd.f32 %v3081_v50, %v1041_v31 }
 0x4d2   :  { %v2457_v32 = vpop.eup %2456 }
 0x4d3   :  { %v2459_v33 = vpop.eup %2458  ;;  %v1049_v34 = vadd.f32 1.0, %v2457_v32 }
 0x4d4   :  { %v1070_v36 = vadd.f32 1.0, %v2459_v33  ;;  %v3329_v33 = vld [vmem:[%s3537_s18] ss:$0 sm:$0xff] }
 0x4d5   :  { %2460 = vrcp.f32 %v1049_v34  ;;  %v1061_v54 = vand.u32 2147483648, %v1049_v34  ;;  %v1059_v12 = vand.u32 2147483647, %v1049_v34  ;;  %vm1055_vm9 = vweird.f32 %v1049_v34 }
 0x4d6   :  { %2462 = vrcp.f32 %v1070_v36  ;;  %v1243_v37 = vpop.f32.mrf.mxu2  ;;  %v1082_v5 = vand.u32 2147483648, %v1070_v36  ;;  %vm1076_vm14 = vweird.f32 %v1070_v36  ;;  %v1080_v17 = vand.u32 2147483647, %v1070_v36 }
 0x4d7   :  { %v1244_v41 = vadd.f32 %v3225_v35, %v1243_v37  ;;  %v1062_v57 = vor.u32 1.1754944e-38, %v1061_v54  ;;  %vm1060_vm12 = vcmp.eq.f32.partialorder %v1059_v12, 8.507059e+37 }
 0x4d8   :  { %v1083_v19 = vor.u32 1.1754944e-38, %v1082_v5  ;;  %vm1081_vm0 = vcmp.eq.f32.partialorder %v1080_v17, 8.507059e+37  ;;  %v1200_v17 = vld [vmem:[#allocation4 + $0xe] sm:$0x3] }
 0x4d9   :  { %1249 = vst.msk [vmem:[#allocation2] sm:$0xff] %vm215_vm1, %v1244_v41 }
 0x4db   :  { %v2461_v18 = vpop.eup %2460 }
 0x4dc   :  { %v2463_v48 = vpop.eup %2462  ;;  %v1051_v49 = vmul.f32 %v2461_v18, %v1049_v34  ;;  %vm1056_vm8 = vweird.f32 %v2461_v18 }
 0x4dd   :  { %v1072_v51 = vmul.f32 %v2463_v48, %v1070_v36  ;;  %vm1057_vm11 = vmor %vm1055_vm9, %vm1056_vm8  ;;  %vm1077_vm13 = vweird.f32 %v2463_v48 }
 0x4de   :  { %v1052_v52 = vsub.f32 1.0, %v1051_v49  ;;  %vm1078_vm15 = vmor %vm1076_vm14, %vm1077_vm13  ;;  %v3349_v49 = vld [vmem:[#allocation17] sm:$0xff] }
 0x4df   :  { %v1073_v53 = vsub.f32 1.0, %v1072_v51 }
 0x4e0   :  { %v1053_v1 = vmul.f32 %v2461_v18, %v1052_v52 }
 0x4e1   :  { %v1074_v55 = vmul.f32 %v2463_v48, %v1073_v53 }
 0x4e2   :  { %v1054_v56 = vadd.f32 %v2461_v18, %v1053_v1 }
 0x4e3   :  { %v1075_v13 = vadd.f32 %v2463_v48, %v1074_v55 }
 0x4e4   :  { %v1058_v58 = vsel %vm1057_vm11, %v2461_v18, %v1054_v56  ;;  %v2556_v56 = vld [vmem:[#allocation14] ss:$0 sm:$0xff] }
 0x4e5   :  { %v1063_v59 = vsel %vm1060_vm12, %v1062_v57, %v1058_v58  ;;  %v1079_v62 = vsel %vm1078_vm15, %v2463_v48, %v1075_v13  ;;  %v3347_v48 = vld [vmem:[#allocation17 + $0x8] sm:$0xff] }
 0x4e6   :  { %v1087_v60 = vmul.f32 %v1063_v59, %v1042_v3  ;;  %v1084_v63 = vsel %vm1081_vm0, %v1083_v19, %v1079_v62  ;;  %1387 = vmatpush.msrb.mxu2 %v3347_v48 }
 0x4e7   :  { %v1090_v0 = vsub.f32 1.0, %v1084_v63  ;;  %v1092_v4 = vmul.f32 %v1084_v63, %v3208_v21 }
 0x4e8   :  { %v1088_v8 = vadd.f32 %v1087_v60, %v1086_v61  ;;  %1388 = vmatpush.msrb.mxu2 %v3349_v49 }
 0x4ea   :  { %2464 = vtanh.f32 %v1088_v8  ;;  %1573 = vmatpush.msra.mxu2 %v3236_v40 }
 0x4ec   :  { %1574 = vmatpush.msra.mxu2 %v3248_v44 }
 0x4ee   :  { %1575 = vmatpush.msra.mxu2 %v3261_v47 }
 0x4f0   :  { %v2465_v2 = vpop.eup %2464  ;;  %1576 = vmatpush.msra.mxu2 %v3273_v20 }
 0x4f1   :  { %v1091_v50 = vmul.f32 %v2465_v2, %v1090_v0 }
 0x4f3   :  { %v3279_v6 = vadd.f32 %v1092_v4, %v1091_v50 }
 0x4f5   :  { %1094 = vst.msk [vmem:[#allocation5 + $0xc] sm:$0x3] %vm409_vm10, %v3279_v6  ;;  %2326 = vmatmul.msk.f32.vlgmr.msra.gmra.mxu3 %vm215_vm1, %v3279_v6  ;;  %2327 = vmatmul.msk.f32.vlgmr.msra.gmra.mxu0 %vm215_vm1, %v3279_v6 }
 0x4f6   :  { %2328 = vmatmul.msk.f32.vlgmr.msra.gmra.mxu1 %vm215_vm1, %v3279_v6  ;;  %1459 = vmatpush.msra.mxu3 %v3236_v40 }
 0x4f7   :  { %1362 = vmatpush.msra.mxu1 %v3281_v7  ;;  %1479 = vmatpush.msra.mxu0 %v3281_v7 }
 0x4f8   :  { %1460 = vmatpush.msra.mxu3 %v3248_v44 }
 0x4f9   :  { %1363 = vmatpush.msra.mxu1 %v3291_v10  ;;  %1480 = vmatpush.msra.mxu0 %v3291_v10 }
 0x4fa   :  { %1461 = vmatpush.msra.mxu3 %v3261_v47 }
 0x4fb   :  { %1364 = vmatpush.msra.mxu1 %v3296_v11  ;;  %1481 = vmatpush.msra.mxu0 %v3296_v11 }
 0x4fc   :  { %1462 = vmatpush.msra.mxu3 %v3273_v20 }
 0x4fd   :  { %2333 = vmatmul.msk.f32.vlgmr.msrb.gmra.mxu3 %vm215_vm1, %v3218_v22  ;;  %2335 = vmatmul.msk.f32.vlgmr.msrb.gmra.mxu0 %vm215_vm1, %v3218_v22 }
 0x4fe   :  { %1346 = vmatmul.f32.vlgmr.msrb.gmra.mxu1 %v2794_v15  ;;  %1482 = vmatpush.msra.mxu0 %v3304_v16 }
 0x4ff   :  { %1365 = vmatpush.msra.mxu1 %v3304_v16  ;;  %1593 = vmatpush.msrb.mxu3 %v3281_v7 }
 0x500   :  { %1613 = vmatpush.msrb.mxu0 %v3336_v42 }
 0x501   :  { %1594 = vmatpush.msrb.mxu3 %v3291_v10  ;;  %1499 = vmatpush.msrb.mxu1 %v3336_v42 }
 0x502   :  { %1614 = vmatpush.msrb.mxu0 %v3338_v43 }
 0x503   :  { %1595 = vmatpush.msrb.mxu3 %v3296_v11  ;;  %1500 = vmatpush.msrb.mxu1 %v3338_v43 }
 0x504   :  { %1615 = vmatpush.msrb.mxu0 %v3347_v48 }
 0x505   :  { %1596 = vmatpush.msrb.mxu3 %v3304_v16  ;;  %1501 = vmatpush.msrb.mxu1 %v3347_v48 }
 0x506   :  { %1366 = vmatmul.f32.vlgmr.msra.gmra.mxu1 %v2794_v15  ;;  %1616 = vmatpush.msrb.mxu0 %v3349_v49 }
 0x507   :  { %1502 = vmatpush.msrb.mxu1 %v3349_v49 }
 0x509   :  { %1687 = vmatpush.msra.mxu1 %v3236_v40 }
 0x50b   :  { %1688 = vmatpush.msra.mxu1 %v3248_v44 }
 0x50d   :  { %1689 = vmatpush.msra.mxu1 %v3261_v47 }
 0x50f   :  { %1690 = vmatpush.msra.mxu1 %v3273_v20 }
 0x572   :  { %v1135_v21 = vpop.f32.mrf.mxu0 }
 0x573   :  { %v1180_v24 = vadd.f32 %v1179_v23, %v1135_v21  ;;  %v1155_v1 = vpop.f32.mrf.mxu1  ;;  %v1393_v23 = vld [vmem:[#allocation2] sm:$0x3] }
 0x574   :  { %v1156_v57 = vadd.f32 %v2556_v56, %v1155_v1 }
 0x575   :  { %v2330_v22 = vmul.f32 -1.442695, %v1180_v24 }
 0x577   :  { %2466 = vpow2.f32 %v2330_v22 }
 0x578   :  { %v1115_v26 = vpop.f32.mrf.mxu3 }
 0x579   :  { %v1159_v28 = vadd.f32 %v1158_v27, %v1115_v26 }
 0x57a   :  { %v1309_v29 = vpop.f32.mrf.mxu0 }
 0x57b   :  { %v2329_v30 = vmul.f32 -1.442695, %v1159_v28  ;;  %v1310_v31 = vadd.f32 %v3322_v25, %v1309_v29 }
 0x57d   :  { %v2467_v32 = vpop.eup %2466  ;;  %2468 = vpow2.f32 %v2329_v30  ;;  %1315 = vst.msk [vmem:[#allocation4] sm:$0xff] %vm215_vm1, %v1310_v31 }
 0x57e   :  { %v3331_v34 = vadd.f32 1.0, %v2467_v32 }
 0x580   :  { %v1276_v36 = vpop.f32.mrf.mxu3  ;;  %2470 = vrcp.f32 %v3331_v34  ;;  %v1196_v59 = vand.u32 2147483648, %v3331_v34  ;;  %vm1190_vm7 = vweird.f32 %v3331_v34  ;;  %v1194_v60 = vand.u32 2147483647, %v3331_v34 }
 0x581   :  { %v1277_v37 = vadd.f32 %v3329_v33, %v1276_v36 }
 0x582   :  { %v1197_v62 = vor.u32 1.1754944e-38, %v1196_v59  ;;  %vm1195_vm9 = vcmp.eq.f32.partialorder %v1194_v60, 8.507059e+37 }
 0x583   :  { %v2469_v38 = vpop.eup %2468  ;;  %1282 = vst.msk [vmem:[#allocation3] sm:$0xff] %vm215_vm1, %v1277_v37 }
 0x584   :  { %v1163_v39 = vadd.f32 1.0, %v2469_v38 }
 0x586   :  { %2472 = vrcp.f32 %v1163_v39  ;;  %v2471_v41 = vpop.eup %2470  ;;  %v1175_v51 = vand.u32 2147483648, %v1163_v39  ;;  %v1173_v53 = vand.u32 2147483647, %v1163_v39  ;;  %vm1169_vm3 = vweird.f32 %v1163_v39 }
 0x587   :  { %v1186_v45 = vmul.f32 %v2471_v41, %v3331_v34  ;;  %vm1191_vm6 = vweird.f32 %v2471_v41 }
 0x588   :  { %v1176_v55 = vor.u32 1.1754944e-38, %v1175_v51  ;;  %vm1174_vm5 = vcmp.eq.f32.partialorder %v1173_v53, 8.507059e+37  ;;  %vm1192_vm8 = vmor %vm1190_vm7, %vm1191_vm6 }
 0x589   :  { %v1187_v14 = vsub.f32 1.0, %v1186_v45 }
 0x58a   :  { %v1414_v27 = vld [vmem:[#allocation3] sm:$0x3] }
 0x58b   :  { %v1188_v54 = vmul.f32 %v2471_v41, %v1187_v14 }
 0x58c   :  { %v2473_v46 = vpop.eup %2472 }
 0x58d   :  { %v1165_v9 = vmul.f32 %v2473_v46, %v1163_v39  ;;  %vm1170_vm2 = vweird.f32 %v2473_v46  ;;  %v1189_v58 = vadd.f32 %v2471_v41, %v1188_v54 }
 0x58e   :  { %vm1171_vm4 = vmor %vm1169_vm3, %vm1170_vm2 }
 0x58f   :  { %v1166_v18 = vsub.f32 1.0, %v1165_v9  ;;  %v1193_v8 = vsel %vm1192_vm8, %v2471_v41, %v1189_v58 }
 0x590   :  { %v1198_v19 = vsel %vm1195_vm9, %v1197_v62, %v1193_v8 }
 0x591   :  { %v1167_v52 = vmul.f32 %v2473_v46, %v1166_v18  ;;  %v1204_v63 = vsub.f32 1.0, %v1198_v19  ;;  %v1206_v2 = vmul.f32 %v1198_v19, %v3279_v6  ;;  %v1347_v6 = vpop.f32.mrf.mxu1 }
 0x592   :  { %v1394_v24 = vadd.f32 %v1393_v23, %v1347_v6 }
 0x593   :  { %v1168_v12 = vadd.f32 %v2473_v46, %v1167_v52 }
 0x594   :  { %v2337_v22 = vmul.f32 -1.442695, %v1394_v24  ;;  %v1507_v24 = vld [vmem:[#allocation2 + $0x2] sm:$0x3] }
 0x595   :  { %v1172_v3 = vsel %vm1171_vm4, %v2473_v46, %v1168_v12 }
 0x596   :  { %v1177_v13 = vsel %vm1174_vm5, %v1176_v55, %v1172_v3 }
 0x597   :  { %v1201_v5 = vmul.f32 %v1177_v13, %v1156_v57 }
 0x599   :  { %v1202_v61 = vadd.f32 %v1201_v5, %v1200_v17  ;;  %v1367_v26 = vpop.f32.mrf.mxu1  ;;  %v1435_v5 = vld [vmem:[#allocation4] sm:$0x3] }
 0x59a   :  { %v1415_v28 = vadd.f32 %v1414_v27, %v1367_v26 }
 0x59b   :  { %2474 = vtanh.f32 %v1202_v61 }
 0x59c   :  { %2476 = vpow2.f32 %v2337_v22  ;;  %v2338_v29 = vmul.f32 -1.442695, %v1415_v28 }
 0x59e   :  { %2478 = vpow2.f32 %v2338_v29 }
 0x5a1   :  { %v2475_v0 = vpop.eup %2474 }
 0x5a2   :  { %v1205_v50 = vmul.f32 %v2475_v0, %v1204_v63  ;;  %v2477_v30 = vpop.eup %2476 }
 0x5a4   :  { %v1207_v4 = vadd.f32 %v1206_v2, %v1205_v50  ;;  %v2479_v31 = vpop.eup %2478 }
 0x5a5   :  { %v1419_v32 = vadd.f32 1.0, %v2479_v31 }
 0x5a6   :  { %1208 = vst.msk [vmem:[#allocation5 + $0xe] sm:$0x3] %vm409_vm10, %v1207_v4 }
 0x5a7   :  { %1209 = vst.msk [vmem:[#allocation19] sm:$0x3] %vm409_vm10, %v1207_v4  ;;  %v1431_v58 = vand.u32 2147483648, %v1419_v32  ;;  %vm1425_vm0 = vweird.f32 %v1419_v32  ;;  %v1429_v59 = vand.u32 2147483647, %v1419_v32 }
 0x5a8   :  { %v1528_v4 = vld [vmem:[#allocation3 + $0x2] sm:$0x3] }
 0x5a9   :  { %v1432_v61 = vor.u32 1.1754944e-38, %v1431_v58  ;;  %vm1430_vm3 = vcmp.eq.f32.partialorder %v1429_v59, 8.507059e+37 }
 0x5ad   :  { %v1211_v21 = vld [vmem:[#allocation5 + $0x8] sm:$0xff] }
 0x5ae   :  { %2332 = vmatmul.msk.f32.gmra.mxu2 %vm215_vm1, %v1211_v21  ;;  %2334 = vmatmul.msk.f32.gmra.mxu3 %vm215_vm1, %v1211_v21 }
 0x5af   :  { %2336 = vmatmul.msk.f32.gmra.mxu0 %vm215_vm1, %v1211_v21 }
 0x5b6   :  { %1389 = vmatmul.f32.vlgmr.msrb.gmra.mxu2 %v2794_v15  ;;  %v1398_v15 = vadd.f32 1.0, %v2477_v30 }
 0x5b7   :  { %1707 = vmatpush.msrb.mxu2 %v3281_v7 }
 0x5b8   :  { %2480 = vrcp.f32 %v1398_v15  ;;  %v1410_v54 = vand.u32 2147483648, %v1398_v15  ;;  %vm1404_vm12 = vweird.f32 %v1398_v15  ;;  %v1408_v1 = vand.u32 2147483647, %v1398_v15 }
 0x5b9   :  { %1708 = vmatpush.msrb.mxu2 %v3291_v10  ;;  %2482 = vrcp.f32 %v1419_v32 }
 0x5ba   :  { %vm1409_vm14 = vcmp.eq.f32.partialorder %v1408_v1, 8.507059e+37 }
 0x5bb   :  { %1709 = vmatpush.msrb.mxu2 %v3296_v11 }
 0x5bd   :  { %1710 = vmatpush.msrb.mxu2 %v3304_v16 }
 0x5be   :  { %v2481_v34 = vpop.eup %2480 }
 0x5bf   :  { %v1400_v36 = vmul.f32 %v2481_v34, %v1398_v15  ;;  %v2483_v37 = vpop.eup %2482  ;;  %vm1405_vm11 = vweird.f32 %v2481_v34 }
 0x5c0   :  { %v1421_v45 = vmul.f32 %v2483_v37, %v1419_v32  ;;  %vm1406_vm13 = vmor %vm1404_vm12, %vm1405_vm11  ;;  %vm1426_vm15 = vweird.f32 %v2483_v37 }
 0x5c1   :  { %v1401_v39 = vsub.f32 1.0, %v1400_v36  ;;  %vm1427_vm2 = vmor %vm1425_vm0, %vm1426_vm15 }
 0x5c2   :  { %v1422_v52 = vsub.f32 1.0, %v1421_v45 }
 0x5c3   :  { %v1402_v46 = vmul.f32 %v2481_v34, %v1401_v39 }
 0x5c4   :  { %v1423_v12 = vmul.f32 %v2483_v37, %v1422_v52 }
 0x5c5   :  { %v1403_v53 = vadd.f32 %v2481_v34, %v1402_v46 }
 0x5c6   :  { %v1424_v57 = vadd.f32 %v2483_v37, %v1423_v12 }
 0x5c8   :  { %v1428_v17 = vsel %vm1427_vm2, %v2483_v37, %v1424_v57 }
 0x5c9   :  { %v1433_v8 = vsel %vm1430_vm3, %v1432_v61, %v1428_v17  ;;  %v1621_v17 = vld [vmem:[#allocation2 + $0x4] sm:$0x3] }
 0x5ca   :  { %v1439_v62 = vsub.f32 1.0, %v1433_v8  ;;  %v1441_v0 = vmul.f32 0.0, %v1433_v8  ;;  %v1642_v8 = vld [vmem:[#allocation3 + $0x4] sm:$0x3] }
 0x62c   :  { %v1312_v38 = vpop.f32.mrf.mxu0 }
 0x62d   :  { %v1313_v41 = vadd.f32 %v3322_v25, %v1312_v38  ;;  %v3388_v25 = vld [vmem:[%s3539_s20] ss:$0 sm:$0xff]  ;;  %s2795_s20 = smov [#allocation19]  }
 0x62e   :  { %s2265_s30 = sshll.u32 %s2795_s20, 4  ;;  %s2266_s30 = int_to_ptr.vmem [resolvable:$true] %s2265_s30 }
 0x62f   :  { %1316 = vst.msk [vmem:[#allocation4 + $0x8] sm:$0xff] %vm215_vm1, %v1313_v41 }
 0x631   :  { %v1246_v9 = vpop.f32.mrf.mxu2  ;;  %v1279_v14 = vpop.f32.mrf.mxu3 }
 0x632   :  { %v1247_v18 = vadd.f32 %v3225_v35, %v1246_v9  ;;  %v1280_v51 = vadd.f32 %v3329_v33, %v1279_v14  ;;  %v1407_v35 = vsel %vm1406_vm13, %v2481_v34, %v1403_v53  ;;  %v1411_v33 = vor.u32 1.1754944e-38, %v1410_v54 }
 0x634   :  { %1250 = vst.msk [vmem:[#allocation2 + $0x8] sm:$0xff] %vm215_vm1, %v1247_v18  ;;  %v1412_v3 = vsel %vm1409_vm14, %v1411_v33, %v1407_v35  ;;  %v1549_v35 = vld [vmem:[#allocation4 + $0x2] sm:$0x3] }
 0x635   :  { %1283 = vst.msk [vmem:[#allocation3 + $0x8] sm:$0xff] %vm215_vm1, %v1280_v51 }
 0x639   :  { %v1390_v55 = vpop.f32.mrf.mxu2 }
 0x63a   :  { %v1391_v56 = vadd.f32 %v3388_v25, %v1390_v55 }
 0x63c   :  { %v1436_v13 = vmul.f32 %v1412_v3, %v1391_v56 }
 0x63e   :  { %v1437_v60 = vadd.f32 %v1436_v13, %v1435_v5 }
 0x640   :  { %2484 = vtanh.f32 %v1437_v60 }
 0x646   :  { %v2485_v19 = vpop.eup %2484 }
 0x647   :  { %v1440_v63 = vmul.f32 %v2485_v19, %v1439_v62 }
 0x649   :  { %v3391_v2 = vadd.f32 %v1441_v0, %v1440_v63 }
 0x64b   :  { %1443 = vst.msk [vmem:[#allocation5] sm:$0x3] %vm409_vm10, %v3391_v2  ;;  %2339 = vmatmul.msk.f32.vlgmr.msra.gmra.mxu3 %vm215_vm1, %v3391_v2  ;;  %2340 = vmatmul.msk.f32.vlgmr.msra.gmra.mxu0 %vm215_vm1, %v3391_v2 }
 0x64c   :  { %2341 = vmatmul.msk.f32.vlgmr.msrb.gmra.mxu1 %vm215_vm1, %v3391_v2  ;;  %1727 = vmatpush.msra.mxu3 %v3336_v42 }
 0x64d   :  { %1801 = vmatpush.msra.mxu0 %v3236_v40  ;;  %1821 = vmatpush.msrb.mxu1 %v3281_v7 }
 0x64e   :  { %1728 = vmatpush.msra.mxu3 %v3338_v43 }
 0x64f   :  { %1802 = vmatpush.msra.mxu0 %v3248_v44  ;;  %1822 = vmatpush.msrb.mxu1 %v3291_v10 }
 0x650   :  { %1729 = vmatpush.msra.mxu3 %v3347_v48 }
 0x651   :  { %1803 = vmatpush.msra.mxu0 %v3261_v47  ;;  %1823 = vmatpush.msrb.mxu1 %v3296_v11 }
 0x652   :  { %1730 = vmatpush.msra.mxu3 %v3349_v49 }
 0x653   :  { %1804 = vmatpush.msra.mxu0 %v3273_v20  ;;  %1824 = vmatpush.msrb.mxu1 %v3304_v16 }
 0x6c8   :  { %v1484_v50 = vpop.f32.mrf.mxu0 }
 0x6c9   :  { %v1529_v21 = vadd.f32 %v1528_v4, %v1484_v50  ;;  %v1504_v46 = vpop.f32.mrf.mxu1 }
 0x6ca   :  { %v1505_v18 = vadd.f32 %v3388_v25, %v1504_v46 }
 0x6cb   :  { %v2343_v6 = vmul.f32 -1.442695, %v1529_v21 }
 0x6cd   :  { %2486 = vpow2.f32 %v2343_v6 }
 0x6ce   :  { %v1464_v23 = vpop.f32.mrf.mxu3 }
 0x6cf   :  { %v1508_v22 = vadd.f32 %v1507_v24, %v1464_v23 }
 0x6d1   :  { %v2342_v26 = vmul.f32 -1.442695, %v1508_v22 }
 0x6d3   :  { %v2487_v27 = vpop.eup %2486  ;;  %2488 = vpow2.f32 %v2342_v26 }
 0x6d4   :  { %v1533_v28 = vadd.f32 1.0, %v2487_v27 }
 0x6d6   :  { %2490 = vrcp.f32 %v1533_v28  ;;  %v1545_v54 = vand.u32 2147483648, %v1533_v28  ;;  %vm1539_vm9 = vweird.f32 %v1533_v28  ;;  %v1543_v12 = vand.u32 2147483647, %v1533_v28 }
 0x6d8   :  { %v1546_v56 = vor.u32 1.1754944e-38, %v1545_v54  ;;  %vm1544_vm12 = vcmp.eq.f32.partialorder %v1543_v12, 8.507059e+37 }
 0x6d9   :  { %v2489_v29 = vpop.eup %2488 }
 0x6da   :  { %v1512_v30 = vadd.f32 1.0, %v2489_v29 }
 0x6dc   :  { %2492 = vrcp.f32 %v1512_v30  ;;  %v2491_v15 = vpop.eup %2490  ;;  %v1524_v38 = vand.u32 2147483648, %v1512_v30  ;;  %v1522_v41 = vand.u32 2147483647, %v1512_v30  ;;  %vm1518_vm5 = vweird.f32 %v1512_v30 }
 0x6dd   :  { %v1535_v31 = vmul.f32 %v2491_v15, %v1533_v28  ;;  %vm1540_vm8 = vweird.f32 %v2491_v15 }
 0x6de   :  { %v1525_v14 = vor.u32 1.1754944e-38, %v1524_v38  ;;  %vm1523_vm7 = vcmp.eq.f32.partialorder %v1522_v41, 8.507059e+37  ;;  %vm1541_vm11 = vmor %vm1539_vm9, %vm1540_vm8 }
 0x6df   :  { %v1536_v36 = vsub.f32 1.0, %v1535_v31 }
 0x6e1   :  { %v1537_v45 = vmul.f32 %v2491_v15, %v1536_v36 }
 0x6e2   :  { %v2493_v32 = vpop.eup %2492 }
 0x6e3   :  { %v1514_v34 = vmul.f32 %v2493_v32, %v1512_v30  ;;  %vm1519_vm4 = vweird.f32 %v2493_v32  ;;  %v1538_v52 = vadd.f32 %v2491_v15, %v1537_v45 }
 0x6e4   :  { %vm1520_vm6 = vmor %vm1518_vm5, %vm1519_vm4 }
 0x6e5   :  { %v1515_v37 = vsub.f32 1.0, %v1514_v34  ;;  %v1542_v33 = vsel %vm1541_vm11, %v2491_v15, %v1538_v52 }
 0x6e6   :  { %v1547_v57 = vsel %vm1544_vm12, %v1546_v56, %v1542_v33  ;;  %v1735_v33 = vld [vmem:[#allocation2 + $0x6] sm:$0x3] }
 0x6e7   :  { %v1516_v39 = vmul.f32 %v2493_v32, %v1515_v37  ;;  %v1553_v3 = vsub.f32 1.0, %v1547_v57  ;;  %v1555_v59 = vmul.f32 %v1547_v57, %v3391_v2 }
 0x6e9   :  { %v1517_v9 = vadd.f32 %v2493_v32, %v1516_v39 }
 0x6eb   :  { %v1521_v51 = vsel %vm1520_vm6, %v2493_v32, %v1517_v9  ;;  %v1663_v9 = vld [vmem:[#allocation4 + $0x4] sm:$0x3] }
 0x6ec   :  { %v1526_v53 = vsel %vm1523_vm7, %v1525_v14, %v1521_v51 }
 0x6ed   :  { %v1550_v1 = vmul.f32 %v1526_v53, %v1505_v18 }
 0x6ef   :  { %v1551_v55 = vadd.f32 %v1550_v1, %v1549_v35 }
 0x6f1   :  { %2494 = vtanh.f32 %v1551_v55 }
 0x6f7   :  { %v2495_v58 = vpop.eup %2494 }
 0x6f8   :  { %v1554_v13 = vmul.f32 %v2495_v58, %v1553_v3  ;;  %v1756_v58 = vld [vmem:[#allocation3 + $0x6] sm:$0x3] }
 0x6fa   :  { %v3415_v5 = vadd.f32 %v1555_v59, %v1554_v13 }
 0x6fc   :  { %1557 = vst.msk [vmem:[#allocation5 + $0x2] sm:$0x3] %vm409_vm10, %v3415_v5  ;;  %2344 = vmatmul.msk.f32.vlgmr.msra.gmra.mxu2 %vm215_vm1, %v3415_v5  ;;  %2345 = vmatmul.msk.f32.vlgmr.msrb.gmra.mxu3 %vm215_vm1, %v3415_v5 }
 0x6fd   :  { %2346 = vmatmul.msk.f32.vlgmr.msrb.gmra.mxu0 %vm215_vm1, %v3415_v5  ;;  %1841 = vmatpush.msra.mxu2 %v3336_v42 }
 0x6fe   :  { %1915 = vmatpush.msrb.mxu3 %v3236_v40  ;;  %1935 = vmatpush.msrb.mxu0 %v3281_v7 }
 0x6ff   :  { %1842 = vmatpush.msra.mxu2 %v3338_v43 }
 0x700   :  { %1916 = vmatpush.msrb.mxu3 %v3248_v44  ;;  %1936 = vmatpush.msrb.mxu0 %v3291_v10 }
 0x701   :  { %1843 = vmatpush.msra.mxu2 %v3347_v48 }
 0x702   :  { %1917 = vmatpush.msrb.mxu3 %v3261_v47  ;;  %1937 = vmatpush.msrb.mxu0 %v3296_v11 }
 0x703   :  { %1844 = vmatpush.msra.mxu2 %v3349_v49 }
 0x704   :  { %1918 = vmatpush.msrb.mxu3 %v3273_v20  ;;  %1938 = vmatpush.msrb.mxu0 %v3304_v16 }
 0x77a   :  { %v1618_v15 = vpop.f32.mrf.mxu0 }
 0x77b   :  { %v1619_v36 = vadd.f32 %v3388_v25, %v1618_v15 }
 0x77f   :  { %v1578_v60 = vpop.f32.mrf.mxu2  ;;  %v1598_v61 = vpop.f32.mrf.mxu3 }
 0x780   :  { %v1622_v62 = vadd.f32 %v1621_v17, %v1578_v60  ;;  %v1643_v19 = vadd.f32 %v1642_v8, %v1598_v61 }
 0x782   :  { %v2347_v63 = vmul.f32 -1.442695, %v1622_v62  ;;  %v2348_v0 = vmul.f32 -1.442695, %v1643_v19 }
 0x784   :  { %2496 = vpow2.f32 %v2347_v63 }
 0x785   :  { %2498 = vpow2.f32 %v2348_v0 }
 0x78a   :  { %v2497_v2 = vpop.eup %2496 }
 0x78b   :  { %v2499_v50 = vpop.eup %2498  ;;  %v1626_v4 = vadd.f32 1.0, %v2497_v2 }
 0x78c   :  { %v1647_v21 = vadd.f32 1.0, %v2499_v50 }
 0x78d   :  { %2500 = vrcp.f32 %v1626_v4  ;;  %v1638_v27 = vand.u32 2147483648, %v1626_v4  ;;  %v1636_v30 = vand.u32 2147483647, %v1626_v4  ;;  %vm1632_vm14 = vweird.f32 %v1626_v4 }
 0x78e   :  { %2502 = vrcp.f32 %v1647_v21  ;;  %v1659_v45 = vand.u32 2147483648, %v1647_v21  ;;  %vm1653_vm3 = vweird.f32 %v1647_v21  ;;  %v1657_v46 = vand.u32 2147483647, %v1647_v21 }
 0x78f   :  { %v1639_v34 = vor.u32 1.1754944e-38, %v1638_v27  ;;  %vm1637_vm0 = vcmp.eq.f32.partialorder %v1636_v30, 8.507059e+37 }
 0x790   :  { %v1660_v51 = vor.u32 1.1754944e-38, %v1659_v45  ;;  %vm1658_vm5 = vcmp.eq.f32.partialorder %v1657_v46, 8.507059e+37 }
 0x793   :  { %v2501_v6 = vpop.eup %2500 }
 0x794   :  { %v2503_v23 = vpop.eup %2502  ;;  %v1628_v24 = vmul.f32 %v2501_v6, %v1626_v4  ;;  %vm1633_vm13 = vweird.f32 %v2501_v6 }
 0x795   :  { %v1649_v22 = vmul.f32 %v2503_v23, %v1647_v21  ;;  %vm1634_vm15 = vmor %vm1632_vm14, %vm1633_vm13  ;;  %vm1654_vm2 = vweird.f32 %v2503_v23 }
 0x796   :  { %v1629_v26 = vsub.f32 1.0, %v1628_v24  ;;  %vm1655_vm4 = vmor %vm1653_vm3, %vm1654_vm2 }
 0x797   :  { %v1650_v28 = vsub.f32 1.0, %v1649_v22 }
 0x798   :  { %v1630_v29 = vmul.f32 %v2501_v6, %v1629_v26 }
 0x799   :  { %v1651_v31 = vmul.f32 %v2503_v23, %v1650_v28 }
 0x79a   :  { %v1631_v32 = vadd.f32 %v2501_v6, %v1630_v29 }
 0x79b   :  { %v1652_v39 = vadd.f32 %v2503_v23, %v1651_v31  ;;  %v1777_v31 = vld [vmem:[#allocation4 + $0x6] sm:$0x3] }
 0x79c   :  { %v1635_v37 = vsel %vm1634_vm15, %v2501_v6, %v1631_v32 }
 0x79d   :  { %v1640_v38 = vsel %vm1637_vm0, %v1639_v34, %v1635_v37  ;;  %v1656_v18 = vsel %vm1655_vm4, %v2503_v23, %v1652_v39 }
 0x79e   :  { %v1664_v41 = vmul.f32 %v1640_v38, %v1619_v36  ;;  %v1661_v52 = vsel %vm1658_vm5, %v1660_v51, %v1656_v18  ;;  %v1870_v18 = vld [vmem:[#allocation3 + $0x8] sm:$0x3] }
 0x79f   :  { %v1667_v53 = vsub.f32 1.0, %v1661_v52  ;;  %v1669_v12 = vmul.f32 %v1661_v52, %v3415_v5 }
 0x7a0   :  { %v1665_v14 = vadd.f32 %v1664_v41, %v1663_v9 }
 0x7a2   :  { %2504 = vtanh.f32 %v1665_v14 }
 0x7a8   :  { %v2505_v54 = vpop.eup %2504 }
 0x7a9   :  { %v1668_v1 = vmul.f32 %v2505_v54, %v1667_v53 }
 0x7ab   :  { %v3439_v35 = vadd.f32 %v1669_v12, %v1668_v1 }
 0x7ad   :  { %1671 = vst.msk [vmem:[#allocation5 + $0x4] sm:$0x3] %vm409_vm10, %v3439_v35  ;;  %2349 = vmatmul.msk.f32.vlgmr.msra.gmra.mxu1 %vm215_vm1, %v3439_v35  ;;  %2350 = vmatmul.msk.f32.vlgmr.msrb.gmra.mxu2 %vm215_vm1, %v3439_v35 }
 0x7ae   :  { %2351 = vmatmul.msk.f32.vlgmr.msra.gmra.mxu3 %vm215_vm1, %v3439_v35  ;;  %1955 = vmatpush.msra.mxu1 %v3336_v42 }
 0x7af   :  { %2029 = vmatpush.msrb.mxu2 %v3236_v40  ;;  %2049 = vmatpush.msra.mxu3 %v3281_v7 }
 0x7b0   :  { %1956 = vmatpush.msra.mxu1 %v3338_v43 }
 0x7b1   :  { %2030 = vmatpush.msrb.mxu2 %v3248_v44  ;;  %2050 = vmatpush.msra.mxu3 %v3291_v10 }
 0x7b2   :  { %1957 = vmatpush.msra.mxu1 %v3347_v48 }
 0x7b3   :  { %2031 = vmatpush.msrb.mxu2 %v3261_v47  ;;  %2051 = vmatpush.msra.mxu3 %v3296_v11 }
 0x7b4   :  { %1958 = vmatpush.msra.mxu1 %v3349_v49 }
 0x7b5   :  { %2032 = vmatpush.msrb.mxu2 %v3273_v20  ;;  %2052 = vmatpush.msra.mxu3 %v3304_v16 }
 0x82a   :  { %v1692_v55 = vpop.f32.mrf.mxu1 }
 0x82b   :  { %v1736_v56 = vadd.f32 %v1735_v33, %v1692_v55 }
 0x82d   :  { %v2352_v57 = vmul.f32 -1.442695, %v1736_v56 }
 0x82f   :  { %2506 = vpow2.f32 %v2352_v57 }
 0x830   :  { %v1712_v3 = vpop.f32.mrf.mxu2 }
 0x831   :  { %v1757_v13 = vadd.f32 %v1756_v58, %v1712_v3  ;;  %v1732_v4 = vpop.f32.mrf.mxu3 }
 0x832   :  { %v1733_v22 = vadd.f32 %v3388_v25, %v1732_v4 }
 0x833   :  { %v2353_v59 = vmul.f32 -1.442695, %v1757_v13 }
 0x835   :  { %v2507_v5 = vpop.eup %2506  ;;  %2508 = vpow2.f32 %v2353_v59 }
 0x836   :  { %v1740_v60 = vadd.f32 1.0, %v2507_v5 }
 0x838   :  { %2510 = vrcp.f32 %v1740_v60  ;;  %v1752_v63 = vand.u32 2147483648, %v1740_v60  ;;  %v1750_v2 = vand.u32 2147483647, %v1740_v60  ;;  %vm1746_vm7 = vweird.f32 %v1740_v60 }
 0x83a   :  { %v1753_v23 = vor.u32 1.1754944e-38, %v1752_v63  ;;  %vm1751_vm9 = vcmp.eq.f32.partialorder %v1750_v2, 8.507059e+37 }
 0x83b   :  { %v2509_v17 = vpop.eup %2508 }
 0x83c   :  { %v1761_v61 = vadd.f32 1.0, %v2509_v17 }
 0x83e   :  { %v2511_v8 = vpop.eup %2510  ;;  %2512 = vrcp.f32 %v1761_v61  ;;  %v1773_v29 = vand.u32 2147483648, %v1761_v61  ;;  %v1771_v15 = vand.u32 2147483647, %v1761_v61  ;;  %vm1767_vm12 = vweird.f32 %v1761_v61 }
 0x83f   :  { %v1742_v62 = vmul.f32 %v2511_v8, %v1740_v60  ;;  %vm1747_vm6 = vweird.f32 %v2511_v8 }
 0x840   :  { %vm1748_vm8 = vmor %vm1746_vm7, %vm1747_vm6  ;;  %v1774_v36 = vor.u32 1.1754944e-38, %v1773_v29  ;;  %vm1772_vm14 = vcmp.eq.f32.partialorder %v1771_v15, 8.507059e+37 }
 0x841   :  { %v1743_v19 = vsub.f32 1.0, %v1742_v62 }
 0x843   :  { %v1744_v0 = vmul.f32 %v2511_v8, %v1743_v19 }
 0x844   :  { %v2513_v50 = vpop.eup %2512 }
 0x845   :  { %v1763_v21 = vmul.f32 %v2513_v50, %v1761_v61  ;;  %v1745_v6 = vadd.f32 %v2511_v8, %v1744_v0  ;;  %vm1768_vm11 = vweird.f32 %v2513_v50  ;;  %v1891_v0 = vld [vmem:[#allocation4 + $0x8] sm:$0x3] }
 0x846   :  { %vm1769_vm13 = vmor %vm1767_vm12, %vm1768_vm11 }
 0x847   :  { %v1764_v24 = vsub.f32 1.0, %v1763_v21  ;;  %v1749_v26 = vsel %vm1748_vm8, %v2511_v8, %v1745_v6 }
 0x848   :  { %v1754_v27 = vsel %vm1751_vm9, %v1753_v23, %v1749_v26 }
 0x849   :  { %v1765_v28 = vmul.f32 %v2513_v50, %v1764_v24  ;;  %v1778_v30 = vmul.f32 %v1754_v27, %v1733_v22 }
 0x84b   :  { %v1766_v32 = vadd.f32 %v2513_v50, %v1765_v28  ;;  %v1779_v34 = vadd.f32 %v1778_v30, %v1777_v31  ;;  %v1984_v28 = vld [vmem:[#allocation3 + $0xa] sm:$0x3]  ;;  %v1963_v31 = vld [vmem:[#allocation2 + $0xa] sm:$0x3] }
 0x84d   :  { %v1770_v37 = vsel %vm1769_vm13, %v2513_v50, %v1766_v32  ;;  %2514 = vtanh.f32 %v1779_v34 }
 0x84e   :  { %v1775_v38 = vsel %vm1772_vm14, %v1774_v36, %v1770_v37 }
 0x84f   :  { %v1781_v39 = vsub.f32 1.0, %v1775_v38  ;;  %v1783_v46 = vmul.f32 %v1775_v38, %v3439_v35 }
 0x853   :  { %v2515_v41 = vpop.eup %2514 }
 0x854   :  { %v1782_v45 = vmul.f32 %v2515_v41, %v1781_v39 }
 0x856   :  { %v3463_v9 = vadd.f32 %v1783_v46, %v1782_v45 }
 0x858   :  { %1785 = vst.msk [vmem:[#allocation5 + $0x6] sm:$0x3] %vm409_vm10, %v3463_v9  ;;  %2354 = vmatmul.msk.f32.vlgmr.msra.gmra.mxu0 %vm215_vm1, %v3463_v9  ;;  %2355 = vmatmul.msk.f32.vlgmr.msrb.gmra.mxu1 %vm215_vm1, %v3463_v9 }
 0x859   :  { %2356 = vmatmul.msk.f32.vlgmr.msra.gmra.mxu2 %vm215_vm1, %v3463_v9  ;;  %2069 = vmatpush.msra.mxu0 %v3336_v42 }
 0x85a   :  { %2143 = vmatpush.msrb.mxu1 %v3236_v40  ;;  %2163 = vmatpush.msra.mxu2 %v3281_v7  ;;  %v1849_v7 = vld [vmem:[#allocation2 + $0x8] sm:$0x3] }
 0x85b   :  { %2070 = vmatpush.msra.mxu0 %v3338_v43 }
 0x85c   :  { %2144 = vmatpush.msrb.mxu1 %v3248_v44  ;;  %2164 = vmatpush.msra.mxu2 %v3291_v10 }
 0x85d   :  { %2071 = vmatpush.msra.mxu0 %v3347_v48 }
 0x85e   :  { %2145 = vmatpush.msrb.mxu1 %v3261_v47  ;;  %2165 = vmatpush.msra.mxu2 %v3296_v11 }
 0x85f   :  { %2072 = vmatpush.msra.mxu0 %v3349_v49  ;;  %v2244_v14 = vld [vmem:[#allocation5] sm:$0xff] }
 0x860   :  { %2146 = vmatpush.msrb.mxu1 %v3273_v20  ;;  %2166 = vmatpush.msra.mxu2 %v3304_v16  ;;  %2246 = vst.msk [vmem:[#allocation18] sm:$0xff] %vm215_vm1, %v2244_v14 }
 0x8d5   :  { %v1806_v40 = vpop.f32.mrf.mxu0  ;;  %v1826_v44 = vpop.f32.mrf.mxu1 }
 0x8d6   :  { %v1850_v10 = vadd.f32 %v1849_v7, %v1806_v40  ;;  %v1871_v51 = vadd.f32 %v1870_v18, %v1826_v44 }
 0x8d8   :  { %v2357_v52 = vmul.f32 -1.442695, %v1850_v10  ;;  %v2358_v53 = vmul.f32 -1.442695, %v1871_v51 }
 0x8da   :  { %2516 = vpow2.f32 %v2357_v52 }
 0x8db   :  { %2518 = vpow2.f32 %v2358_v53 }
 0x8dc   :  { %v1846_v13 = vpop.f32.mrf.mxu2 }
 0x8dd   :  { %v1847_v60 = vadd.f32 %v3388_v25, %v1846_v13  ;;  %v2077_v13 = vld [vmem:[#allocation2 + $0xc] sm:$0x3] }
 0x8e0   :  { %v2517_v47 = vpop.eup %2516 }
 0x8e1   :  { %v2519_v11 = vpop.eup %2518  ;;  %v1854_v54 = vadd.f32 1.0, %v2517_v47 }
 0x8e2   :  { %v1875_v1 = vadd.f32 1.0, %v2519_v11 }
 0x8e3   :  { %2520 = vrcp.f32 %v1854_v54  ;;  %v1866_v56 = vand.u32 2147483648, %v1854_v54  ;;  %v1864_v3 = vand.u32 2147483647, %v1854_v54  ;;  %vm1860_vm0 = vweird.f32 %v1854_v54 }
 0x8e4   :  { %2522 = vrcp.f32 %v1875_v1  ;;  %v1887_v62 = vand.u32 2147483648, %v1875_v1  ;;  %vm1881_vm5 = vweird.f32 %v1875_v1  ;;  %v1885_v63 = vand.u32 2147483647, %v1875_v1 }
 0x8e5   :  { %v1867_v5 = vor.u32 1.1754944e-38, %v1866_v56  ;;  %vm1865_vm3 = vcmp.eq.f32.partialorder %v1864_v3, 8.507059e+37 }
 0x8e6   :  { %v1888_v4 = vor.u32 1.1754944e-38, %v1887_v62  ;;  %vm1886_vm7 = vcmp.eq.f32.partialorder %v1885_v63, 8.507059e+37 }
 0x8e9   :  { %v2521_v20 = vpop.eup %2520 }
 0x8ea   :  { %v2523_v16 = vpop.eup %2522  ;;  %v1856_v12 = vmul.f32 %v2521_v20, %v1854_v54  ;;  %vm1861_vm15 = vweird.f32 %v2521_v20 }
 0x8eb   :  { %v1877_v35 = vmul.f32 %v2523_v16, %v1875_v1  ;;  %vm1862_vm2 = vmor %vm1860_vm0, %vm1861_vm15  ;;  %vm1882_vm4 = vweird.f32 %v2523_v16  ;;  %v2005_v1 = vld [vmem:[#allocation4 + $0xa] sm:$0x3] }
 0x8ec   :  { %v1857_v55 = vsub.f32 1.0, %v1856_v12  ;;  %vm1883_vm6 = vmor %vm1881_vm5, %vm1882_vm4 }
 0x8ed   :  { %v1878_v33 = vsub.f32 1.0, %v1877_v35 }
 0x8ee   :  { %v1858_v57 = vmul.f32 %v2521_v20, %v1857_v55 }
 0x8ef   :  { %v1879_v58 = vmul.f32 %v2523_v16, %v1878_v33 }
 0x8f0   :  { %v1859_v59 = vadd.f32 %v2521_v20, %v1858_v57 }
 0x8f1   :  { %v1880_v61 = vadd.f32 %v2523_v16, %v1879_v58 }
 0x8f2   :  { %v1863_v17 = vsel %vm1862_vm2, %v2521_v20, %v1859_v59 }
 0x8f3   :  { %v1868_v8 = vsel %vm1865_vm3, %v1867_v5, %v1863_v17  ;;  %v1884_v50 = vsel %vm1883_vm6, %v2523_v16, %v1880_v61  ;;  %v2098_v5 = vld [vmem:[#allocation3 + $0xc] sm:$0x3] }
 0x8f4   :  { %v1892_v19 = vmul.f32 %v1868_v8, %v1847_v60  ;;  %v1889_v21 = vsel %vm1886_vm7, %v1888_v4, %v1884_v50 }
 0x8f5   :  { %v1895_v6 = vsub.f32 1.0, %v1889_v21  ;;  %v1897_v22 = vmul.f32 %v1889_v21, %v3463_v9 }
 0x8f6   :  { %v1893_v2 = vadd.f32 %v1892_v19, %v1891_v0 }
 0x8f8   :  { %2524 = vtanh.f32 %v1893_v2 }
 0x8fe   :  { %v2525_v23 = vpop.eup %2524 }
 0x8ff   :  { %v1896_v24 = vmul.f32 %v2525_v23, %v1895_v6 }
 0x901   :  { %v1898_v26 = vadd.f32 %v1897_v22, %v1896_v24 }
 0x903   :  { %1899 = vst.msk [vmem:[#allocation5 + $0x8] sm:$0x3] %vm409_vm10, %v1898_v26  ;;  %2359 = vmatmul.msk.f32.vlgmr.msrb.gmra.mxu3 %vm215_vm1, %v1898_v26  ;;  %2360 = vmatmul.msk.f32.vlgmr.msrb.gmra.mxu0 %vm215_vm1, %v1898_v26 }
 0x904   :  { %2361 = vmatmul.msk.f32.vlgmr.msra.gmra.mxu1 %vm215_vm1, %v1898_v26  ;;  %2183 = vmatpush.msrb.mxu3 %v3336_v42 }
 0x906   :  { %2184 = vmatpush.msrb.mxu3 %v3338_v43 }
 0x908   :  { %2185 = vmatpush.msrb.mxu3 %v3347_v48 }
 0x90a   :  { %2186 = vmatpush.msrb.mxu3 %v3349_v49 }
 0x980   :  { %v1940_v27 = vpop.f32.mrf.mxu0 }
 0x981   :  { %v1985_v29 = vadd.f32 %v1984_v28, %v1940_v27  ;;  %v1960_v7 = vpop.f32.mrf.mxu1 }
 0x982   :  { %v1961_v10 = vadd.f32 %v3388_v25, %v1960_v7  ;;  %v2191_v7 = vld [vmem:[#allocation2 + $0xe] sm:$0x3] }
 0x983   :  { %v2363_v30 = vmul.f32 -1.442695, %v1985_v29 }
 0x985   :  { %2526 = vpow2.f32 %v2363_v30 }
 0x986   :  { %v1920_v15 = vpop.f32.mrf.mxu3 }
 0x987   :  { %v1964_v32 = vadd.f32 %v1963_v31, %v1920_v15 }
 0x989   :  { %v2362_v34 = vmul.f32 -1.442695, %v1964_v32 }
 0x98b   :  { %v2527_v36 = vpop.eup %2526  ;;  %2528 = vpow2.f32 %v2362_v34 }
 0x98c   :  { %v1989_v37 = vadd.f32 1.0, %v2527_v36 }
 0x98e   :  { %2530 = vrcp.f32 %v1989_v37  ;;  %v2001_v47 = vand.u32 2147483648, %v1989_v37  ;;  %vm1995_vm14 = vweird.f32 %v1989_v37  ;;  %v1999_v54 = vand.u32 2147483647, %v1989_v37 }
 0x990   :  { %v2002_v12 = vor.u32 1.1754944e-38, %v2001_v47  ;;  %vm2000_vm0 = vcmp.eq.f32.partialorder %v1999_v54, 8.507059e+37 }
 0x991   :  { %v2529_v42 = vpop.eup %2528 }
 0x992   :  { %v1968_v38 = vadd.f32 1.0, %v2529_v42 }
 0x994   :  { %2532 = vrcp.f32 %v1968_v38  ;;  %v2531_v43 = vpop.eup %2530  ;;  %v1980_v46 = vand.u32 2147483648, %v1968_v38  ;;  %v1978_v14 = vand.u32 2147483647, %v1968_v38  ;;  %vm1974_vm9 = vweird.f32 %v1968_v38 }
 0x995   :  { %v1991_v48 = vmul.f32 %v2531_v43, %v1989_v37  ;;  %vm1996_vm13 = vweird.f32 %v2531_v43 }
 0x996   :  { %v1981_v18 = vor.u32 1.1754944e-38, %v1980_v46  ;;  %vm1979_vm12 = vcmp.eq.f32.partialorder %v1978_v14, 8.507059e+37  ;;  %vm1997_vm15 = vmor %vm1995_vm14, %vm1996_vm13 }
 0x997   :  { %v1992_v41 = vsub.f32 1.0, %v1991_v48 }
 0x999   :  { %v1993_v40 = vmul.f32 %v2531_v43, %v1992_v41 }
 0x99a   :  { %v2533_v39 = vpop.eup %2532 }
 0x99b   :  { %v1970_v49 = vmul.f32 %v2533_v39, %v1968_v38  ;;  %vm1975_vm8 = vweird.f32 %v2533_v39  ;;  %v1994_v52 = vadd.f32 %v2531_v43, %v1993_v40  ;;  %v2119_v38 = vld [vmem:[#allocation4 + $0xc] sm:$0x3] }
 0x99c   :  { %vm1976_vm11 = vmor %vm1974_vm9, %vm1975_vm8 }
 0x99d   :  { %v1971_v45 = vsub.f32 1.0, %v1970_v49  ;;  %v1998_v16 = vsel %vm1997_vm15, %v2531_v43, %v1994_v52 }
 0x99e   :  { %v2003_v35 = vsel %vm2000_vm0, %v2002_v12, %v1998_v16 }
 0x99f   :  { %v1972_v9 = vmul.f32 %v2533_v39, %v1971_v45  ;;  %v2009_v55 = vsub.f32 1.0, %v2003_v35  ;;  %v2011_v57 = vmul.f32 %v2003_v35, %v1898_v26 }
 0x9a1   :  { %v1973_v44 = vadd.f32 %v2533_v39, %v1972_v9 }
 0x9a3   :  { %v1977_v51 = vsel %vm1976_vm11, %v2533_v39, %v1973_v44 }
 0x9a4   :  { %v1982_v53 = vsel %vm1979_vm12, %v1981_v18, %v1977_v51  ;;  %v2212_v51 = vld [vmem:[#allocation3 + $0xe] sm:$0x3] }
 0x9a5   :  { %v2006_v11 = vmul.f32 %v1982_v53, %v1961_v10 }
 0x9a7   :  { %v2007_v20 = vadd.f32 %v2006_v11, %v2005_v1 }
 0x9a9   :  { %2534 = vtanh.f32 %v2007_v20 }
 0x9af   :  { %v2535_v33 = vpop.eup %2534 }
 0x9b0   :  { %v2010_v56 = vmul.f32 %v2535_v33, %v2009_v55 }
 0x9b2   :  { %v2012_v3 = vadd.f32 %v2011_v57, %v2010_v56 }
 0x9b4   :  { %2013 = vst.msk [vmem:[#allocation5 + $0xa] sm:$0x3] %vm409_vm10, %v2012_v3  ;;  %2364 = vmatmul.msk.f32.vlgmr.msrb.gmra.mxu2 %vm215_vm1, %v2012_v3  ;;  %2365 = vmatmul.msk.f32.vlgmr.msra.gmra.mxu3 %vm215_vm1, %v2012_v3 }
 0x9b5   :  { %2366 = vmatmul.msk.f32.vlgmr.msra.gmra.mxu0 %vm215_vm1, %v2012_v3 }
 0xa32   :  { %v2074_v27 = vpop.f32.mrf.mxu0 }
 0xa33   :  { %v2075_v15 = vadd.f32 %v3388_v25, %v2074_v27 }
 0xa37   :  { %v2034_v58 = vpop.f32.mrf.mxu2  ;;  %v2054_v59 = vpop.f32.mrf.mxu3 }
 0xa38   :  { %v2078_v60 = vadd.f32 %v2077_v13, %v2034_v58  ;;  %v2099_v17 = vadd.f32 %v2098_v5, %v2054_v59 }
 0xa3a   :  { %v2367_v61 = vmul.f32 -1.442695, %v2078_v60  ;;  %v2368_v8 = vmul.f32 -1.442695, %v2099_v17 }
 0xa3c   :  { %2536 = vpow2.f32 %v2367_v61 }
 0xa3d   :  { %2538 = vpow2.f32 %v2368_v8 }
 0xa42   :  { %v2537_v62 = vpop.eup %2536 }
 0xa43   :  { %v2539_v19 = vpop.eup %2538  ;;  %v2082_v63 = vadd.f32 1.0, %v2537_v62 }
 0xa44   :  { %v2103_v0 = vadd.f32 1.0, %v2539_v19 }
 0xa45   :  { %2540 = vrcp.f32 %v2082_v63  ;;  %v2094_v23 = vand.u32 2147483648, %v2082_v63  ;;  %v2092_v26 = vand.u32 2147483647, %v2082_v63  ;;  %vm2088_vm3 = vweird.f32 %v2082_v63 }
 0xa46   :  { %2542 = vrcp.f32 %v2103_v0  ;;  %v2115_v37 = vand.u32 2147483648, %v2103_v0  ;;  %vm2109_vm7 = vweird.f32 %v2103_v0  ;;  %v2113_v42 = vand.u32 2147483647, %v2103_v0 }
 0xa47   :  { %v2095_v30 = vor.u32 1.1754944e-38, %v2094_v23  ;;  %vm2093_vm5 = vcmp.eq.f32.partialorder %v2092_v26, 8.507059e+37 }
 0xa48   :  { %v2116_v39 = vor.u32 1.1754944e-38, %v2115_v37  ;;  %vm2114_vm9 = vcmp.eq.f32.partialorder %v2113_v42, 8.507059e+37 }
 0xa4b   :  { %v2541_v2 = vpop.eup %2540 }
 0xa4c   :  { %v2543_v50 = vpop.eup %2542  ;;  %v2084_v4 = vmul.f32 %v2541_v2, %v2082_v63  ;;  %vm2089_vm2 = vweird.f32 %v2541_v2  ;;  %v2233_v63 = vld [vmem:[#allocation4 + $0xe] sm:$0x3] }
 0xa4d   :  { %v2105_v21 = vmul.f32 %v2543_v50, %v2103_v0  ;;  %vm2090_vm4 = vmor %vm2088_vm3, %vm2089_vm2  ;;  %vm2110_vm6 = vweird.f32 %v2543_v50 }
 0xa4e   :  { %v2085_v6 = vsub.f32 1.0, %v2084_v4  ;;  %vm2111_vm8 = vmor %vm2109_vm7, %vm2110_vm6 }
 0xa4f   :  { %v2106_v24 = vsub.f32 1.0, %v2105_v21 }
 0xa50   :  { %v2086_v22 = vmul.f32 %v2541_v2, %v2085_v6 }
 0xa51   :  { %v2107_v28 = vmul.f32 %v2543_v50, %v2106_v24 }
 0xa52   :  { %v2087_v29 = vadd.f32 %v2541_v2, %v2086_v22 }
 0xa53   :  { %v2108_v34 = vadd.f32 %v2543_v50, %v2107_v28 }
 0xa54   :  { %v2091_v31 = vsel %vm2090_vm4, %v2541_v2, %v2087_v29 }
 0xa55   :  { %v2096_v32 = vsel %vm2093_vm5, %v2095_v30, %v2091_v31  ;;  %v2112_v48 = vsel %vm2111_vm8, %v2543_v50, %v2108_v34 }
 0xa56   :  { %v2120_v36 = vmul.f32 %v2096_v32, %v2075_v15  ;;  %v2117_v49 = vsel %vm2114_vm9, %v2116_v39, %v2112_v48 }
 0xa57   :  { %v2123_v41 = vsub.f32 1.0, %v2117_v49  ;;  %v2125_v9 = vmul.f32 %v2117_v49, %v2012_v3 }
 0xa58   :  { %v2121_v43 = vadd.f32 %v2120_v36, %v2119_v38 }
 0xa5a   :  { %2544 = vtanh.f32 %v2121_v43 }
 0xa60   :  { %v2545_v45 = vpop.eup %2544 }
 0xa61   :  { %v2124_v46 = vmul.f32 %v2545_v45, %v2123_v41 }
 0xa63   :  { %v2126_v14 = vadd.f32 %v2125_v9, %v2124_v46 }
 0xa65   :  { %2127 = vst.msk [vmem:[#allocation5 + $0xc] sm:$0x3] %vm409_vm10, %v2126_v14  ;;  %2369 = vmatmul.msk.f32.vlgmr.msrb.gmra.mxu1 %vm215_vm1, %v2126_v14  ;;  %2370 = vmatmul.msk.f32.vlgmr.msra.gmra.mxu2 %vm215_vm1, %v2126_v14 }
 0xa66   :  { %2371 = vmatmul.msk.f32.vlgmr.msrb.gmra.mxu3 %vm215_vm1, %v2126_v14 }
 0xae2   :  { %v2148_v40 = vpop.f32.mrf.mxu1 }
 0xae3   :  { %v2192_v44 = vadd.f32 %v2191_v7, %v2148_v40 }
 0xae5   :  { %v2372_v18 = vmul.f32 -1.442695, %v2192_v44 }
 0xae7   :  { %2546 = vpow2.f32 %v2372_v18 }
 0xae8   :  { %v2168_v10 = vpop.f32.mrf.mxu2 }
 0xae9   :  { %v2213_v52 = vadd.f32 %v2212_v51, %v2168_v10  ;;  %v2188_v57 = vpop.f32.mrf.mxu3 }
 0xaea   :  { %v2189_v5 = vadd.f32 %v3388_v25, %v2188_v57 }
 0xaeb   :  { %v2373_v53 = vmul.f32 -1.442695, %v2213_v52 }
 0xaed   :  { %v2547_v47 = vpop.eup %2546  ;;  %2548 = vpow2.f32 %v2373_v53 }
 0xaee   :  { %v2196_v11 = vadd.f32 1.0, %v2547_v47 }
 0xaf0   :  { %2550 = vrcp.f32 %v2196_v11  ;;  %v2208_v35 = vand.u32 2147483648, %v2196_v11  ;;  %v2206_v33 = vand.u32 2147483647, %v2196_v11  ;;  %vm2202_vm12 = vweird.f32 %v2196_v11 }
 0xaf2   :  { %v2209_v13 = vor.u32 1.1754944e-38, %v2208_v35  ;;  %vm2207_vm14 = vcmp.eq.f32.partialorder %v2206_v33, 8.507059e+37 }
 0xaf3   :  { %v2549_v54 = vpop.eup %2548 }
 0xaf4   :  { %v2217_v1 = vadd.f32 1.0, %v2549_v54 }
 0xaf6   :  { %v2551_v20 = vpop.eup %2550  ;;  %2552 = vrcp.f32 %v2217_v1  ;;  %v2229_v8 = vand.u32 2147483648, %v2217_v1  ;;  %v2227_v19 = vand.u32 2147483647, %v2217_v1  ;;  %vm2223_vm0 = vweird.f32 %v2217_v1 }
 0xaf7   :  { %v2198_v16 = vmul.f32 %v2551_v20, %v2196_v11  ;;  %vm2203_vm11 = vweird.f32 %v2551_v20 }
 0xaf8   :  { %vm2204_vm13 = vmor %vm2202_vm12, %vm2203_vm11  ;;  %v2230_v50 = vor.u32 1.1754944e-38, %v2229_v8  ;;  %vm2228_vm3 = vcmp.eq.f32.partialorder %v2227_v19, 8.507059e+37 }
 0xaf9   :  { %v2199_v12 = vsub.f32 1.0, %v2198_v16 }
 0xafb   :  { %v2200_v55 = vmul.f32 %v2551_v20, %v2199_v12 }
 0xafc   :  { %v2553_v56 = vpop.eup %2552 }
 0xafd   :  { %v2219_v3 = vmul.f32 %v2553_v56, %v2217_v1  ;;  %v2201_v58 = vadd.f32 %v2551_v20, %v2200_v55  ;;  %vm2224_vm15 = vweird.f32 %v2553_v56 }
 0xafe   :  { %vm2225_vm2 = vmor %vm2223_vm0, %vm2224_vm15 }
 0xaff   :  { %v2220_v59 = vsub.f32 1.0, %v2219_v3  ;;  %v2205_v60 = vsel %vm2204_vm13, %v2551_v20, %v2201_v58 }
 0xb00   :  { %v2210_v17 = vsel %vm2207_vm14, %v2209_v13, %v2205_v60 }
 0xb01   :  { %v2221_v61 = vmul.f32 %v2553_v56, %v2220_v59  ;;  %v2234_v62 = vmul.f32 %v2210_v17, %v2189_v5 }
 0xb03   :  { %v2222_v0 = vadd.f32 %v2553_v56, %v2221_v61  ;;  %v2235_v2 = vadd.f32 %v2234_v62, %v2233_v63 }
 0xb05   :  { %v2226_v4 = vsel %vm2225_vm2, %v2553_v56, %v2222_v0  ;;  %2554 = vtanh.f32 %v2235_v2 }
 0xb06   :  { %v2231_v21 = vsel %vm2228_vm3, %v2230_v50, %v2226_v4 }
 0xb07   :  { %v2237_v6 = vsub.f32 1.0, %v2231_v21  ;;  %v2239_v24 = vmul.f32 %v2231_v21, %v2126_v14 }
 0xb0b   :  { %v2555_v25 = vpop.eup %2554 }
 0xb0c   :  { %v2238_v23 = vmul.f32 %v2555_v25, %v2237_v6 }
 0xb0e   :  { %v2240_v22 = vadd.f32 %v2239_v24, %v2238_v23 }
 0xb10   :  { %2241 = vst.msk [vmem:[#allocation5 + $0xe] sm:$0x3] %vm409_vm10, %v2240_v22 }
 0xb11   :  { %2243 = vst.msk [vmem:[#allocation19 + $0x2] sm:$0x3] %vm409_vm10, %v2240_v22 }
 0xb12   :  { %2273 = dma.vmem_to_hbm [thread:$0]  %s2266_s30, 64, %s2268_s25, [#allocation20], %s2796_s0, %s2796_s0, %s2797_s10  }
 0xb17   :  { %v2245_v26 = vld [vmem:[#allocation5 + $0x8] sm:$0xff] }
 0xb18   :  { %2247 = vst.msk [vmem:[#allocation18 + $0x8] sm:$0xff] %vm215_vm1, %v2245_v26 }
 0xb19   :  { %2260 = dma.vmem_to_hbm [thread:$0]  %s2253_s7, 256, %s2255_s15, [#allocation8], %s2786_s24, %s2786_s24, %s2787_s6  }
 0xb1a   :  { %2781 = dma.done.wait [#allocation8], 256  }
 0xb1b   :  { %2782 = vsyncadd [#allocation8], 4294967040 }
 0xb1c   :  { %2783 = dma.done.wait [#allocation20], 64  }
 0xb1d   :  { %2784 = vsyncadd [#allocation20], 4294967232 }
 0xb1e   :  { %2282 = vsyncpa [#allocation7], 1 }
 0xb1f   :  { %2283 = vsyncpa [#allocation10], 1 }
 0xb20   :  { %2284 = vsyncpa [#allocation13], 1 }
 0xb21   :  { %2285 = vsyncpa [#allocation16], 1 }
 0xb22   :  { %2286 = vsyncpa [#allocation8], 1 }
 0xb23   :  { %2287 = vsyncpa [#allocation20], 1 }

</bundles_post_ra>
